<compile_context>
chip_gen: v7x
topology: tpu7x:2x2x1
jax: 0.10.0
libtpu: 0.0.40
codegen_flags: <defaults>
</compile_context>

<pallas_src>
import functools

import jax
import jax.numpy as jnp
from jax.experimental import pallas as pl
from jax.experimental.pallas import tpu as pltpu


def _encoder_layer_kernel(
    xq_ref, xkv_ref,
    wq_ref, bq_ref, wk_ref, bk_ref, wv_ref, bv_ref,
    wf_ref, bf_ref, g1_ref, be1_ref,
    w1_ref, b1_ref, w2_ref, b2_ref, g2_ref, be2_ref,
    out_ref, attn_ref,
    k_scr, v_scr, q_scr, ctx_scr,
    *, n_head, d_k, inv_temp, ln_eps):
  """Fused: QKV proj -> per-head SDPA -> fc -> add&norm -> FFN -> add&norm."""
  f32 = jnp.float32
  bf16 = jnp.bfloat16

  x = xq_ref[0]                      # (tq, D) f32 — q rows, also residual 1

  # --- K / V projections: ONCE per batch element (t == 0), cached head-split
  # --- in bf16 VMEM scratch that persists across the q-tile axis. ----------
  @pl.when(pl.program_id(1) == 0)
  def _project_kv():
    src = xkv_ref[0]                 # (Lk, D) bf16 (pre-cast in the wrapper)
    k_full = jnp.dot(src, wk_ref[...], preferred_element_type=f32) + bk_ref[0]
    for h in range(n_head):
      k_scr[h] = k_full[:, h * d_k:(h + 1) * d_k].astype(bf16)
    v_full = jnp.dot(src, wv_ref[...], preferred_element_type=f32) + bv_ref[0]
    for h in range(n_head):
      v_scr[h] = v_full[:, h * d_k:(h + 1) * d_k].astype(bf16)

  # --- Q projection: one full-width (tq, D) @ (D, D) MXU matmul. ------------
  q_full = (jnp.dot(x.astype(bf16), wq_ref[...], preferred_element_type=f32)
            + bq_ref[0]) * inv_temp          # fold 1/temperature into Q once
  for h in range(n_head):
    q_scr[h] = q_full[:, h * d_k:(h + 1) * d_k].astype(bf16)

  # --- Scaled dot-product attention, heads as the matmul batch dim. ---------
  scores = jnp.einsum('hqe,hke->hqk', q_scr[...], k_scr[...],
                      preferred_element_type=f32)           # (H, tq, Lk) f32
  m = jnp.max(scores, axis=-1, keepdims=True)
  e = jnp.exp(scores - m)
  attn = e * pl.reciprocal(jnp.sum(e, axis=-1, keepdims=True), approx=True)
  attn_ref[:, 0, :, :] = attn.astype(attn_ref.dtype)        # head-major write

  ctx = jnp.einsum('hqk,hke->hqe', attn.astype(bf16), v_scr[...],
                   preferred_element_type=f32)               # (H, tq, d_v) f32
  for h in range(n_head):                                    # concat heads
    ctx_scr[:, h * d_k:(h + 1) * d_k] = ctx[h].astype(bf16)

  # --- fc on the concatenated heads: single (tq, D) @ (D, D) matmul. --------
  proj = jnp.dot(ctx_scr[...], wf_ref[...], preferred_element_type=f32) + bf_ref[0]

  # --- Residual + LayerNorm 1 (f32). -----------------------------------------
  x1 = proj + x
  mu1 = jnp.mean(x1, axis=-1, keepdims=True)
  var1 = jnp.mean(jnp.square(x1 - mu1), axis=-1, keepdims=True)
  y1 = (x1 - mu1) * jax.lax.rsqrt(var1 + ln_eps) * g1_ref[0] + be1_ref[0]

  # --- Position-wise FFN (1x1 convs == per-token linears) with ReLU. --------
  hid = jnp.dot(y1.astype(bf16), w1_ref[...], preferred_element_type=f32) + b1_ref[0]
  hid = jnp.maximum(hid, 0.0)
  ffn = jnp.dot(hid.astype(bf16), w2_ref[...], preferred_element_type=f32) + b2_ref[0]

  # --- Residual + LayerNorm 2 (f32). -----------------------------------------
  x2 = ffn + y1
  mu2 = jnp.mean(x2, axis=-1, keepdims=True)
  var2 = jnp.mean(jnp.square(x2 - mu2), axis=-1, keepdims=True)
  out_ref[0] = (x2 - mu2) * jax.lax.rsqrt(var2 + ln_eps) * g2_ref[0] + be2_ref[0]


def encoder_layer(x, params, *, n_head, q_tile=128, attn_dtype=jnp.bfloat16,
                  vmem_limit_bytes=56 * 1024 * 1024):
  sz_b, seq_len, d_model = x.shape
  assert d_model % n_head == 0
  d_k = d_model // n_head
  d_inner = params["w1"].shape[1]
  inv_temp = 1.0 / (float(d_model) ** 0.5)   # temperature = sqrt(d_model)

  tq = min(q_tile, seq_len)
  # TODO(synk): pad seq_len / d_model to (8, 128)-friendly multiples for production shapes.
  assert seq_len % tq == 0
  n_qt = seq_len // tq

  bf16 = jnp.bfloat16
  # bf16 weights (halves weight HBM traffic).  The K/V copy of the input is
  # also shipped in bf16: the kernel only ever consumes it through a bf16 cast.
  wq = params["wq"].astype(bf16)
  wk = params["wk"].astype(bf16)
  wv = params["wv"].astype(bf16)
  wf = params["wf"].astype(bf16)
  w1 = params["w1"].astype(bf16)
  w2 = params["w2"].astype(bf16)
  x_kv = x.astype(bf16)

  kernel = functools.partial(_encoder_layer_kernel, n_head=n_head, d_k=d_k,
                             inv_temp=inv_temp, ln_eps=1e-5)

  attn_bytes = jnp.dtype(attn_dtype).itemsize
  flops = int(8 * sz_b * seq_len * d_model * d_model            # q,k,v,fc proj
              + 4 * sz_b * seq_len * seq_len * d_model          # scores + ctx
              + 4 * sz_b * seq_len * d_model * d_inner)         # FFN
  transcendentals = int(sz_b * n_head * seq_len * seq_len       # exp
                        + sz_b * n_head * seq_len               # reciprocal
                        + 2 * sz_b * seq_len)                   # rsqrt (LN)
  bytes_accessed = int(
      sz_b * seq_len * d_model * (4 + 2)                        # f32 q + bf16 kv input
      + sz_b * seq_len * d_model * 4                            # output
      + sz_b * n_head * seq_len * seq_len * attn_bytes          # attention weights
      + 2 * (4 * d_model * d_model + 2 * d_model * d_inner)     # bf16 weights
      + 4 * (9 * d_model + d_inner))                            # f32 biases / LN params

  def build(single_buffer_consts):
    if single_buffer_consts and hasattr(pl, "Buffered"):
      def const(shape):   # grid-invariant blocks: no double-buffering needed
        return pl.BlockSpec(shape, lambda b, t: (0, 0),
                            pipeline_mode=pl.Buffered(1))
    else:
      def const(shape):
        return pl.BlockSpec(shape, lambda b, t: (0, 0))

    in_specs = [
        pl.BlockSpec((1, tq, d_model), lambda b, t: (b, t, 0)),        # q rows (f32)
        pl.BlockSpec((1, seq_len, d_model), lambda b, t: (b, 0, 0)),   # K/V src (bf16)
        const((d_model, d_model)), const((1, d_model)),                # w_qs
        const((d_model, d_model)), const((1, d_model)),                # w_ks
        const((d_model, d_model)), const((1, d_model)),                # w_vs
        const((d_model, d_model)), const((1, d_model)),                # fc
        const((1, d_model)), const((1, d_model)),                      # layer_norm 1
        const((d_model, d_inner)), const((1, d_inner)),                # ffn w_1
        const((d_inner, d_model)), const((1, d_model)),                # ffn w_2
        const((1, d_model)), const((1, d_model)),                      # layer_norm 2
    ]
    out_specs = [
        pl.BlockSpec((1, tq, d_model), lambda b, t: (b, t, 0)),
        # Attention weights written head-major straight from the kernel: no
        # wrapper-side transpose of the (H*B, L, L) tensor through HBM.
        pl.BlockSpec((n_head, 1, tq, seq_len), lambda b, t: (0, b, t, 0)),
    ]
    out_shape = [
        jax.ShapeDtypeStruct((sz_b, seq_len, d_model), jnp.float32),
        jax.ShapeDtypeStruct((n_head, sz_b, seq_len, seq_len), attn_dtype),
    ]
    scratch_shapes = [
        pltpu.VMEM((n_head, seq_len, d_k), bf16),   # K cache (per batch elem)
        pltpu.VMEM((n_head, seq_len, d_k), bf16),   # V cache (per batch elem)
        pltpu.VMEM((n_head, tq, d_k), bf16),        # head-split Q (per tile)
        pltpu.VMEM((tq, d_model), bf16),            # concatenated attention ctx
    ]
    return pl.pallas_call(
        kernel,
        grid=(sz_b, n_qt),
        in_specs=in_specs,
        out_specs=out_specs,
        out_shape=out_shape,
        scratch_shapes=scratch_shapes,
        compiler_params=pltpu.CompilerParams(
            # K/V scratch is carried across the q-tile axis -> "arbitrary";
            # megacore sharding comes from the batch axis (sz_b >= 2).
            dimension_semantics=("parallel", "arbitrary"),
            vmem_limit_bytes=vmem_limit_bytes),
        cost_estimate=pl.CostEstimate(
            flops=flops, transcendentals=transcendentals,
            bytes_accessed=bytes_accessed),
    )

  operands = (x, x_kv,
              wq, params["bq"], wk, params["bk"], wv, params["bv"],
              wf, params["bf"], params["gamma1"], params["beta1"],
              w1, params["b1"], w2, params["b2"],
              params["gamma2"], params["beta2"])
  try:
    out, attn_hb = build(True)(*operands)
  except Exception:
    # Older jax without BlockSpec(pipeline_mode=...): fall back to the default
    # (double-buffered) specs for the grid-invariant weight blocks.
    out, attn_hb = build(False)(*operands)

  # PyTorch layout: (n_head * sz_b, len_q, len_k), index = h * sz_b + b.
  # The kernel already wrote head-major, so this reshape is free (no copy).
  attn = attn_hb.reshape(n_head * sz_b, seq_len, seq_len)
  return out, attn


def _reference(x, params, *, n_head):
  """Plain-JAX float32 reference mirroring the PyTorch EncoderLayer (eval mode)."""
  sz_b, L, D = x.shape
  d_k = D // n_head
  temperature = float(D) ** 0.5

  def layer_norm(t, g, b):
    mu = jnp.mean(t, axis=-1, keepdims=True)
    var = jnp.mean((t - mu) ** 2, axis=-1, keepdims=True)
    return (t - mu) / jnp.sqrt(var + 1e-5) * g + b

  q = x @ params["wq"] + params["bq"][0]
  k = x @ params["wk"] + params["bk"][0]
  v = x @ params["wv"] + params["bv"][0]

  def split(t):
    t = t.reshape(sz_b, L, n_head, d_k)
    return jnp.transpose(t, (2, 0, 1, 3)).reshape(-1, L, d_k)

  qh, kh, vh = split(q), split(k), split(v)
  scores = jnp.einsum("bqd,bkd->bqk", qh, kh) / temperature
  attn = jax.nn.softmax(scores, axis=-1)
  ctx = jnp.einsum("bqk,bkd->bqd", attn, vh)
  ctx = ctx.reshape(n_head, sz_b, L, d_k)
  ctx = jnp.transpose(ctx, (1, 2, 0, 3)).reshape(sz_b, L, D)
  y1 = layer_norm(ctx @ params["wf"] + params["bf"][0] + x,
                  params["gamma1"][0], params["beta1"][0])
  h = jax.nn.relu(y1 @ params["w1"] + params["b1"][0])
  f = h @ params["w2"] + params["b2"][0]
  y2 = layer_norm(f + y1, params["gamma2"][0], params["beta2"][0])
  return y2, attn


def init_params(key, d_model, d_inner, n_head):
  d_k = d_model // n_head
  ks = jax.random.split(key, 12)
  std_qkv = (2.0 / (d_model + d_k)) ** 0.5
  std_fc = (2.0 / (2.0 * d_model)) ** 0.5
  b_lin = 1.0 / (d_model ** 0.5)
  b_ffn2 = 1.0 / (d_inner ** 0.5)
  u = lambda k, shape, bound: jax.random.uniform(k, shape, jnp.float32, -bound, bound)
  return {
      "wq": std_qkv * jax.random.normal(ks[0], (d_model, d_model), jnp.float32),
      "wk": std_qkv * jax.random.normal(ks[1], (d_model, d_model), jnp.float32),
      "wv": std_qkv * jax.random.normal(ks[2], (d_model, d_model), jnp.float32),
      "wf": std_fc * jax.random.normal(ks[3], (d_model, d_model), jnp.float32),
      "bq": u(ks[4], (1, d_model), b_lin),
      "bk": u(ks[5], (1, d_model), b_lin),
      "bv": u(ks[6], (1, d_model), b_lin),
      "bf": u(ks[7], (1, d_model), b_lin),
      "gamma1": jnp.ones((1, d_model), jnp.float32),
      "beta1": jnp.zeros((1, d_model), jnp.float32),
      # Conv1d(kernel_size=1) weights stored as (d_in, d_out): y = x @ w + b.
      "w1": u(ks[8], (d_model, d_inner), b_lin),
      "b1": u(ks[9], (1, d_inner), b_lin),
      "w2": u(ks[10], (d_inner, d_model), b_ffn2),
      "b2": u(ks[11], (1, d_model), b_ffn2),
      "gamma2": jnp.ones((1, d_model), jnp.float32),
      "beta2": jnp.zeros((1, d_model), jnp.float32),
  }


if __name__ == "__main__":
  sz_b, seq_len, d_model, d_inner, n_head = 2, 8, 32, 64, 4

  key = jax.random.PRNGKey(0)
  kx, kp = jax.random.split(key)
  x = jax.random.normal(kx, (sz_b, seq_len, d_model), jnp.float32)
  params = init_params(kp, d_model, d_inner, n_head)

  out, attn = encoder_layer(x, params, n_head=n_head)
  out = jax.block_until_ready(out)
  attn = jax.block_until_ready(attn)

  ref_out, ref_attn = _reference(x, params, n_head=n_head)
  assert out.shape == (sz_b, seq_len, d_model)
  assert attn.shape == (n_head * sz_b, seq_len, seq_len)
  attn_f32 = attn.astype(jnp.float32)
  # bf16-MXU kernel (bf16 attn output) vs float32 reference: loose tolerances.
  assert jnp.allclose(attn_f32, ref_attn, atol=5e-2, rtol=5e-2), \
      float(jnp.max(jnp.abs(attn_f32 - ref_attn)))
  assert jnp.allclose(out, ref_out, atol=1.5e-1, rtol=1e-1), \
      float(jnp.max(jnp.abs(out - ref_out)))

  print("KERNEL_OK")
</pallas_src>

<mosaic_0001>
module attributes {stable_mosaic.version = 11 : i64} {
  func.func @_encoder_layer_kernel(%arg0: i32, %arg1: i32, %arg2: memref<1x8x32xf32, #tpu.memory_space<vmem>>, %arg3: memref<1x8x32xbf16, #tpu.memory_space<vmem>>, %arg4: memref<32x32xbf16, #tpu.memory_space<vmem>>, %arg5: memref<1x32xf32, #tpu.memory_space<vmem>>, %arg6: memref<32x32xbf16, #tpu.memory_space<vmem>>, %arg7: memref<1x32xf32, #tpu.memory_space<vmem>>, %arg8: memref<32x32xbf16, #tpu.memory_space<vmem>>, %arg9: memref<1x32xf32, #tpu.memory_space<vmem>>, %arg10: memref<32x32xbf16, #tpu.memory_space<vmem>>, %arg11: memref<1x32xf32, #tpu.memory_space<vmem>>, %arg12: memref<1x32xf32, #tpu.memory_space<vmem>>, %arg13: memref<1x32xf32, #tpu.memory_space<vmem>>, %arg14: memref<32x64xbf16, #tpu.memory_space<vmem>>, %arg15: memref<1x64xf32, #tpu.memory_space<vmem>>, %arg16: memref<64x32xbf16, #tpu.memory_space<vmem>>, %arg17: memref<1x32xf32, #tpu.memory_space<vmem>>, %arg18: memref<1x32xf32, #tpu.memory_space<vmem>>, %arg19: memref<1x32xf32, #tpu.memory_space<vmem>>, %arg20: memref<1x8x32xf32, #tpu.memory_space<vmem>>, %arg21: memref<4x1x8x8xbf16, #tpu.memory_space<vmem>>, %arg22: memref<4x8x8xbf16, #tpu.memory_space<vmem>>, %arg23: memref<4x8x8xbf16, #tpu.memory_space<vmem>>, %arg24: memref<4x8x8xbf16, #tpu.memory_space<vmem>>, %arg25: memref<8x32xbf16, #tpu.memory_space<vmem>>) attributes {dimension_semantics = [#tpu.dimension_semantics<parallel>, #tpu.dimension_semantics<arbitrary>], iteration_bounds = array<i64: 2, 1>, scalar_prefetch = 0 : i64, scratch_operands = 4 : i64, tpu.core_type = #tpu.core_type<tc>, window_params = [{transform_indices = @transform_0, window_bounds = array<i64: 1, 8, 32>}, {transform_indices = @transform_1, window_bounds = array<i64: 1, 8, 32>}, {pipeline_mode = #tpu.pipeline_mode<synchronous>, transform_indices = @transform_2, window_bounds = array<i64: 32, 32>}, {pipeline_mode = #tpu.pipeline_mode<synchronous>, transform_indices = @transform_3, window_bounds = array<i64: 1, 32>}, {pipeline_mode = #tpu.pipeline_mode<synchronous>, transform_indices = @transform_4, window_bounds = array<i64: 32, 32>}, {pipeline_mode = #tpu.pipeline_mode<synchronous>, transform_indices = @transform_5, window_bounds = array<i64: 1, 32>}, {pipeline_mode = #tpu.pipeline_mode<synchronous>, transform_indices = @transform_6, window_bounds = array<i64: 32, 32>}, {pipeline_mode = #tpu.pipeline_mode<synchronous>, transform_indices = @transform_7, window_bounds = array<i64: 1, 32>}, {pipeline_mode = #tpu.pipeline_mode<synchronous>, transform_indices = @transform_8, window_bounds = array<i64: 32, 32>}, {pipeline_mode = #tpu.pipeline_mode<synchronous>, transform_indices = @transform_9, window_bounds = array<i64: 1, 32>}, {pipeline_mode = #tpu.pipeline_mode<synchronous>, transform_indices = @transform_10, window_bounds = array<i64: 1, 32>}, {pipeline_mode = #tpu.pipeline_mode<synchronous>, transform_indices = @transform_11, window_bounds = array<i64: 1, 32>}, {pipeline_mode = #tpu.pipeline_mode<synchronous>, transform_indices = @transform_12, window_bounds = array<i64: 32, 64>}, {pipeline_mode = #tpu.pipeline_mode<synchronous>, transform_indices = @transform_13, window_bounds = array<i64: 1, 64>}, {pipeline_mode = #tpu.pipeline_mode<synchronous>, transform_indices = @transform_14, window_bounds = array<i64: 64, 32>}, {pipeline_mode = #tpu.pipeline_mode<synchronous>, transform_indices = @transform_15, window_bounds = array<i64: 1, 32>}, {pipeline_mode = #tpu.pipeline_mode<synchronous>, transform_indices = @transform_16, window_bounds = array<i64: 1, 32>}, {pipeline_mode = #tpu.pipeline_mode<synchronous>, transform_indices = @transform_17, window_bounds = array<i64: 1, 32>}, {transform_indices = @transform_18, window_bounds = array<i64: 1, 8, 32>}, {transform_indices = @transform_19, window_bounds = array<i64: 4, 1, 8, 8>}]} {
    %c0 = arith.constant 0 : index
    %c0_0 = arith.constant 0 : index
    %c0_1 = arith.constant 0 : index
    %0 = vector.load %arg2[%c0, %c0_0, %c0_1] : memref<1x8x32xf32, #tpu.memory_space<vmem>>, vector<1x8x32xf32>
    %1 = vector.shape_cast %0 : vector<1x8x32xf32> to vector<8x32xf32>
    %c0_i32 = arith.constant 0 : i32
    %2 = arith.cmpi eq, %arg1, %c0_i32 : i32
    %3 = arith.extui %2 : i1 to i32
    %c0_i32_2 = arith.constant 0 : i32
    %4 = arith.cmpi ne, %3, %c0_i32_2 : i32
    scf.if %4 {
      %c0_78 = arith.constant 0 : index
      %c0_79 = arith.constant 0 : index
      %c0_80 = arith.constant 0 : index
      %158 = vector.load %arg3[%c0_78, %c0_79, %c0_80] : memref<1x8x32xbf16, #tpu.memory_space<vmem>>, vector<1x8x32xbf16>
      %159 = vector.shape_cast %158 : vector<1x8x32xbf16> to vector<8x32xbf16>
      %c0_81 = arith.constant 0 : index
      %c0_82 = arith.constant 0 : index
      %160 = vector.load %arg6[%c0_81, %c0_82] : memref<32x32xbf16, #tpu.memory_space<vmem>>, vector<32x32xbf16>
      %cst_83 = arith.constant dense<0.000000e+00> : vector<8x32xf32>
      %161 = tpu.matmul %159, %160, %cst_83 {dimension_numbers = #tpu.dot_dimension_numbers<[1], [0], [0], [1], [0, 0, 1, 1], [], []>} : vector<8x32xbf16>, vector<32x32xbf16>, vector<8x32xf32> -> vector<8x32xf32>
      %c0_84 = arith.constant 0 : index
      %c0_85 = arith.constant 0 : index
      %162 = vector.load %arg7[%c0_84, %c0_85] : memref<1x32xf32, #tpu.memory_space<vmem>>, vector<1x32xf32>
      %163 = vector.shape_cast %162 : vector<1x32xf32> to vector<32xf32>
      %164 = vector.shape_cast %163 : vector<32xf32> to vector<1x32xf32>
      %165 = vector.broadcast %164 : vector<1x32xf32> to vector<8x32xf32>
      %166 = arith.addf %161, %165 : vector<8x32xf32>
      %167 = vector.extract_strided_slice %166 {offsets = [0, 0], sizes = [8, 8], strides = [1, 1]} : vector<8x32xf32> to vector<8x8xf32>
      %168 = arith.truncf %167 : vector<8x8xf32> to vector<8x8xbf16>
      %c0_86 = arith.constant 0 : index
      %c0_87 = arith.constant 0 : index
      %c0_88 = arith.constant 0 : index
      %169 = vector.load %arg22[%c0_86, %c0_87, %c0_88] : memref<4x8x8xbf16, #tpu.memory_space<vmem>>, vector<1x8x8xbf16>
      %170 = vector.shape_cast %169 : vector<1x8x8xbf16> to vector<8x8xbf16>
      %171 = vector.shape_cast %168 : vector<8x8xbf16> to vector<1x8x8xbf16>
      tpu.vector_store %arg22[%c0_86, %c0_87, %c0_88], %171 {strides = array<i32>} : memref<4x8x8xbf16, #tpu.memory_space<vmem>>, vector<1x8x8xbf16>,
      %172 = vector.extract_strided_slice %166 {offsets = [0, 8], sizes = [8, 8], strides = [1, 1]} : vector<8x32xf32> to vector<8x8xf32>
      %173 = arith.truncf %172 : vector<8x8xf32> to vector<8x8xbf16>
      %c1_89 = arith.constant 1 : index
      %c0_90 = arith.constant 0 : index
      %c0_91 = arith.constant 0 : index
      %174 = vector.load %arg22[%c1_89, %c0_90, %c0_91] : memref<4x8x8xbf16, #tpu.memory_space<vmem>>, vector<1x8x8xbf16>
      %175 = vector.shape_cast %174 : vector<1x8x8xbf16> to vector<8x8xbf16>
      %176 = vector.shape_cast %173 : vector<8x8xbf16> to vector<1x8x8xbf16>
      tpu.vector_store %arg22[%c1_89, %c0_90, %c0_91], %176 {strides = array<i32>} : memref<4x8x8xbf16, #tpu.memory_space<vmem>>, vector<1x8x8xbf16>,
      %177 = vector.extract_strided_slice %166 {offsets = [0, 16], sizes = [8, 8], strides = [1, 1]} : vector<8x32xf32> to vector<8x8xf32>
      %178 = arith.truncf %177 : vector<8x8xf32> to vector<8x8xbf16>
      %c2_92 = arith.constant 2 : index
      %c0_93 = arith.constant 0 : index
      %c0_94 = arith.constant 0 : index
      %179 = vector.load %arg22[%c2_92, %c0_93, %c0_94] : memref<4x8x8xbf16, #tpu.memory_space<vmem>>, vector<1x8x8xbf16>
      %180 = vector.shape_cast %179 : vector<1x8x8xbf16> to vector<8x8xbf16>
      %181 = vector.shape_cast %178 : vector<8x8xbf16> to vector<1x8x8xbf16>
      tpu.vector_store %arg22[%c2_92, %c0_93, %c0_94], %181 {strides = array<i32>} : memref<4x8x8xbf16, #tpu.memory_space<vmem>>, vector<1x8x8xbf16>,
      %182 = vector.extract_strided_slice %166 {offsets = [0, 24], sizes = [8, 8], strides = [1, 1]} : vector<8x32xf32> to vector<8x8xf32>
      %183 = arith.truncf %182 : vector<8x8xf32> to vector<8x8xbf16>
      %c3_95 = arith.constant 3 : index
      %c0_96 = arith.constant 0 : index
      %c0_97 = arith.constant 0 : index
      %184 = vector.load %arg22[%c3_95, %c0_96, %c0_97] : memref<4x8x8xbf16, #tpu.memory_space<vmem>>, vector<1x8x8xbf16>
      %185 = vector.shape_cast %184 : vector<1x8x8xbf16> to vector<8x8xbf16>
      %186 = vector.shape_cast %183 : vector<8x8xbf16> to vector<1x8x8xbf16>
      tpu.vector_store %arg22[%c3_95, %c0_96, %c0_97], %186 {strides = array<i32>} : memref<4x8x8xbf16, #tpu.memory_space<vmem>>, vector<1x8x8xbf16>,
      %c0_98 = arith.constant 0 : index
      %c0_99 = arith.constant 0 : index
      %187 = vector.load %arg8[%c0_98, %c0_99] : memref<32x32xbf16, #tpu.memory_space<vmem>>, vector<32x32xbf16>
      %cst_100 = arith.constant dense<0.000000e+00> : vector<8x32xf32>
      %188 = tpu.matmul %159, %187, %cst_100 {dimension_numbers = #tpu.dot_dimension_numbers<[1], [0], [0], [1], [0, 0, 1, 1], [], []>} : vector<8x32xbf16>, vector<32x32xbf16>, vector<8x32xf32> -> vector<8x32xf32>
      %c0_101 = arith.constant 0 : index
      %c0_102 = arith.constant 0 : index
      %189 = vector.load %arg9[%c0_101, %c0_102] : memref<1x32xf32, #tpu.memory_space<vmem>>, vector<1x32xf32>
      %190 = vector.shape_cast %189 : vector<1x32xf32> to vector<32xf32>
      %191 = vector.shape_cast %190 : vector<32xf32> to vector<1x32xf32>
      %192 = vector.broadcast %191 : vector<1x32xf32> to vector<8x32xf32>
      %193 = arith.addf %188, %192 : vector<8x32xf32>
      %194 = vector.extract_strided_slice %193 {offsets = [0, 0], sizes = [8, 8], strides = [1, 1]} : vector<8x32xf32> to vector<8x8xf32>
      %195 = arith.truncf %194 : vector<8x8xf32> to vector<8x8xbf16>
      %c0_103 = arith.constant 0 : index
      %c0_104 = arith.constant 0 : index
      %c0_105 = arith.constant 0 : index
      %196 = vector.load %arg23[%c0_103, %c0_104, %c0_105] : memref<4x8x8xbf16, #tpu.memory_space<vmem>>, vector<1x8x8xbf16>
      %197 = vector.shape_cast %196 : vector<1x8x8xbf16> to vector<8x8xbf16>
      %198 = vector.shape_cast %195 : vector<8x8xbf16> to vector<1x8x8xbf16>
      tpu.vector_store %arg23[%c0_103, %c0_104, %c0_105], %198 {strides = array<i32>} : memref<4x8x8xbf16, #tpu.memory_space<vmem>>, vector<1x8x8xbf16>,
      %199 = vector.extract_strided_slice %193 {offsets = [0, 8], sizes = [8, 8], strides = [1, 1]} : vector<8x32xf32> to vector<8x8xf32>
      %200 = arith.truncf %199 : vector<8x8xf32> to vector<8x8xbf16>
      %c1_106 = arith.constant 1 : index
      %c0_107 = arith.constant 0 : index
      %c0_108 = arith.constant 0 : index
      %201 = vector.load %arg23[%c1_106, %c0_107, %c0_108] : memref<4x8x8xbf16, #tpu.memory_space<vmem>>, vector<1x8x8xbf16>
      %202 = vector.shape_cast %201 : vector<1x8x8xbf16> to vector<8x8xbf16>
      %203 = vector.shape_cast %200 : vector<8x8xbf16> to vector<1x8x8xbf16>
      tpu.vector_store %arg23[%c1_106, %c0_107, %c0_108], %203 {strides = array<i32>} : memref<4x8x8xbf16, #tpu.memory_space<vmem>>, vector<1x8x8xbf16>,
      %204 = vector.extract_strided_slice %193 {offsets = [0, 16], sizes = [8, 8], strides = [1, 1]} : vector<8x32xf32> to vector<8x8xf32>
      %205 = arith.truncf %204 : vector<8x8xf32> to vector<8x8xbf16>
      %c2_109 = arith.constant 2 : index
      %c0_110 = arith.constant 0 : index
      %c0_111 = arith.constant 0 : index
      %206 = vector.load %arg23[%c2_109, %c0_110, %c0_111] : memref<4x8x8xbf16, #tpu.memory_space<vmem>>, vector<1x8x8xbf16>
      %207 = vector.shape_cast %206 : vector<1x8x8xbf16> to vector<8x8xbf16>
      %208 = vector.shape_cast %205 : vector<8x8xbf16> to vector<1x8x8xbf16>
      tpu.vector_store %arg23[%c2_109, %c0_110, %c0_111], %208 {strides = array<i32>} : memref<4x8x8xbf16, #tpu.memory_space<vmem>>, vector<1x8x8xbf16>,
      %209 = vector.extract_strided_slice %193 {offsets = [0, 24], sizes = [8, 8], strides = [1, 1]} : vector<8x32xf32> to vector<8x8xf32>
      %210 = arith.truncf %209 : vector<8x8xf32> to vector<8x8xbf16>
      %c3_112 = arith.constant 3 : index
      %c0_113 = arith.constant 0 : index
      %c0_114 = arith.constant 0 : index
      %211 = vector.load %arg23[%c3_112, %c0_113, %c0_114] : memref<4x8x8xbf16, #tpu.memory_space<vmem>>, vector<1x8x8xbf16>
      %212 = vector.shape_cast %211 : vector<1x8x8xbf16> to vector<8x8xbf16>
      %213 = vector.shape_cast %210 : vector<8x8xbf16> to vector<1x8x8xbf16>
      tpu.vector_store %arg23[%c3_112, %c0_113, %c0_114], %213 {strides = array<i32>} : memref<4x8x8xbf16, #tpu.memory_space<vmem>>, vector<1x8x8xbf16>,
    } else {
    }
    %5 = arith.truncf %1 : vector<8x32xf32> to vector<8x32xbf16>
    %c0_3 = arith.constant 0 : index
    %c0_4 = arith.constant 0 : index
    %6 = vector.load %arg4[%c0_3, %c0_4] : memref<32x32xbf16, #tpu.memory_space<vmem>>, vector<32x32xbf16>
    %cst = arith.constant dense<0.000000e+00> : vector<8x32xf32>
    %7 = tpu.matmul %5, %6, %cst {dimension_numbers = #tpu.dot_dimension_numbers<[1], [0], [0], [1], [0, 0, 1, 1], [], []>} : vector<8x32xbf16>, vector<32x32xbf16>, vector<8x32xf32> -> vector<8x32xf32>
    %c0_5 = arith.constant 0 : index
    %c0_6 = arith.constant 0 : index
    %8 = vector.load %arg5[%c0_5, %c0_6] : memref<1x32xf32, #tpu.memory_space<vmem>>, vector<1x32xf32>
    %9 = vector.shape_cast %8 : vector<1x32xf32> to vector<32xf32>
    %10 = vector.shape_cast %9 : vector<32xf32> to vector<1x32xf32>
    %11 = vector.broadcast %10 : vector<1x32xf32> to vector<8x32xf32>
    %12 = arith.addf %7, %11 : vector<8x32xf32>
    %cst_7 = arith.constant 0.176776692 : f32
    %13 = vector.broadcast %cst_7 : f32 to vector<8x32xf32>
    %14 = arith.mulf %12, %13 : vector<8x32xf32>
    %15 = vector.extract_strided_slice %14 {offsets = [0, 0], sizes = [8, 8], strides = [1, 1]} : vector<8x32xf32> to vector<8x8xf32>
    %16 = arith.truncf %15 : vector<8x8xf32> to vector<8x8xbf16>
    %c0_8 = arith.constant 0 : index
    %c0_9 = arith.constant 0 : index
    %c0_10 = arith.constant 0 : index
    %17 = vector.load %arg24[%c0_8, %c0_9, %c0_10] : memref<4x8x8xbf16, #tpu.memory_space<vmem>>, vector<1x8x8xbf16>
    %18 = vector.shape_cast %17 : vector<1x8x8xbf16> to vector<8x8xbf16>
    %19 = vector.shape_cast %16 : vector<8x8xbf16> to vector<1x8x8xbf16>
    tpu.vector_store %arg24[%c0_8, %c0_9, %c0_10], %19 {strides = array<i32>} : memref<4x8x8xbf16, #tpu.memory_space<vmem>>, vector<1x8x8xbf16>,
    %20 = vector.extract_strided_slice %14 {offsets = [0, 8], sizes = [8, 8], strides = [1, 1]} : vector<8x32xf32> to vector<8x8xf32>
    %21 = arith.truncf %20 : vector<8x8xf32> to vector<8x8xbf16>
    %c1 = arith.constant 1 : index
    %c0_11 = arith.constant 0 : index
    %c0_12 = arith.constant 0 : index
    %22 = vector.load %arg24[%c1, %c0_11, %c0_12] : memref<4x8x8xbf16, #tpu.memory_space<vmem>>, vector<1x8x8xbf16>
    %23 = vector.shape_cast %22 : vector<1x8x8xbf16> to vector<8x8xbf16>
    %24 = vector.shape_cast %21 : vector<8x8xbf16> to vector<1x8x8xbf16>
    tpu.vector_store %arg24[%c1, %c0_11, %c0_12], %24 {strides = array<i32>} : memref<4x8x8xbf16, #tpu.memory_space<vmem>>, vector<1x8x8xbf16>,
    %25 = vector.extract_strided_slice %14 {offsets = [0, 16], sizes = [8, 8], strides = [1, 1]} : vector<8x32xf32> to vector<8x8xf32>
    %26 = arith.truncf %25 : vector<8x8xf32> to vector<8x8xbf16>
    %c2 = arith.constant 2 : index
    %c0_13 = arith.constant 0 : index
    %c0_14 = arith.constant 0 : index
    %27 = vector.load %arg24[%c2, %c0_13, %c0_14] : memref<4x8x8xbf16, #tpu.memory_space<vmem>>, vector<1x8x8xbf16>
    %28 = vector.shape_cast %27 : vector<1x8x8xbf16> to vector<8x8xbf16>
    %29 = vector.shape_cast %26 : vector<8x8xbf16> to vector<1x8x8xbf16>
    tpu.vector_store %arg24[%c2, %c0_13, %c0_14], %29 {strides = array<i32>} : memref<4x8x8xbf16, #tpu.memory_space<vmem>>, vector<1x8x8xbf16>,
    %30 = vector.extract_strided_slice %14 {offsets = [0, 24], sizes = [8, 8], strides = [1, 1]} : vector<8x32xf32> to vector<8x8xf32>
    %31 = arith.truncf %30 : vector<8x8xf32> to vector<8x8xbf16>
    %c3 = arith.constant 3 : index
    %c0_15 = arith.constant 0 : index
    %c0_16 = arith.constant 0 : index
    %32 = vector.load %arg24[%c3, %c0_15, %c0_16] : memref<4x8x8xbf16, #tpu.memory_space<vmem>>, vector<1x8x8xbf16>
    %33 = vector.shape_cast %32 : vector<1x8x8xbf16> to vector<8x8xbf16>
    %34 = vector.shape_cast %31 : vector<8x8xbf16> to vector<1x8x8xbf16>
    tpu.vector_store %arg24[%c3, %c0_15, %c0_16], %34 {strides = array<i32>} : memref<4x8x8xbf16, #tpu.memory_space<vmem>>, vector<1x8x8xbf16>,
    %c0_17 = arith.constant 0 : index
    %c0_18 = arith.constant 0 : index
    %c0_19 = arith.constant 0 : index
    %35 = vector.load %arg24[%c0_17, %c0_18, %c0_19] : memref<4x8x8xbf16, #tpu.memory_space<vmem>>, vector<4x8x8xbf16>
    %c0_20 = arith.constant 0 : index
    %c0_21 = arith.constant 0 : index
    %c0_22 = arith.constant 0 : index
    %36 = vector.load %arg22[%c0_20, %c0_21, %c0_22] : memref<4x8x8xbf16, #tpu.memory_space<vmem>>, vector<4x8x8xbf16>
    "tpu.trace_start"() <{level = 10 : i32, message = "hqe,hke->hqk"}> : () -> ()
    %cst_23 = arith.constant dense<0.000000e+00> : vector<4x8x8xf32>
    %37 = tpu.matmul %35, %36, %cst_23 {dimension_numbers = #tpu.dot_dimension_numbers<[2], [2], [1], [1], [0, 0, 0, 1, 1, 1], [0], [0]>} : vector<4x8x8xbf16>, vector<4x8x8xbf16>, vector<4x8x8xf32> -> vector<4x8x8xf32>
    "tpu.trace_stop"() : () -> ()
    %cst_24 = arith.constant dense<0xFF800000> : vector<4x8xf32>
    %38 = vector.multi_reduction <maximumf>, %37, %cst_24 [2] : vector<4x8x8xf32> to vector<4x8xf32>
    %39 = vector.shape_cast %38 : vector<4x8xf32> to vector<4x8x1xf32>
    %40 = vector.broadcast %39 : vector<4x8x1xf32> to vector<4x8x8xf32>
    %41 = arith.subf %37, %40 : vector<4x8x8xf32>
    %42 = math.exp %41 : vector<4x8x8xf32>
    %cst_25 = arith.constant dense<0.000000e+00> : vector<4x8xf32>
    %43 = vector.multi_reduction <add>, %42, %cst_25 [2] : vector<4x8x8xf32> to vector<4x8xf32>
    %44 = vector.shape_cast %43 : vector<4x8xf32> to vector<4x8x1xf32>
    %45 = tpu.reciprocal %44 {approx = true} : vector<4x8x1xf32> -> vector<4x8x1xf32>
    %46 = vector.broadcast %45 : vector<4x8x1xf32> to vector<4x8x8xf32>
    %47 = arith.mulf %42, %46 : vector<4x8x8xf32>
    %48 = arith.truncf %47 : vector<4x8x8xf32> to vector<4x8x8xbf16>
    %c0_26 = arith.constant 0 : index
    %c0_27 = arith.constant 0 : index
    %c0_28 = arith.constant 0 : index
    %c0_29 = arith.constant 0 : index
    %49 = vector.load %arg21[%c0_26, %c0_27, %c0_28, %c0_29] : memref<4x1x8x8xbf16, #tpu.memory_space<vmem>>, vector<4x1x8x8xbf16>
    %50 = vector.shape_cast %49 : vector<4x1x8x8xbf16> to vector<4x8x8xbf16>
    %51 = vector.shape_cast %48 : vector<4x8x8xbf16> to vector<4x1x8x8xbf16>
    tpu.vector_store %arg21[%c0_26, %c0_27, %c0_28, %c0_29], %51 {strides = array<i32>} : memref<4x1x8x8xbf16, #tpu.memory_space<vmem>>, vector<4x1x8x8xbf16>,
    %52 = arith.truncf %47 : vector<4x8x8xf32> to vector<4x8x8xbf16>
    %c0_30 = arith.constant 0 : index
    %c0_31 = arith.constant 0 : index
    %c0_32 = arith.constant 0 : index
    %53 = vector.load %arg23[%c0_30, %c0_31, %c0_32] : memref<4x8x8xbf16, #tpu.memory_space<vmem>>, vector<4x8x8xbf16>
    "tpu.trace_start"() <{level = 10 : i32, message = "hqk,hke->hqe"}> : () -> ()
    %cst_33 = arith.constant dense<0.000000e+00> : vector<4x8x8xf32>
    %54 = tpu.matmul %52, %53, %cst_33 {dimension_numbers = #tpu.dot_dimension_numbers<[2], [1], [1], [2], [0, 0, 0, 1, 1, 2], [0], [0]>} : vector<4x8x8xbf16>, vector<4x8x8xbf16>, vector<4x8x8xf32> -> vector<4x8x8xf32>
    "tpu.trace_stop"() : () -> ()
    %55 = vector.extract_strided_slice %54 {offsets = [0, 0, 0], sizes = [1, 8, 8], strides = [1, 1, 1]} : vector<4x8x8xf32> to vector<1x8x8xf32>
    %56 = vector.shape_cast %55 : vector<1x8x8xf32> to vector<8x8xf32>
    %57 = arith.truncf %56 : vector<8x8xf32> to vector<8x8xbf16>
    %c0_34 = arith.constant 0 : index
    %c0_35 = arith.constant 0 : index
    %58 = vector.load %arg25[%c0_34, %c0_35] : memref<8x32xbf16, #tpu.memory_space<vmem>>, vector<8x8xbf16>
    tpu.vector_store %arg25[%c0_34, %c0_35], %57 {strides = array<i32>} : memref<8x32xbf16, #tpu.memory_space<vmem>>, vector<8x8xbf16>,
    %59 = vector.extract_strided_slice %54 {offsets = [1, 0, 0], sizes = [1, 8, 8], strides = [1, 1, 1]} : vector<4x8x8xf32> to vector<1x8x8xf32>
    %60 = vector.shape_cast %59 : vector<1x8x8xf32> to vector<8x8xf32>
    %61 = arith.truncf %60 : vector<8x8xf32> to vector<8x8xbf16>
    %c0_36 = arith.constant 0 : index
    %c8 = arith.constant 8 : index
    %62 = vector.load %arg25[%c0_36, %c8] : memref<8x32xbf16, #tpu.memory_space<vmem>>, vector<8x8xbf16>
    tpu.vector_store %arg25[%c0_36, %c8], %61 {strides = array<i32>} : memref<8x32xbf16, #tpu.memory_space<vmem>>, vector<8x8xbf16>,
    %63 = vector.extract_strided_slice %54 {offsets = [2, 0, 0], sizes = [1, 8, 8], strides = [1, 1, 1]} : vector<4x8x8xf32> to vector<1x8x8xf32>
    %64 = vector.shape_cast %63 : vector<1x8x8xf32> to vector<8x8xf32>
    %65 = arith.truncf %64 : vector<8x8xf32> to vector<8x8xbf16>
    %c0_37 = arith.constant 0 : index
    %c16 = arith.constant 16 : index
    %66 = vector.load %arg25[%c0_37, %c16] : memref<8x32xbf16, #tpu.memory_space<vmem>>, vector<8x8xbf16>
    tpu.vector_store %arg25[%c0_37, %c16], %65 {strides = array<i32>} : memref<8x32xbf16, #tpu.memory_space<vmem>>, vector<8x8xbf16>,
    %67 = vector.extract_strided_slice %54 {offsets = [3, 0, 0], sizes = [1, 8, 8], strides = [1, 1, 1]} : vector<4x8x8xf32> to vector<1x8x8xf32>
    %68 = vector.shape_cast %67 : vector<1x8x8xf32> to vector<8x8xf32>
    %69 = arith.truncf %68 : vector<8x8xf32> to vector<8x8xbf16>
    %c0_38 = arith.constant 0 : index
    %c24 = arith.constant 24 : index
    %70 = vector.load %arg25[%c0_38, %c24] : memref<8x32xbf16, #tpu.memory_space<vmem>>, vector<8x8xbf16>
    tpu.vector_store %arg25[%c0_38, %c24], %69 {strides = array<i32>} : memref<8x32xbf16, #tpu.memory_space<vmem>>, vector<8x8xbf16>,
    %c0_39 = arith.constant 0 : index
    %c0_40 = arith.constant 0 : index
    %71 = vector.load %arg25[%c0_39, %c0_40] : memref<8x32xbf16, #tpu.memory_space<vmem>>, vector<8x32xbf16>
    %c0_41 = arith.constant 0 : index
    %c0_42 = arith.constant 0 : index
    %72 = vector.load %arg10[%c0_41, %c0_42] : memref<32x32xbf16, #tpu.memory_space<vmem>>, vector<32x32xbf16>
    %cst_43 = arith.constant dense<0.000000e+00> : vector<8x32xf32>
    %73 = tpu.matmul %71, %72, %cst_43 {dimension_numbers = #tpu.dot_dimension_numbers<[1], [0], [0], [1], [0, 0, 1, 1], [], []>} : vector<8x32xbf16>, vector<32x32xbf16>, vector<8x32xf32> -> vector<8x32xf32>
    %c0_44 = arith.constant 0 : index
    %c0_45 = arith.constant 0 : index
    %74 = vector.load %arg11[%c0_44, %c0_45] : memref<1x32xf32, #tpu.memory_space<vmem>>, vector<1x32xf32>
    %75 = vector.shape_cast %74 : vector<1x32xf32> to vector<32xf32>
    %76 = vector.shape_cast %75 : vector<32xf32> to vector<1x32xf32>
    %77 = vector.broadcast %76 : vector<1x32xf32> to vector<8x32xf32>
    %78 = arith.addf %73, %77 : vector<8x32xf32>
    %79 = arith.addf %78, %1 : vector<8x32xf32>
    %cst_46 = arith.constant dense<0.000000e+00> : vector<8xf32>
    %80 = vector.multi_reduction <add>, %79, %cst_46 [1] : vector<8x32xf32> to vector<8xf32>
    %81 = vector.shape_cast %80 : vector<8xf32> to vector<8x1xf32>
    %cst_47 = arith.constant 3.200000e+01 : f32
    %82 = vector.broadcast %cst_47 : f32 to vector<8x1xf32>
    %83 = arith.divf %81, %82 : vector<8x1xf32>
    %84 = vector.broadcast %83 : vector<8x1xf32> to vector<8x32xf32>
    %85 = arith.subf %79, %84 : vector<8x32xf32>
    %86 = arith.mulf %85, %85 : vector<8x32xf32>
    %cst_48 = arith.constant dense<0.000000e+00> : vector<8xf32>
    %87 = vector.multi_reduction <add>, %86, %cst_48 [1] : vector<8x32xf32> to vector<8xf32>
    %88 = vector.shape_cast %87 : vector<8xf32> to vector<8x1xf32>
    %cst_49 = arith.constant 3.200000e+01 : f32
    %89 = vector.broadcast %cst_49 : f32 to vector<8x1xf32>
    %90 = arith.divf %88, %89 : vector<8x1xf32>
    %91 = vector.broadcast %83 : vector<8x1xf32> to vector<8x32xf32>
    %92 = arith.subf %79, %91 : vector<8x32xf32>
    %cst_50 = arith.constant 9.99999974E-6 : f32
    %93 = vector.broadcast %cst_50 : f32 to vector<8x1xf32>
    %94 = arith.addf %90, %93 : vector<8x1xf32>
    %95 = math.rsqrt %94 : vector<8x1xf32>
    %96 = vector.broadcast %95 : vector<8x1xf32> to vector<8x32xf32>
    %97 = arith.mulf %92, %96 : vector<8x32xf32>
    %c0_51 = arith.constant 0 : index
    %c0_52 = arith.constant 0 : index
    %98 = vector.load %arg12[%c0_51, %c0_52] : memref<1x32xf32, #tpu.memory_space<vmem>>, vector<1x32xf32>
    %99 = vector.shape_cast %98 : vector<1x32xf32> to vector<32xf32>
    %100 = vector.shape_cast %99 : vector<32xf32> to vector<1x32xf32>
    %101 = vector.broadcast %100 : vector<1x32xf32> to vector<8x32xf32>
    %102 = arith.mulf %97, %101 : vector<8x32xf32>
    %c0_53 = arith.constant 0 : index
    %c0_54 = arith.constant 0 : index
    %103 = vector.load %arg13[%c0_53, %c0_54] : memref<1x32xf32, #tpu.memory_space<vmem>>, vector<1x32xf32>
    %104 = vector.shape_cast %103 : vector<1x32xf32> to vector<32xf32>
    %105 = vector.shape_cast %104 : vector<32xf32> to vector<1x32xf32>
    %106 = vector.broadcast %105 : vector<1x32xf32> to vector<8x32xf32>
    %107 = arith.addf %102, %106 : vector<8x32xf32>
    %108 = arith.truncf %107 : vector<8x32xf32> to vector<8x32xbf16>
    %c0_55 = arith.constant 0 : index
    %c0_56 = arith.constant 0 : index
    %109 = vector.load %arg14[%c0_55, %c0_56] : memref<32x64xbf16, #tpu.memory_space<vmem>>, vector<32x64xbf16>
    %cst_57 = arith.constant dense<0.000000e+00> : vector<8x64xf32>
    %110 = tpu.matmul %108, %109, %cst_57 {dimension_numbers = #tpu.dot_dimension_numbers<[1], [0], [0], [1], [0, 0, 1, 1], [], []>} : vector<8x32xbf16>, vector<32x64xbf16>, vector<8x64xf32> -> vector<8x64xf32>
    %c0_58 = arith.constant 0 : index
    %c0_59 = arith.constant 0 : index
    %111 = vector.load %arg15[%c0_58, %c0_59] : memref<1x64xf32, #tpu.memory_space<vmem>>, vector<1x64xf32>
    %112 = vector.shape_cast %111 : vector<1x64xf32> to vector<64xf32>
    %113 = vector.shape_cast %112 : vector<64xf32> to vector<1x64xf32>
    %114 = vector.broadcast %113 : vector<1x64xf32> to vector<8x64xf32>
    %115 = arith.addf %110, %114 : vector<8x64xf32>
    %cst_60 = arith.constant 0.000000e+00 : f32
    %116 = vector.broadcast %cst_60 : f32 to vector<8x64xf32>
    %117 = arith.maximumf %115, %116 : vector<8x64xf32>
    %118 = arith.truncf %117 : vector<8x64xf32> to vector<8x64xbf16>
    %c0_61 = arith.constant 0 : index
    %c0_62 = arith.constant 0 : index
    %119 = vector.load %arg16[%c0_61, %c0_62] : memref<64x32xbf16, #tpu.memory_space<vmem>>, vector<64x32xbf16>
    %cst_63 = arith.constant dense<0.000000e+00> : vector<8x32xf32>
    %120 = tpu.matmul %118, %119, %cst_63 {dimension_numbers = #tpu.dot_dimension_numbers<[1], [0], [0], [1], [0, 0, 1, 1], [], []>} : vector<8x64xbf16>, vector<64x32xbf16>, vector<8x32xf32> -> vector<8x32xf32>
    %c0_64 = arith.constant 0 : index
    %c0_65 = arith.constant 0 : index
    %121 = vector.load %arg17[%c0_64, %c0_65] : memref<1x32xf32, #tpu.memory_space<vmem>>, vector<1x32xf32>
    %122 = vector.shape_cast %121 : vector<1x32xf32> to vector<32xf32>
    %123 = vector.shape_cast %122 : vector<32xf32> to vector<1x32xf32>
    %124 = vector.broadcast %123 : vector<1x32xf32> to vector<8x32xf32>
    %125 = arith.addf %120, %124 : vector<8x32xf32>
    %126 = arith.addf %125, %107 : vector<8x32xf32>
    %cst_66 = arith.constant dense<0.000000e+00> : vector<8xf32>
    %127 = vector.multi_reduction <add>, %126, %cst_66 [1] : vector<8x32xf32> to vector<8xf32>
    %128 = vector.shape_cast %127 : vector<8xf32> to vector<8x1xf32>
    %cst_67 = arith.constant 3.200000e+01 : f32
    %129 = vector.broadcast %cst_67 : f32 to vector<8x1xf32>
    %130 = arith.divf %128, %129 : vector<8x1xf32>
    %131 = vector.broadcast %130 : vector<8x1xf32> to vector<8x32xf32>
    %132 = arith.subf %126, %131 : vector<8x32xf32>
    %133 = arith.mulf %132, %132 : vector<8x32xf32>
    %cst_68 = arith.constant dense<0.000000e+00> : vector<8xf32>
    %134 = vector.multi_reduction <add>, %133, %cst_68 [1] : vector<8x32xf32> to vector<8xf32>
    %135 = vector.shape_cast %134 : vector<8xf32> to vector<8x1xf32>
    %cst_69 = arith.constant 3.200000e+01 : f32
    %136 = vector.broadcast %cst_69 : f32 to vector<8x1xf32>
    %137 = arith.divf %135, %136 : vector<8x1xf32>
    %138 = vector.broadcast %130 : vector<8x1xf32> to vector<8x32xf32>
    %139 = arith.subf %126, %138 : vector<8x32xf32>
    %cst_70 = arith.constant 9.99999974E-6 : f32
    %140 = vector.broadcast %cst_70 : f32 to vector<8x1xf32>
    %141 = arith.addf %137, %140 : vector<8x1xf32>
    %142 = math.rsqrt %141 : vector<8x1xf32>
    %143 = vector.broadcast %142 : vector<8x1xf32> to vector<8x32xf32>
    %144 = arith.mulf %139, %143 : vector<8x32xf32>
    %c0_71 = arith.constant 0 : index
    %c0_72 = arith.constant 0 : index
    %145 = vector.load %arg18[%c0_71, %c0_72] : memref<1x32xf32, #tpu.memory_space<vmem>>, vector<1x32xf32>
    %146 = vector.shape_cast %145 : vector<1x32xf32> to vector<32xf32>
    %147 = vector.shape_cast %146 : vector<32xf32> to vector<1x32xf32>
    %148 = vector.broadcast %147 : vector<1x32xf32> to vector<8x32xf32>
    %149 = arith.mulf %144, %148 : vector<8x32xf32>
    %c0_73 = arith.constant 0 : index
    %c0_74 = arith.constant 0 : index
    %150 = vector.load %arg19[%c0_73, %c0_74] : memref<1x32xf32, #tpu.memory_space<vmem>>, vector<1x32xf32>
    %151 = vector.shape_cast %150 : vector<1x32xf32> to vector<32xf32>
    %152 = vector.shape_cast %151 : vector<32xf32> to vector<1x32xf32>
    %153 = vector.broadcast %152 : vector<1x32xf32> to vector<8x32xf32>
    %154 = arith.addf %149, %153 : vector<8x32xf32>
    %c0_75 = arith.constant 0 : index
    %c0_76 = arith.constant 0 : index
    %c0_77 = arith.constant 0 : index
    %155 = vector.load %arg20[%c0_75, %c0_76, %c0_77] : memref<1x8x32xf32, #tpu.memory_space<vmem>>, vector<1x8x32xf32>
    %156 = vector.shape_cast %155 : vector<1x8x32xf32> to vector<8x32xf32>
    %157 = vector.shape_cast %154 : vector<8x32xf32> to vector<1x8x32xf32>
    tpu.vector_store %arg20[%c0_75, %c0_76, %c0_77], %157 {strides = array<i32>} : memref<1x8x32xf32, #tpu.memory_space<vmem>>, vector<1x8x32xf32>,
    return
  }
  func.func @transform_0(%arg0: i32, %arg1: i32) -> (i32, i32, i32) {
    %c0_i32 = arith.constant 0 : i32
    %c0_i32_0 = arith.constant 0 : i32
    return %arg0, %arg1, %c0_i32 : i32, i32, i32
  }
  func.func @transform_1(%arg0: i32, %arg1: i32) -> (i32, i32, i32) {
    %c0_i32 = arith.constant 0 : i32
    %c0_i32_0 = arith.constant 0 : i32
    %c0_i32_1 = arith.constant 0 : i32
    return %arg0, %c0_i32, %c0_i32_0 : i32, i32, i32
  }
  func.func @transform_2(%arg0: i32, %arg1: i32) -> (i32, i32) {
    %c0_i32 = arith.constant 0 : i32
    %c0_i32_0 = arith.constant 0 : i32
    %c0_i32_1 = arith.constant 0 : i32
    return %c0_i32, %c0_i32_0 : i32, i32
  }
  func.func @transform_3(%arg0: i32, %arg1: i32) -> (i32, i32) {
    %c0_i32 = arith.constant 0 : i32
    %c0_i32_0 = arith.constant 0 : i32
    %c0_i32_1 = arith.constant 0 : i32
    return %c0_i32, %c0_i32_0 : i32, i32
  }
  func.func @transform_4(%arg0: i32, %arg1: i32) -> (i32, i32) {
    %c0_i32 = arith.constant 0 : i32
    %c0_i32_0 = arith.constant 0 : i32
    %c0_i32_1 = arith.constant 0 : i32
    return %c0_i32, %c0_i32_0 : i32, i32
  }
  func.func @transform_5(%arg0: i32, %arg1: i32) -> (i32, i32) {
    %c0_i32 = arith.constant 0 : i32
    %c0_i32_0 = arith.constant 0 : i32
    %c0_i32_1 = arith.constant 0 : i32
    return %c0_i32, %c0_i32_0 : i32, i32
  }
  func.func @transform_6(%arg0: i32, %arg1: i32) -> (i32, i32) {
    %c0_i32 = arith.constant 0 : i32
    %c0_i32_0 = arith.constant 0 : i32
    %c0_i32_1 = arith.constant 0 : i32
    return %c0_i32, %c0_i32_0 : i32, i32
  }
  func.func @transform_7(%arg0: i32, %arg1: i32) -> (i32, i32) {
    %c0_i32 = arith.constant 0 : i32
    %c0_i32_0 = arith.constant 0 : i32
    %c0_i32_1 = arith.constant 0 : i32
    return %c0_i32, %c0_i32_0 : i32, i32
  }
  func.func @transform_8(%arg0: i32, %arg1: i32) -> (i32, i32) {
    %c0_i32 = arith.constant 0 : i32
    %c0_i32_0 = arith.constant 0 : i32
    %c0_i32_1 = arith.constant 0 : i32
    return %c0_i32, %c0_i32_0 : i32, i32
  }
  func.func @transform_9(%arg0: i32, %arg1: i32) -> (i32, i32) {
    %c0_i32 = arith.constant 0 : i32
    %c0_i32_0 = arith.constant 0 : i32
    %c0_i32_1 = arith.constant 0 : i32
    return %c0_i32, %c0_i32_0 : i32, i32
  }
  func.func @transform_10(%arg0: i32, %arg1: i32) -> (i32, i32) {
    %c0_i32 = arith.constant 0 : i32
    %c0_i32_0 = arith.constant 0 : i32
    %c0_i32_1 = arith.constant 0 : i32
    return %c0_i32, %c0_i32_0 : i32, i32
  }
  func.func @transform_11(%arg0: i32, %arg1: i32) -> (i32, i32) {
    %c0_i32 = arith.constant 0 : i32
    %c0_i32_0 = arith.constant 0 : i32
    %c0_i32_1 = arith.constant 0 : i32
    return %c0_i32, %c0_i32_0 : i32, i32
  }
  func.func @transform_12(%arg0: i32, %arg1: i32) -> (i32, i32) {
    %c0_i32 = arith.constant 0 : i32
    %c0_i32_0 = arith.constant 0 : i32
    %c0_i32_1 = arith.constant 0 : i32
    return %c0_i32, %c0_i32_0 : i32, i32
  }
  func.func @transform_13(%arg0: i32, %arg1: i32) -> (i32, i32) {
    %c0_i32 = arith.constant 0 : i32
    %c0_i32_0 = arith.constant 0 : i32
    %c0_i32_1 = arith.constant 0 : i32
    return %c0_i32, %c0_i32_0 : i32, i32
  }
  func.func @transform_14(%arg0: i32, %arg1: i32) -> (i32, i32) {
    %c0_i32 = arith.constant 0 : i32
    %c0_i32_0 = arith.constant 0 : i32
    %c0_i32_1 = arith.constant 0 : i32
    return %c0_i32, %c0_i32_0 : i32, i32
  }
  func.func @transform_15(%arg0: i32, %arg1: i32) -> (i32, i32) {
    %c0_i32 = arith.constant 0 : i32
    %c0_i32_0 = arith.constant 0 : i32
    %c0_i32_1 = arith.constant 0 : i32
    return %c0_i32, %c0_i32_0 : i32, i32
  }
  func.func @transform_16(%arg0: i32, %arg1: i32) -> (i32, i32) {
    %c0_i32 = arith.constant 0 : i32
    %c0_i32_0 = arith.constant 0 : i32
    %c0_i32_1 = arith.constant 0 : i32
    return %c0_i32, %c0_i32_0 : i32, i32
  }
  func.func @transform_17(%arg0: i32, %arg1: i32) -> (i32, i32) {
    %c0_i32 = arith.constant 0 : i32
    %c0_i32_0 = arith.constant 0 : i32
    %c0_i32_1 = arith.constant 0 : i32
    return %c0_i32, %c0_i32_0 : i32, i32
  }
  func.func @transform_18(%arg0: i32, %arg1: i32) -> (i32, i32, i32) {
    %c0_i32 = arith.constant 0 : i32
    %c0_i32_0 = arith.constant 0 : i32
    return %arg0, %arg1, %c0_i32 : i32, i32, i32
  }
  func.func @transform_19(%arg0: i32, %arg1: i32) -> (i32, i32, i32, i32) {
    %c0_i32 = arith.constant 0 : i32
    %c0_i32_0 = arith.constant 0 : i32
    %c0_i32_1 = arith.constant 0 : i32
    return %c0_i32, %arg0, %arg1, %c0_i32_0 : i32, i32, i32, i32
  }
}

module attributes {stable_mosaic.version = 11 : i64} {
  func.func @_encoder_layer_kernel(%arg0: i32, %arg1: i32, %arg2: memref<1x8x32xf32, #tpu.memory_space<vmem>>, %arg3: memref<1x8x32xbf16, #tpu.memory_space<vmem>>, %arg4: memref<32x32xbf16, #tpu.memory_space<vmem>>, %arg5: memref<1x32xf32, #tpu.memory_space<vmem>>, %arg6: memref<32x32xbf16, #tpu.memory_space<vmem>>, %arg7: memref<1x32xf32, #tpu.memory_space<vmem>>, %arg8: memref<32x32xbf16, #tpu.memory_space<vmem>>, %arg9: memref<1x32xf32, #tpu.memory_space<vmem>>, %arg10: memref<32x32xbf16, #tpu.memory_space<vmem>>, %arg11: memref<1x32xf32, #tpu.memory_space<vmem>>, %arg12: memref<1x32xf32, #tpu.memory_space<vmem>>, %arg13: memref<1x32xf32, #tpu.memory_space<vmem>>, %arg14: memref<32x64xbf16, #tpu.memory_space<vmem>>, %arg15: memref<1x64xf32, #tpu.memory_space<vmem>>, %arg16: memref<64x32xbf16, #tpu.memory_space<vmem>>, %arg17: memref<1x32xf32, #tpu.memory_space<vmem>>, %arg18: memref<1x32xf32, #tpu.memory_space<vmem>>, %arg19: memref<1x32xf32, #tpu.memory_space<vmem>>, %arg20: memref<1x8x32xf32, #tpu.memory_space<vmem>>, %arg21: memref<4x1x8x8xbf16, #tpu.memory_space<vmem>>, %arg22: memref<4x8x8xbf16, #tpu.memory_space<vmem>>, %arg23: memref<4x8x8xbf16, #tpu.memory_space<vmem>>, %arg24: memref<4x8x8xbf16, #tpu.memory_space<vmem>>, %arg25: memref<8x32xbf16, #tpu.memory_space<vmem>>) attributes {dimension_semantics = [#tpu.dimension_semantics<parallel>, #tpu.dimension_semantics<arbitrary>], iteration_bounds = array<i64: 2, 1>, scalar_prefetch = 0 : i64, scratch_operands = 4 : i64, tpu.core_type = #tpu.core_type<tc>, window_params = [{transform_indices = @transform_0, window_bounds = array<i64: 1, 8, 32>}, {transform_indices = @transform_1, window_bounds = array<i64: 1, 8, 32>}, {pipeline_mode = #tpu.pipeline_mode<synchronous>, transform_indices = @transform_2, window_bounds = array<i64: 32, 32>}, {pipeline_mode = #tpu.pipeline_mode<synchronous>, transform_indices = @transform_3, window_bounds = array<i64: 1, 32>}, {pipeline_mode = #tpu.pipeline_mode<synchronous>, transform_indices = @transform_4, window_bounds = array<i64: 32, 32>}, {pipeline_mode = #tpu.pipeline_mode<synchronous>, transform_indices = @transform_5, window_bounds = array<i64: 1, 32>}, {pipeline_mode = #tpu.pipeline_mode<synchronous>, transform_indices = @transform_6, window_bounds = array<i64: 32, 32>}, {pipeline_mode = #tpu.pipeline_mode<synchronous>, transform_indices = @transform_7, window_bounds = array<i64: 1, 32>}, {pipeline_mode = #tpu.pipeline_mode<synchronous>, transform_indices = @transform_8, window_bounds = array<i64: 32, 32>}, {pipeline_mode = #tpu.pipeline_mode<synchronous>, transform_indices = @transform_9, window_bounds = array<i64: 1, 32>}, {pipeline_mode = #tpu.pipeline_mode<synchronous>, transform_indices = @transform_10, window_bounds = array<i64: 1, 32>}, {pipeline_mode = #tpu.pipeline_mode<synchronous>, transform_indices = @transform_11, window_bounds = array<i64: 1, 32>}, {pipeline_mode = #tpu.pipeline_mode<synchronous>, transform_indices = @transform_12, window_bounds = array<i64: 32, 64>}, {pipeline_mode = #tpu.pipeline_mode<synchronous>, transform_indices = @transform_13, window_bounds = array<i64: 1, 64>}, {pipeline_mode = #tpu.pipeline_mode<synchronous>, transform_indices = @transform_14, window_bounds = array<i64: 64, 32>}, {pipeline_mode = #tpu.pipeline_mode<synchronous>, transform_indices = @transform_15, window_bounds = array<i64: 1, 32>}, {pipeline_mode = #tpu.pipeline_mode<synchronous>, transform_indices = @transform_16, window_bounds = array<i64: 1, 32>}, {pipeline_mode = #tpu.pipeline_mode<synchronous>, transform_indices = @transform_17, window_bounds = array<i64: 1, 32>}, {transform_indices = @transform_18, window_bounds = array<i64: 1, 8, 32>}, {transform_indices = @transform_19, window_bounds = array<i64: 4, 1, 8, 8>}]} {
    %c0 = arith.constant 0 : index
    %c0_0 = arith.constant 0 : index
    %c0_1 = arith.constant 0 : index
    %0 = vector.load %arg2[%c0, %c0_0, %c0_1] : memref<1x8x32xf32, #tpu.memory_space<vmem>>, vector<1x8x32xf32>
    %1 = vector.shape_cast %0 : vector<1x8x32xf32> to vector<8x32xf32>
    %c0_i32 = arith.constant 0 : i32
    %2 = arith.cmpi eq, %arg1, %c0_i32 : i32
    %3 = arith.extui %2 : i1 to i32
    %c0_i32_2 = arith.constant 0 : i32
    %4 = arith.cmpi ne, %3, %c0_i32_2 : i32
    scf.if %4 {
      %c0_78 = arith.constant 0 : index
      %c0_79 = arith.constant 0 : index
      %c0_80 = arith.constant 0 : index
      %158 = vector.load %arg3[%c0_78, %c0_79, %c0_80] : memref<1x8x32xbf16, #tpu.memory_space<vmem>>, vector<1x8x32xbf16>
      %159 = vector.shape_cast %158 : vector<1x8x32xbf16> to vector<8x32xbf16>
      %c0_81 = arith.constant 0 : index
      %c0_82 = arith.constant 0 : index
      %160 = vector.load %arg6[%c0_81, %c0_82] : memref<32x32xbf16, #tpu.memory_space<vmem>>, vector<32x32xbf16>
      %cst_83 = arith.constant dense<0.000000e+00> : vector<8x32xf32>
      %161 = tpu.matmul %159, %160, %cst_83 {dimension_numbers = #tpu.dot_dimension_numbers<[1], [0], [0], [1], [0, 0, 1, 1], [], []>} : vector<8x32xbf16>, vector<32x32xbf16>, vector<8x32xf32> -> vector<8x32xf32>
      %c0_84 = arith.constant 0 : index
      %c0_85 = arith.constant 0 : index
      %162 = vector.load %arg7[%c0_84, %c0_85] : memref<1x32xf32, #tpu.memory_space<vmem>>, vector<1x32xf32>
      %163 = vector.shape_cast %162 : vector<1x32xf32> to vector<32xf32>
      %164 = vector.shape_cast %163 : vector<32xf32> to vector<1x32xf32>
      %165 = vector.broadcast %164 : vector<1x32xf32> to vector<8x32xf32>
      %166 = arith.addf %161, %165 : vector<8x32xf32>
      %167 = vector.extract_strided_slice %166 {offsets = [0, 0], sizes = [8, 8], strides = [1, 1]} : vector<8x32xf32> to vector<8x8xf32>
      %168 = arith.truncf %167 : vector<8x8xf32> to vector<8x8xbf16>
      %c0_86 = arith.constant 0 : index
      %c0_87 = arith.constant 0 : index
      %c0_88 = arith.constant 0 : index
      %169 = vector.load %arg22[%c0_86, %c0_87, %c0_88] : memref<4x8x8xbf16, #tpu.memory_space<vmem>>, vector<1x8x8xbf16>
      %170 = vector.shape_cast %169 : vector<1x8x8xbf16> to vector<8x8xbf16>
      %171 = vector.shape_cast %168 : vector<8x8xbf16> to vector<1x8x8xbf16>
      tpu.vector_store %arg22[%c0_86, %c0_87, %c0_88], %171 {strides = array<i32>} : memref<4x8x8xbf16, #tpu.memory_space<vmem>>, vector<1x8x8xbf16>,
      %172 = vector.extract_strided_slice %166 {offsets = [0, 8], sizes = [8, 8], strides = [1, 1]} : vector<8x32xf32> to vector<8x8xf32>
      %173 = arith.truncf %172 : vector<8x8xf32> to vector<8x8xbf16>
      %c1_89 = arith.constant 1 : index
      %c0_90 = arith.constant 0 : index
      %c0_91 = arith.constant 0 : index
      %174 = vector.load %arg22[%c1_89, %c0_90, %c0_91] : memref<4x8x8xbf16, #tpu.memory_space<vmem>>, vector<1x8x8xbf16>
      %175 = vector.shape_cast %174 : vector<1x8x8xbf16> to vector<8x8xbf16>
      %176 = vector.shape_cast %173 : vector<8x8xbf16> to vector<1x8x8xbf16>
      tpu.vector_store %arg22[%c1_89, %c0_90, %c0_91], %176 {strides = array<i32>} : memref<4x8x8xbf16, #tpu.memory_space<vmem>>, vector<1x8x8xbf16>,
      %177 = vector.extract_strided_slice %166 {offsets = [0, 16], sizes = [8, 8], strides = [1, 1]} : vector<8x32xf32> to vector<8x8xf32>
      %178 = arith.truncf %177 : vector<8x8xf32> to vector<8x8xbf16>
      %c2_92 = arith.constant 2 : index
      %c0_93 = arith.constant 0 : index
      %c0_94 = arith.constant 0 : index
      %179 = vector.load %arg22[%c2_92, %c0_93, %c0_94] : memref<4x8x8xbf16, #tpu.memory_space<vmem>>, vector<1x8x8xbf16>
      %180 = vector.shape_cast %179 : vector<1x8x8xbf16> to vector<8x8xbf16>
      %181 = vector.shape_cast %178 : vector<8x8xbf16> to vector<1x8x8xbf16>
      tpu.vector_store %arg22[%c2_92, %c0_93, %c0_94], %181 {strides = array<i32>} : memref<4x8x8xbf16, #tpu.memory_space<vmem>>, vector<1x8x8xbf16>,
      %182 = vector.extract_strided_slice %166 {offsets = [0, 24], sizes = [8, 8], strides = [1, 1]} : vector<8x32xf32> to vector<8x8xf32>
      %183 = arith.truncf %182 : vector<8x8xf32> to vector<8x8xbf16>
      %c3_95 = arith.constant 3 : index
      %c0_96 = arith.constant 0 : index
      %c0_97 = arith.constant 0 : index
      %184 = vector.load %arg22[%c3_95, %c0_96, %c0_97] : memref<4x8x8xbf16, #tpu.memory_space<vmem>>, vector<1x8x8xbf16>
      %185 = vector.shape_cast %184 : vector<1x8x8xbf16> to vector<8x8xbf16>
      %186 = vector.shape_cast %183 : vector<8x8xbf16> to vector<1x8x8xbf16>
      tpu.vector_store %arg22[%c3_95, %c0_96, %c0_97], %186 {strides = array<i32>} : memref<4x8x8xbf16, #tpu.memory_space<vmem>>, vector<1x8x8xbf16>,
      %c0_98 = arith.constant 0 : index
      %c0_99 = arith.constant 0 : index
      %187 = vector.load %arg8[%c0_98, %c0_99] : memref<32x32xbf16, #tpu.memory_space<vmem>>, vector<32x32xbf16>
      %cst_100 = arith.constant dense<0.000000e+00> : vector<8x32xf32>
      %188 = tpu.matmul %159, %187, %cst_100 {dimension_numbers = #tpu.dot_dimension_numbers<[1], [0], [0], [1], [0, 0, 1, 1], [], []>} : vector<8x32xbf16>, vector<32x32xbf16>, vector<8x32xf32> -> vector<8x32xf32>
      %c0_101 = arith.constant 0 : index
      %c0_102 = arith.constant 0 : index
      %189 = vector.load %arg9[%c0_101, %c0_102] : memref<1x32xf32, #tpu.memory_space<vmem>>, vector<1x32xf32>
      %190 = vector.shape_cast %189 : vector<1x32xf32> to vector<32xf32>
      %191 = vector.shape_cast %190 : vector<32xf32> to vector<1x32xf32>
      %192 = vector.broadcast %191 : vector<1x32xf32> to vector<8x32xf32>
      %193 = arith.addf %188, %192 : vector<8x32xf32>
      %194 = vector.extract_strided_slice %193 {offsets = [0, 0], sizes = [8, 8], strides = [1, 1]} : vector<8x32xf32> to vector<8x8xf32>
      %195 = arith.truncf %194 : vector<8x8xf32> to vector<8x8xbf16>
      %c0_103 = arith.constant 0 : index
      %c0_104 = arith.constant 0 : index
      %c0_105 = arith.constant 0 : index
      %196 = vector.load %arg23[%c0_103, %c0_104, %c0_105] : memref<4x8x8xbf16, #tpu.memory_space<vmem>>, vector<1x8x8xbf16>
      %197 = vector.shape_cast %196 : vector<1x8x8xbf16> to vector<8x8xbf16>
      %198 = vector.shape_cast %195 : vector<8x8xbf16> to vector<1x8x8xbf16>
      tpu.vector_store %arg23[%c0_103, %c0_104, %c0_105], %198 {strides = array<i32>} : memref<4x8x8xbf16, #tpu.memory_space<vmem>>, vector<1x8x8xbf16>,
      %199 = vector.extract_strided_slice %193 {offsets = [0, 8], sizes = [8, 8], strides = [1, 1]} : vector<8x32xf32> to vector<8x8xf32>
      %200 = arith.truncf %199 : vector<8x8xf32> to vector<8x8xbf16>
      %c1_106 = arith.constant 1 : index
      %c0_107 = arith.constant 0 : index
      %c0_108 = arith.constant 0 : index
      %201 = vector.load %arg23[%c1_106, %c0_107, %c0_108] : memref<4x8x8xbf16, #tpu.memory_space<vmem>>, vector<1x8x8xbf16>
      %202 = vector.shape_cast %201 : vector<1x8x8xbf16> to vector<8x8xbf16>
      %203 = vector.shape_cast %200 : vector<8x8xbf16> to vector<1x8x8xbf16>
      tpu.vector_store %arg23[%c1_106, %c0_107, %c0_108], %203 {strides = array<i32>} : memref<4x8x8xbf16, #tpu.memory_space<vmem>>, vector<1x8x8xbf16>,
      %204 = vector.extract_strided_slice %193 {offsets = [0, 16], sizes = [8, 8], strides = [1, 1]} : vector<8x32xf32> to vector<8x8xf32>
      %205 = arith.truncf %204 : vector<8x8xf32> to vector<8x8xbf16>
      %c2_109 = arith.constant 2 : index
      %c0_110 = arith.constant 0 : index
      %c0_111 = arith.constant 0 : index
      %206 = vector.load %arg23[%c2_109, %c0_110, %c0_111] : memref<4x8x8xbf16, #tpu.memory_space<vmem>>, vector<1x8x8xbf16>
      %207 = vector.shape_cast %206 : vector<1x8x8xbf16> to vector<8x8xbf16>
      %208 = vector.shape_cast %205 : vector<8x8xbf16> to vector<1x8x8xbf16>
      tpu.vector_store %arg23[%c2_109, %c0_110, %c0_111], %208 {strides = array<i32>} : memref<4x8x8xbf16, #tpu.memory_space<vmem>>, vector<1x8x8xbf16>,
      %209 = vector.extract_strided_slice %193 {offsets = [0, 24], sizes = [8, 8], strides = [1, 1]} : vector<8x32xf32> to vector<8x8xf32>
      %210 = arith.truncf %209 : vector<8x8xf32> to vector<8x8xbf16>
      %c3_112 = arith.constant 3 : index
      %c0_113 = arith.constant 0 : index
      %c0_114 = arith.constant 0 : index
      %211 = vector.load %arg23[%c3_112, %c0_113, %c0_114] : memref<4x8x8xbf16, #tpu.memory_space<vmem>>, vector<1x8x8xbf16>
      %212 = vector.shape_cast %211 : vector<1x8x8xbf16> to vector<8x8xbf16>
      %213 = vector.shape_cast %210 : vector<8x8xbf16> to vector<1x8x8xbf16>
      tpu.vector_store %arg23[%c3_112, %c0_113, %c0_114], %213 {strides = array<i32>} : memref<4x8x8xbf16, #tpu.memory_space<vmem>>, vector<1x8x8xbf16>,
    } else {
    }
    %5 = arith.truncf %1 : vector<8x32xf32> to vector<8x32xbf16>
    %c0_3 = arith.constant 0 : index
    %c0_4 = arith.constant 0 : index
    %6 = vector.load %arg4[%c0_3, %c0_4] : memref<32x32xbf16, #tpu.memory_space<vmem>>, vector<32x32xbf16>
    %cst = arith.constant dense<0.000000e+00> : vector<8x32xf32>
    %7 = tpu.matmul %5, %6, %cst {dimension_numbers = #tpu.dot_dimension_numbers<[1], [0], [0], [1], [0, 0, 1, 1], [], []>} : vector<8x32xbf16>, vector<32x32xbf16>, vector<8x32xf32> -> vector<8x32xf32>
    %c0_5 = arith.constant 0 : index
    %c0_6 = arith.constant 0 : index
    %8 = vector.load %arg5[%c0_5, %c0_6] : memref<1x32xf32, #tpu.memory_space<vmem>>, vector<1x32xf32>
    %9 = vector.shape_cast %8 : vector<1x32xf32> to vector<32xf32>
    %10 = vector.shape_cast %9 : vector<32xf32> to vector<1x32xf32>
    %11 = vector.broadcast %10 : vector<1x32xf32> to vector<8x32xf32>
    %12 = arith.addf %7, %11 : vector<8x32xf32>
    %cst_7 = arith.constant 0.176776692 : f32
    %13 = vector.broadcast %cst_7 : f32 to vector<8x32xf32>
    %14 = arith.mulf %12, %13 : vector<8x32xf32>
    %15 = vector.extract_strided_slice %14 {offsets = [0, 0], sizes = [8, 8], strides = [1, 1]} : vector<8x32xf32> to vector<8x8xf32>
    %16 = arith.truncf %15 : vector<8x8xf32> to vector<8x8xbf16>
    %c0_8 = arith.constant 0 : index
    %c0_9 = arith.constant 0 : index
    %c0_10 = arith.constant 0 : index
    %17 = vector.load %arg24[%c0_8, %c0_9, %c0_10] : memref<4x8x8xbf16, #tpu.memory_space<vmem>>, vector<1x8x8xbf16>
    %18 = vector.shape_cast %17 : vector<1x8x8xbf16> to vector<8x8xbf16>
    %19 = vector.shape_cast %16 : vector<8x8xbf16> to vector<1x8x8xbf16>
    tpu.vector_store %arg24[%c0_8, %c0_9, %c0_10], %19 {strides = array<i32>} : memref<4x8x8xbf16, #tpu.memory_space<vmem>>, vector<1x8x8xbf16>,
    %20 = vector.extract_strided_slice %14 {offsets = [0, 8], sizes = [8, 8], strides = [1, 1]} : vector<8x32xf32> to vector<8x8xf32>
    %21 = arith.truncf %20 : vector<8x8xf32> to vector<8x8xbf16>
    %c1 = arith.constant 1 : index
    %c0_11 = arith.constant 0 : index
    %c0_12 = arith.constant 0 : index
    %22 = vector.load %arg24[%c1, %c0_11, %c0_12] : memref<4x8x8xbf16, #tpu.memory_space<vmem>>, vector<1x8x8xbf16>
    %23 = vector.shape_cast %22 : vector<1x8x8xbf16> to vector<8x8xbf16>
    %24 = vector.shape_cast %21 : vector<8x8xbf16> to vector<1x8x8xbf16>
    tpu.vector_store %arg24[%c1, %c0_11, %c0_12], %24 {strides = array<i32>} : memref<4x8x8xbf16, #tpu.memory_space<vmem>>, vector<1x8x8xbf16>,
    %25 = vector.extract_strided_slice %14 {offsets = [0, 16], sizes = [8, 8], strides = [1, 1]} : vector<8x32xf32> to vector<8x8xf32>
    %26 = arith.truncf %25 : vector<8x8xf32> to vector<8x8xbf16>
    %c2 = arith.constant 2 : index
    %c0_13 = arith.constant 0 : index
    %c0_14 = arith.constant 0 : index
    %27 = vector.load %arg24[%c2, %c0_13, %c0_14] : memref<4x8x8xbf16, #tpu.memory_space<vmem>>, vector<1x8x8xbf16>
    %28 = vector.shape_cast %27 : vector<1x8x8xbf16> to vector<8x8xbf16>
    %29 = vector.shape_cast %26 : vector<8x8xbf16> to vector<1x8x8xbf16>
    tpu.vector_store %arg24[%c2, %c0_13, %c0_14], %29 {strides = array<i32>} : memref<4x8x8xbf16, #tpu.memory_space<vmem>>, vector<1x8x8xbf16>,
    %30 = vector.extract_strided_slice %14 {offsets = [0, 24], sizes = [8, 8], strides = [1, 1]} : vector<8x32xf32> to vector<8x8xf32>
    %31 = arith.truncf %30 : vector<8x8xf32> to vector<8x8xbf16>
    %c3 = arith.constant 3 : index
    %c0_15 = arith.constant 0 : index
    %c0_16 = arith.constant 0 : index
    %32 = vector.load %arg24[%c3, %c0_15, %c0_16] : memref<4x8x8xbf16, #tpu.memory_space<vmem>>, vector<1x8x8xbf16>
    %33 = vector.shape_cast %32 : vector<1x8x8xbf16> to vector<8x8xbf16>
    %34 = vector.shape_cast %31 : vector<8x8xbf16> to vector<1x8x8xbf16>
    tpu.vector_store %arg24[%c3, %c0_15, %c0_16], %34 {strides = array<i32>} : memref<4x8x8xbf16, #tpu.memory_space<vmem>>, vector<1x8x8xbf16>,
    %c0_17 = arith.constant 0 : index
    %c0_18 = arith.constant 0 : index
    %c0_19 = arith.constant 0 : index
    %35 = vector.load %arg24[%c0_17, %c0_18, %c0_19] : memref<4x8x8xbf16, #tpu.memory_space<vmem>>, vector<4x8x8xbf16>
    %c0_20 = arith.constant 0 : index
    %c0_21 = arith.constant 0 : index
    %c0_22 = arith.constant 0 : index
    %36 = vector.load %arg22[%c0_20, %c0_21, %c0_22] : memref<4x8x8xbf16, #tpu.memory_space<vmem>>, vector<4x8x8xbf16>
    "tpu.trace_start"() <{level = 10 : i32, message = "hqe,hke->hqk"}> : () -> ()
    %cst_23 = arith.constant dense<0.000000e+00> : vector<4x8x8xf32>
    %37 = tpu.matmul %35, %36, %cst_23 {dimension_numbers = #tpu.dot_dimension_numbers<[2], [2], [1], [1], [0, 0, 0, 1, 1, 1], [0], [0]>} : vector<4x8x8xbf16>, vector<4x8x8xbf16>, vector<4x8x8xf32> -> vector<4x8x8xf32>
    "tpu.trace_stop"() : () -> ()
    %cst_24 = arith.constant dense<0xFF800000> : vector<4x8xf32>
    %38 = vector.multi_reduction <maximumf>, %37, %cst_24 [2] : vector<4x8x8xf32> to vector<4x8xf32>
    %39 = vector.shape_cast %38 : vector<4x8xf32> to vector<4x8x1xf32>
    %40 = vector.broadcast %39 : vector<4x8x1xf32> to vector<4x8x8xf32>
    %41 = arith.subf %37, %40 : vector<4x8x8xf32>
    %42 = math.exp %41 : vector<4x8x8xf32>
    %cst_25 = arith.constant dense<0.000000e+00> : vector<4x8xf32>
    %43 = vector.multi_reduction <add>, %42, %cst_25 [2] : vector<4x8x8xf32> to vector<4x8xf32>
    %44 = vector.shape_cast %43 : vector<4x8xf32> to vector<4x8x1xf32>
    %45 = tpu.reciprocal %44 {approx = true} : vector<4x8x1xf32> -> vector<4x8x1xf32>
    %46 = vector.broadcast %45 : vector<4x8x1xf32> to vector<4x8x8xf32>
    %47 = arith.mulf %42, %46 : vector<4x8x8xf32>
    %48 = arith.truncf %47 : vector<4x8x8xf32> to vector<4x8x8xbf16>
    %c0_26 = arith.constant 0 : index
    %c0_27 = arith.constant 0 : index
    %c0_28 = arith.constant 0 : index
    %c0_29 = arith.constant 0 : index
    %49 = vector.load %arg21[%c0_26, %c0_27, %c0_28, %c0_29] : memref<4x1x8x8xbf16, #tpu.memory_space<vmem>>, vector<4x1x8x8xbf16>
    %50 = vector.shape_cast %49 : vector<4x1x8x8xbf16> to vector<4x8x8xbf16>
    %51 = vector.shape_cast %48 : vector<4x8x8xbf16> to vector<4x1x8x8xbf16>
    tpu.vector_store %arg21[%c0_26, %c0_27, %c0_28, %c0_29], %51 {strides = array<i32>} : memref<4x1x8x8xbf16, #tpu.memory_space<vmem>>, vector<4x1x8x8xbf16>,
    %52 = arith.truncf %47 : vector<4x8x8xf32> to vector<4x8x8xbf16>
    %c0_30 = arith.constant 0 : index
    %c0_31 = arith.constant 0 : index
    %c0_32 = arith.constant 0 : index
    %53 = vector.load %arg23[%c0_30, %c0_31, %c0_32] : memref<4x8x8xbf16, #tpu.memory_space<vmem>>, vector<4x8x8xbf16>
    "tpu.trace_start"() <{level = 10 : i32, message = "hqk,hke->hqe"}> : () -> ()
    %cst_33 = arith.constant dense<0.000000e+00> : vector<4x8x8xf32>
    %54 = tpu.matmul %52, %53, %cst_33 {dimension_numbers = #tpu.dot_dimension_numbers<[2], [1], [1], [2], [0, 0, 0, 1, 1, 2], [0], [0]>} : vector<4x8x8xbf16>, vector<4x8x8xbf16>, vector<4x8x8xf32> -> vector<4x8x8xf32>
    "tpu.trace_stop"() : () -> ()
    %55 = vector.extract_strided_slice %54 {offsets = [0, 0, 0], sizes = [1, 8, 8], strides = [1, 1, 1]} : vector<4x8x8xf32> to vector<1x8x8xf32>
    %56 = vector.shape_cast %55 : vector<1x8x8xf32> to vector<8x8xf32>
    %57 = arith.truncf %56 : vector<8x8xf32> to vector<8x8xbf16>
    %c0_34 = arith.constant 0 : index
    %c0_35 = arith.constant 0 : index
    %58 = vector.load %arg25[%c0_34, %c0_35] : memref<8x32xbf16, #tpu.memory_space<vmem>>, vector<8x8xbf16>
    tpu.vector_store %arg25[%c0_34, %c0_35], %57 {strides = array<i32>} : memref<8x32xbf16, #tpu.memory_space<vmem>>, vector<8x8xbf16>,
    %59 = vector.extract_strided_slice %54 {offsets = [1, 0, 0], sizes = [1, 8, 8], strides = [1, 1, 1]} : vector<4x8x8xf32> to vector<1x8x8xf32>
    %60 = vector.shape_cast %59 : vector<1x8x8xf32> to vector<8x8xf32>
    %61 = arith.truncf %60 : vector<8x8xf32> to vector<8x8xbf16>
    %c0_36 = arith.constant 0 : index
    %c8 = arith.constant 8 : index
    %62 = vector.load %arg25[%c0_36, %c8] : memref<8x32xbf16, #tpu.memory_space<vmem>>, vector<8x8xbf16>
    tpu.vector_store %arg25[%c0_36, %c8], %61 {strides = array<i32>} : memref<8x32xbf16, #tpu.memory_space<vmem>>, vector<8x8xbf16>,
    %63 = vector.extract_strided_slice %54 {offsets = [2, 0, 0], sizes = [1, 8, 8], strides = [1, 1, 1]} : vector<4x8x8xf32> to vector<1x8x8xf32>
    %64 = vector.shape_cast %63 : vector<1x8x8xf32> to vector<8x8xf32>
    %65 = arith.truncf %64 : vector<8x8xf32> to vector<8x8xbf16>
    %c0_37 = arith.constant 0 : index
    %c16 = arith.constant 16 : index
    %66 = vector.load %arg25[%c0_37, %c16] : memref<8x32xbf16, #tpu.memory_space<vmem>>, vector<8x8xbf16>
    tpu.vector_store %arg25[%c0_37, %c16], %65 {strides = array<i32>} : memref<8x32xbf16, #tpu.memory_space<vmem>>, vector<8x8xbf16>,
    %67 = vector.extract_strided_slice %54 {offsets = [3, 0, 0], sizes = [1, 8, 8], strides = [1, 1, 1]} : vector<4x8x8xf32> to vector<1x8x8xf32>
    %68 = vector.shape_cast %67 : vector<1x8x8xf32> to vector<8x8xf32>
    %69 = arith.truncf %68 : vector<8x8xf32> to vector<8x8xbf16>
    %c0_38 = arith.constant 0 : index
    %c24 = arith.constant 24 : index
    %70 = vector.load %arg25[%c0_38, %c24] : memref<8x32xbf16, #tpu.memory_space<vmem>>, vector<8x8xbf16>
    tpu.vector_store %arg25[%c0_38, %c24], %69 {strides = array<i32>} : memref<8x32xbf16, #tpu.memory_space<vmem>>, vector<8x8xbf16>,
    %c0_39 = arith.constant 0 : index
    %c0_40 = arith.constant 0 : index
    %71 = vector.load %arg25[%c0_39, %c0_40] : memref<8x32xbf16, #tpu.memory_space<vmem>>, vector<8x32xbf16>
    %c0_41 = arith.constant 0 : index
    %c0_42 = arith.constant 0 : index
    %72 = vector.load %arg10[%c0_41, %c0_42] : memref<32x32xbf16, #tpu.memory_space<vmem>>, vector<32x32xbf16>
    %cst_43 = arith.constant dense<0.000000e+00> : vector<8x32xf32>
    %73 = tpu.matmul %71, %72, %cst_43 {dimension_numbers = #tpu.dot_dimension_numbers<[1], [0], [0], [1], [0, 0, 1, 1], [], []>} : vector<8x32xbf16>, vector<32x32xbf16>, vector<8x32xf32> -> vector<8x32xf32>
    %c0_44 = arith.constant 0 : index
    %c0_45 = arith.constant 0 : index
    %74 = vector.load %arg11[%c0_44, %c0_45] : memref<1x32xf32, #tpu.memory_space<vmem>>, vector<1x32xf32>
    %75 = vector.shape_cast %74 : vector<1x32xf32> to vector<32xf32>
    %76 = vector.shape_cast %75 : vector<32xf32> to vector<1x32xf32>
    %77 = vector.broadcast %76 : vector<1x32xf32> to vector<8x32xf32>
    %78 = arith.addf %73, %77 : vector<8x32xf32>
    %79 = arith.addf %78, %1 : vector<8x32xf32>
    %cst_46 = arith.constant dense<0.000000e+00> : vector<8xf32>
    %80 = vector.multi_reduction <add>, %79, %cst_46 [1] : vector<8x32xf32> to vector<8xf32>
    %81 = vector.shape_cast %80 : vector<8xf32> to vector<8x1xf32>
    %cst_47 = arith.constant 3.200000e+01 : f32
    %82 = vector.broadcast %cst_47 : f32 to vector<8x1xf32>
    %83 = arith.divf %81, %82 : vector<8x1xf32>
    %84 = vector.broadcast %83 : vector<8x1xf32> to vector<8x32xf32>
    %85 = arith.subf %79, %84 : vector<8x32xf32>
    %86 = arith.mulf %85, %85 : vector<8x32xf32>
    %cst_48 = arith.constant dense<0.000000e+00> : vector<8xf32>
    %87 = vector.multi_reduction <add>, %86, %cst_48 [1] : vector<8x32xf32> to vector<8xf32>
    %88 = vector.shape_cast %87 : vector<8xf32> to vector<8x1xf32>
    %cst_49 = arith.constant 3.200000e+01 : f32
    %89 = vector.broadcast %cst_49 : f32 to vector<8x1xf32>
    %90 = arith.divf %88, %89 : vector<8x1xf32>
    %91 = vector.broadcast %83 : vector<8x1xf32> to vector<8x32xf32>
    %92 = arith.subf %79, %91 : vector<8x32xf32>
    %cst_50 = arith.constant 9.99999974E-6 : f32
    %93 = vector.broadcast %cst_50 : f32 to vector<8x1xf32>
    %94 = arith.addf %90, %93 : vector<8x1xf32>
    %95 = math.rsqrt %94 : vector<8x1xf32>
    %96 = vector.broadcast %95 : vector<8x1xf32> to vector<8x32xf32>
    %97 = arith.mulf %92, %96 : vector<8x32xf32>
    %c0_51 = arith.constant 0 : index
    %c0_52 = arith.constant 0 : index
    %98 = vector.load %arg12[%c0_51, %c0_52] : memref<1x32xf32, #tpu.memory_space<vmem>>, vector<1x32xf32>
    %99 = vector.shape_cast %98 : vector<1x32xf32> to vector<32xf32>
    %100 = vector.shape_cast %99 : vector<32xf32> to vector<1x32xf32>
    %101 = vector.broadcast %100 : vector<1x32xf32> to vector<8x32xf32>
    %102 = arith.mulf %97, %101 : vector<8x32xf32>
    %c0_53 = arith.constant 0 : index
    %c0_54 = arith.constant 0 : index
    %103 = vector.load %arg13[%c0_53, %c0_54] : memref<1x32xf32, #tpu.memory_space<vmem>>, vector<1x32xf32>
    %104 = vector.shape_cast %103 : vector<1x32xf32> to vector<32xf32>
    %105 = vector.shape_cast %104 : vector<32xf32> to vector<1x32xf32>
    %106 = vector.broadcast %105 : vector<1x32xf32> to vector<8x32xf32>
    %107 = arith.addf %102, %106 : vector<8x32xf32>
    %108 = arith.truncf %107 : vector<8x32xf32> to vector<8x32xbf16>
    %c0_55 = arith.constant 0 : index
    %c0_56 = arith.constant 0 : index
    %109 = vector.load %arg14[%c0_55, %c0_56] : memref<32x64xbf16, #tpu.memory_space<vmem>>, vector<32x64xbf16>
    %cst_57 = arith.constant dense<0.000000e+00> : vector<8x64xf32>
    %110 = tpu.matmul %108, %109, %cst_57 {dimension_numbers = #tpu.dot_dimension_numbers<[1], [0], [0], [1], [0, 0, 1, 1], [], []>} : vector<8x32xbf16>, vector<32x64xbf16>, vector<8x64xf32> -> vector<8x64xf32>
    %c0_58 = arith.constant 0 : index
    %c0_59 = arith.constant 0 : index
    %111 = vector.load %arg15[%c0_58, %c0_59] : memref<1x64xf32, #tpu.memory_space<vmem>>, vector<1x64xf32>
    %112 = vector.shape_cast %111 : vector<1x64xf32> to vector<64xf32>
    %113 = vector.shape_cast %112 : vector<64xf32> to vector<1x64xf32>
    %114 = vector.broadcast %113 : vector<1x64xf32> to vector<8x64xf32>
    %115 = arith.addf %110, %114 : vector<8x64xf32>
    %cst_60 = arith.constant 0.000000e+00 : f32
    %116 = vector.broadcast %cst_60 : f32 to vector<8x64xf32>
    %117 = arith.maximumf %115, %116 : vector<8x64xf32>
    %118 = arith.truncf %117 : vector<8x64xf32> to vector<8x64xbf16>
    %c0_61 = arith.constant 0 : index
    %c0_62 = arith.constant 0 : index
    %119 = vector.load %arg16[%c0_61, %c0_62] : memref<64x32xbf16, #tpu.memory_space<vmem>>, vector<64x32xbf16>
    %cst_63 = arith.constant dense<0.000000e+00> : vector<8x32xf32>
    %120 = tpu.matmul %118, %119, %cst_63 {dimension_numbers = #tpu.dot_dimension_numbers<[1], [0], [0], [1], [0, 0, 1, 1], [], []>} : vector<8x64xbf16>, vector<64x32xbf16>, vector<8x32xf32> -> vector<8x32xf32>
    %c0_64 = arith.constant 0 : index
    %c0_65 = arith.constant 0 : index
    %121 = vector.load %arg17[%c0_64, %c0_65] : memref<1x32xf32, #tpu.memory_space<vmem>>, vector<1x32xf32>
    %122 = vector.shape_cast %121 : vector<1x32xf32> to vector<32xf32>
    %123 = vector.shape_cast %122 : vector<32xf32> to vector<1x32xf32>
    %124 = vector.broadcast %123 : vector<1x32xf32> to vector<8x32xf32>
    %125 = arith.addf %120, %124 : vector<8x32xf32>
    %126 = arith.addf %125, %107 : vector<8x32xf32>
    %cst_66 = arith.constant dense<0.000000e+00> : vector<8xf32>
    %127 = vector.multi_reduction <add>, %126, %cst_66 [1] : vector<8x32xf32> to vector<8xf32>
    %128 = vector.shape_cast %127 : vector<8xf32> to vector<8x1xf32>
    %cst_67 = arith.constant 3.200000e+01 : f32
    %129 = vector.broadcast %cst_67 : f32 to vector<8x1xf32>
    %130 = arith.divf %128, %129 : vector<8x1xf32>
    %131 = vector.broadcast %130 : vector<8x1xf32> to vector<8x32xf32>
    %132 = arith.subf %126, %131 : vector<8x32xf32>
    %133 = arith.mulf %132, %132 : vector<8x32xf32>
    %cst_68 = arith.constant dense<0.000000e+00> : vector<8xf32>
    %134 = vector.multi_reduction <add>, %133, %cst_68 [1] : vector<8x32xf32> to vector<8xf32>
    %135 = vector.shape_cast %134 : vector<8xf32> to vector<8x1xf32>
    %cst_69 = arith.constant 3.200000e+01 : f32
    %136 = vector.broadcast %cst_69 : f32 to vector<8x1xf32>
    %137 = arith.divf %135, %136 : vector<8x1xf32>
    %138 = vector.broadcast %130 : vector<8x1xf32> to vector<8x32xf32>
    %139 = arith.subf %126, %138 : vector<8x32xf32>
    %cst_70 = arith.constant 9.99999974E-6 : f32
    %140 = vector.broadcast %cst_70 : f32 to vector<8x1xf32>
    %141 = arith.addf %137, %140 : vector<8x1xf32>
    %142 = math.rsqrt %141 : vector<8x1xf32>
    %143 = vector.broadcast %142 : vector<8x1xf32> to vector<8x32xf32>
    %144 = arith.mulf %139, %143 : vector<8x32xf32>
    %c0_71 = arith.constant 0 : index
    %c0_72 = arith.constant 0 : index
    %145 = vector.load %arg18[%c0_71, %c0_72] : memref<1x32xf32, #tpu.memory_space<vmem>>, vector<1x32xf32>
    %146 = vector.shape_cast %145 : vector<1x32xf32> to vector<32xf32>
    %147 = vector.shape_cast %146 : vector<32xf32> to vector<1x32xf32>
    %148 = vector.broadcast %147 : vector<1x32xf32> to vector<8x32xf32>
    %149 = arith.mulf %144, %148 : vector<8x32xf32>
    %c0_73 = arith.constant 0 : index
    %c0_74 = arith.constant 0 : index
    %150 = vector.load %arg19[%c0_73, %c0_74] : memref<1x32xf32, #tpu.memory_space<vmem>>, vector<1x32xf32>
    %151 = vector.shape_cast %150 : vector<1x32xf32> to vector<32xf32>
    %152 = vector.shape_cast %151 : vector<32xf32> to vector<1x32xf32>
    %153 = vector.broadcast %152 : vector<1x32xf32> to vector<8x32xf32>
    %154 = arith.addf %149, %153 : vector<8x32xf32>
    %c0_75 = arith.constant 0 : index
    %c0_76 = arith.constant 0 : index
    %c0_77 = arith.constant 0 : index
    %155 = vector.load %arg20[%c0_75, %c0_76, %c0_77] : memref<1x8x32xf32, #tpu.memory_space<vmem>>, vector<1x8x32xf32>
    %156 = vector.shape_cast %155 : vector<1x8x32xf32> to vector<8x32xf32>
    %157 = vector.shape_cast %154 : vector<8x32xf32> to vector<1x8x32xf32>
    tpu.vector_store %arg20[%c0_75, %c0_76, %c0_77], %157 {strides = array<i32>} : memref<1x8x32xf32, #tpu.memory_space<vmem>>, vector<1x8x32xf32>,
    return
  }
  func.func @transform_0(%arg0: i32, %arg1: i32) -> (i32, i32, i32) {
    %c0_i32 = arith.constant 0 : i32
    %c0_i32_0 = arith.constant 0 : i32
    return %arg0, %arg1, %c0_i32 : i32, i32, i32
  }
  func.func @transform_1(%arg0: i32, %arg1: i32) -> (i32, i32, i32) {
    %c0_i32 = arith.constant 0 : i32
    %c0_i32_0 = arith.constant 0 : i32
    %c0_i32_1 = arith.constant 0 : i32
    return %arg0, %c0_i32, %c0_i32_0 : i32, i32, i32
  }
  func.func @transform_2(%arg0: i32, %arg1: i32) -> (i32, i32) {
    %c0_i32 = arith.constant 0 : i32
    %c0_i32_0 = arith.constant 0 : i32
    %c0_i32_1 = arith.constant 0 : i32
    return %c0_i32, %c0_i32_0 : i32, i32
  }
  func.func @transform_3(%arg0: i32, %arg1: i32) -> (i32, i32) {
    %c0_i32 = arith.constant 0 : i32
    %c0_i32_0 = arith.constant 0 : i32
    %c0_i32_1 = arith.constant 0 : i32
    return %c0_i32, %c0_i32_0 : i32, i32
  }
  func.func @transform_4(%arg0: i32, %arg1: i32) -> (i32, i32) {
    %c0_i32 = arith.constant 0 : i32
    %c0_i32_0 = arith.constant 0 : i32
    %c0_i32_1 = arith.constant 0 : i32
    return %c0_i32, %c0_i32_0 : i32, i32
  }
  func.func @transform_5(%arg0: i32, %arg1: i32) -> (i32, i32) {
    %c0_i32 = arith.constant 0 : i32
    %c0_i32_0 = arith.constant 0 : i32
    %c0_i32_1 = arith.constant 0 : i32
    return %c0_i32, %c0_i32_0 : i32, i32
  }
  func.func @transform_6(%arg0: i32, %arg1: i32) -> (i32, i32) {
    %c0_i32 = arith.constant 0 : i32
    %c0_i32_0 = arith.constant 0 : i32
    %c0_i32_1 = arith.constant 0 : i32
    return %c0_i32, %c0_i32_0 : i32, i32
  }
  func.func @transform_7(%arg0: i32, %arg1: i32) -> (i32, i32) {
    %c0_i32 = arith.constant 0 : i32
    %c0_i32_0 = arith.constant 0 : i32
    %c0_i32_1 = arith.constant 0 : i32
    return %c0_i32, %c0_i32_0 : i32, i32
  }
  func.func @transform_8(%arg0: i32, %arg1: i32) -> (i32, i32) {
    %c0_i32 = arith.constant 0 : i32
    %c0_i32_0 = arith.constant 0 : i32
    %c0_i32_1 = arith.constant 0 : i32
    return %c0_i32, %c0_i32_0 : i32, i32
  }
  func.func @transform_9(%arg0: i32, %arg1: i32) -> (i32, i32) {
    %c0_i32 = arith.constant 0 : i32
    %c0_i32_0 = arith.constant 0 : i32
    %c0_i32_1 = arith.constant 0 : i32
    return %c0_i32, %c0_i32_0 : i32, i32
  }
  func.func @transform_10(%arg0: i32, %arg1: i32) -> (i32, i32) {
    %c0_i32 = arith.constant 0 : i32
    %c0_i32_0 = arith.constant 0 : i32
    %c0_i32_1 = arith.constant 0 : i32
    return %c0_i32, %c0_i32_0 : i32, i32
  }
  func.func @transform_11(%arg0: i32, %arg1: i32) -> (i32, i32) {
    %c0_i32 = arith.constant 0 : i32
    %c0_i32_0 = arith.constant 0 : i32
    %c0_i32_1 = arith.constant 0 : i32
    return %c0_i32, %c0_i32_0 : i32, i32
  }
  func.func @transform_12(%arg0: i32, %arg1: i32) -> (i32, i32) {
    %c0_i32 = arith.constant 0 : i32
    %c0_i32_0 = arith.constant 0 : i32
    %c0_i32_1 = arith.constant 0 : i32
    return %c0_i32, %c0_i32_0 : i32, i32
  }
  func.func @transform_13(%arg0: i32, %arg1: i32) -> (i32, i32) {
    %c0_i32 = arith.constant 0 : i32
    %c0_i32_0 = arith.constant 0 : i32
    %c0_i32_1 = arith.constant 0 : i32
    return %c0_i32, %c0_i32_0 : i32, i32
  }
  func.func @transform_14(%arg0: i32, %arg1: i32) -> (i32, i32) {
    %c0_i32 = arith.constant 0 : i32
    %c0_i32_0 = arith.constant 0 : i32
    %c0_i32_1 = arith.constant 0 : i32
    return %c0_i32, %c0_i32_0 : i32, i32
  }
  func.func @transform_15(%arg0: i32, %arg1: i32) -> (i32, i32) {
    %c0_i32 = arith.constant 0 : i32
    %c0_i32_0 = arith.constant 0 : i32
    %c0_i32_1 = arith.constant 0 : i32
    return %c0_i32, %c0_i32_0 : i32, i32
  }
  func.func @transform_16(%arg0: i32, %arg1: i32) -> (i32, i32) {
    %c0_i32 = arith.constant 0 : i32
    %c0_i32_0 = arith.constant 0 : i32
    %c0_i32_1 = arith.constant 0 : i32
    return %c0_i32, %c0_i32_0 : i32, i32
  }
  func.func @transform_17(%arg0: i32, %arg1: i32) -> (i32, i32) {
    %c0_i32 = arith.constant 0 : i32
    %c0_i32_0 = arith.constant 0 : i32
    %c0_i32_1 = arith.constant 0 : i32
    return %c0_i32, %c0_i32_0 : i32, i32
  }
  func.func @transform_18(%arg0: i32, %arg1: i32) -> (i32, i32, i32) {
    %c0_i32 = arith.constant 0 : i32
    %c0_i32_0 = arith.constant 0 : i32
    return %arg0, %arg1, %c0_i32 : i32, i32, i32
  }
  func.func @transform_19(%arg0: i32, %arg1: i32) -> (i32, i32, i32, i32) {
    %c0_i32 = arith.constant 0 : i32
    %c0_i32_0 = arith.constant 0 : i32
    %c0_i32_1 = arith.constant 0 : i32
    return %c0_i32, %arg0, %arg1, %c0_i32_0 : i32, i32, i32, i32
  }
}

</mosaic_0001>

<bundles_post_ra>
// kernel: tpu_custom_call.1
= control target key start
LH: loop header
LB: loop body
LE: loop exit
PB: predicated region body
PF: predicated region fallthrough
CT: control target
= control target key end

     0   :  { %s3208_s0 = inlined_call_operand.vmem [shape: f32[2,8,32], index: 0, kind: input, shape index: {}]   ;;  %s3209_s1 = inlined_call_operand.hbm [shape: bf16[2,8,32], index: 1, kind: input, shape index: {}]   ;;  %s3210_s2 = inlined_call_operand.vmem [shape: bf16[32,32], index: 2, kind: input, shape index: {}]   ;;  %s3211_s3 = inlined_call_operand.vmem [shape: f32[1,32], index: 3, kind: input, shape index: {}]   ;;  %s3212_s4 = inlined_call_operand.vmem [shape: bf16[32,32], index: 4, kind: input, shape index: {}]   ;;  %s3213_s5 = inlined_call_operand.vmem [shape: f32[1,32], index: 5, kind: input, shape index: {}]   ;;  %s3214_s6 = inlined_call_operand.hbm [shape: bf16[32,32], index: 6, kind: input, shape index: {}]   ;;  %s3215_s7 = inlined_call_operand.hbm [shape: f32[1,32], index: 7, kind: input, shape index: {}]   ;;  %s3216_s8 = inlined_call_operand.hbm [shape: bf16[32,32], index: 8, kind: input, shape index: {}]   ;;  %s3217_s9 = inlined_call_operand.hbm [shape: f32[1,32], index: 9, kind: input, shape index: {}]   ;;  %s3218_s10 = inlined_call_operand.vmem [shape: f32[1,32], index: 10, kind: input, shape index: {}]   ;;  %s3219_s11 = inlined_call_operand.vmem [shape: f32[1,32], index: 11, kind: input, shape index: {}]   ;;  %s3220_s12 = inlined_call_operand.vmem [shape: bf16[32,64], index: 12, kind: input, shape index: {}]   ;;  %s3221_s13 = inlined_call_operand.vmem [shape: f32[1,64], index: 13, kind: input, shape index: {}]   ;;  %s3222_s14 = inlined_call_operand.vmem [shape: bf16[64,32], index: 14, kind: input, shape index: {}]   ;;  %s3223_s15 = inlined_call_operand.vmem [shape: f32[1,32], index: 15, kind: input, shape index: {}]   ;;  %s3224_s16 = inlined_call_operand.vmem [shape: f32[1,32], index: 16, kind: input, shape index: {}]   ;;  %s3225_s17 = inlined_call_operand.vmem [shape: f32[1,32], index: 17, kind: input, shape index: {}]   ;;  %s3226_s18 = inlined_call_operand.hbm [shape: f32[2,8,32], index: 18, kind: output, shape index: {0}]   ;;  %s3227_s19 = inlined_call_operand.hbm [shape: bf16[4,2,8,8], index: 19, kind: output, shape index: {1}]  }
   0x1   :  { %3238 = sst [smem:[#allocation23_spill]] %s3208_s0 }
   0x2   :  { %3239 = sst [smem:[#allocation24_spill]] %s3209_s1 }
   0x3   :  { %3240 = sst [smem:[#allocation25_spill]] %s3210_s2 }
   0x4   :  { %3241 = sst [smem:[#allocation26_spill]] %s3211_s3 }
   0x5   :  { %3242 = sst [smem:[#allocation27_spill]] %s3212_s4 }
   0x6   :  { %3243 = sst [smem:[#allocation28_spill]] %s3213_s5 }
   0x7   :  { %3244 = sst [smem:[#allocation29_spill]] %s3214_s6 }
   0x8   :  { %3245 = sst [smem:[#allocation30_spill]] %s3215_s7 }
   0x9   :  { %3246 = sst [smem:[#allocation31_spill]] %s3216_s8 }
   0xa   :  { %3247 = sst [smem:[#allocation32_spill]] %s3217_s9 }
   0xb   :  { %3248 = sst [smem:[#allocation33_spill]] %s3218_s10 }
   0xc   :  { %3249 = sst [smem:[#allocation34_spill]] %s3219_s11 }
   0xd   :  { %3250 = sst [smem:[#allocation35_spill]] %s3221_s13 }
   0xe   :  { %3251 = sst [smem:[#allocation36_spill]] %s3222_s14 }
   0xf   :  { %3252 = sst [smem:[#allocation37_spill]] %s3223_s15 }
  0x10   :  { %3253 = sst [smem:[#allocation38_spill]] %s3224_s16 }
  0x11   :  { %3254 = sst [smem:[#allocation39_spill]] %s3225_s17 }
  0x12   :  { %3255 = sst [smem:[#allocation40_spill]] %s3226_s18 }
  0x13   :  { %3256 = sst [smem:[#allocation41_spill]] %s3227_s19 }
  0x14   :  { %25 = vsyncpa [#allocation7], 0 }
  0x15   :  { %27 = vsyncpa [#allocation7 + $0x1], 0 }
  0x16   :  { %28 = vsyncpa [#allocation10], 0 }
  0x17   :  { %29 = vsyncpa [#allocation13], 0 }
  0x18   :  { %30 = vsyncpa [#allocation8], 0 }
  0x19   :  { %32 = vsyncpa [#allocation8 + $0x1], 0 }
  0x1a   :  { %33 = vsyncpa [#allocation17], 0 }
  0x1b   :  { %35 = vsyncpa [#allocation17 + $0x1], 0  ;;  %s2692_s0 = smov 0   ;;  %s2694_s30 = smov 0  }
  0x1c   :  { %s2696_s20 = smov 0   ;;  %s2698_s21 = smov 0  }
  0x1d   :  { %s2700_s1 = smov 0   ;;  %s2702_s22 = smov 0  }
  0x1e LB: > { %s3230_s2 = sadd.s32 4294967295, %s2570_s22   ;;  %p1942_p0 = scmp.ge.s32.totalorder %s2570_s22, 1  ;;  %s2570_s22 = sphi %s2702_s22, %s41_s22   ;;  %s2566_s1 = sphi %s2700_s1, %s3296_s1   ;;  %s2562_s21 = sphi %s2698_s21, %s3295_s21   ;;  %s2558_s20 = sphi %s2696_s20, %s3294_s20   ;;  %s2554_s30 = sphi %s2694_s30, %s3293_s30   ;;  %s2550_s0 = sphi %s2692_s0, %s3292_s0  }
  0x1f   : > { %p2726_p1 = scmp.eq.s32.totalorder %s3230_s2, 0  ;;  %p504_p2 = scmp.lt.s32.totalorder %s2570_s22, 3 }
  0x20   : > { %s2572_s25 = smov [#allocation9]   ;;  %s2573_s27 = smov [#allocation12]  }
  0x21   : > { %s3257_s23 = scalar_select %p2726_p1, 1, 0 }
  0x22   : > { %p2731_p3 = pnand %p1942_p0, %p504_p2  ;;  %s528_s3 = sshll.u32 %s2572_s25, 4  ;;  %s2735_s3 = int_to_ptr.vmem [resolvable:$true] %s528_s3 }
  0x23   : > { %s552_s28 = sshll.u32 %s2573_s27, 4  ;;  %s2574_s29 = smov [#allocation11]   ;;  %s2746_s28 = int_to_ptr.vmem [resolvable:$true] %s552_s28 }
  0x24   : > { %s3258_s24 = scalar_select %p2731_p3, 1, 0 }
  0x25   : > { %p2173_p4 = pneg %p2731_p3  ;;  %s2748_s2 = sshll.u32 %s2574_s29, 4  ;;  %s543_s2 = int_to_ptr.vmem [resolvable:$true] %s2748_s2 }
  0x26   : > { %s3260_s6 = sld [smem:[#allocation29_spill]] }
  0x27   : > { %p2742_p6 = pnand %p2173_p4, %p2726_p1 }
  0x29   : > { %p2758_p8 = pneg %p2742_p6 }
  0x2c   : > { %s2306_s17 = scalar_lea.hbm %s3260_s6, 256 }
  0x2d   : > { %p2307_p7 = scmp.ne.s32.totalorder %s3260_s6, %s2306_s17  ;;  %p2313_p11 = scmp.lt.u32.totalorder %s2306_s17, %s3260_s6 }
  0x2f   : > { %p2309_p9 = pnand %p2758_p8, %p2307_p7 }
  0x31   : > { %p2310_p10 = pneg %p2309_p9 }
  0x33   : > { %p2315_p12 = pnand %p2313_p11, %p2310_p10 }
  0x35   : > { %2318 = shalt.err (!%p2315_p12)
}
  0x36   : > { %s2319_s16 = scalar_lea.vmem %s2735_s3, 256  ;;  %p2327_p4 = scmp.lt.s32.totalorder %s2735_s3, %s2735_s3 }
  0x37   : > { %p2320_p13 = scmp.ne.s32.totalorder %s2735_s3, %s2319_s16  ;;  %p2328_p5 = scmp.lt.s32.totalorder %s2319_s16, %s2319_s16 }
  0x39   : > { %p2322_p0 = pnand %p2320_p13, %p2758_p8  ;;  %p2329_p7 = por %p2328_p5, %p2327_p4 }
  0x3b   : > { %p2323_p2 = pneg %p2322_p0 }
  0x3d   : > { %p2330_p9 = pnand %p2329_p7, %p2323_p2 }
  0x3f   : > { %2333 = shalt.err (!%p2330_p9)
}
  0x40   : > { %s2575_s18 = smov 64   ;;  %s2576_s17 = smov 4  }
  0x41   : > { %2176 = dma.hbm_to_vmem [thread:$0]  (!%p2742_p6), %s3260_s6, 256, %s2735_s3, [#allocation10], %s2575_s18, %s2575_s18, %s2576_s17  }
  0x42   : > { %s3262_s8 = sld [smem:[#allocation31_spill]] }
  0x48   : > { %s2334_s13 = scalar_lea.hbm %s3262_s8, 256 }
  0x49   : > { %p2335_p5 = scmp.ne.s32.totalorder %s3262_s8, %s2334_s13  ;;  %p2341_p12 = scmp.lt.u32.totalorder %s2334_s13, %s3262_s8 }
  0x4b   : > { %p2337_p10 = pnand %p2335_p5, %p2758_p8 }
  0x4d   : > { %p2338_p11 = pneg %p2337_p10 }
  0x4f   : > { %p2343_p13 = pnand %p2341_p12, %p2338_p11 }
  0x51   : > { %2346 = shalt.err (!%p2343_p13)
}
  0x52   : > { %s2347_s3 = scalar_lea.vmem %s2746_s28, 256  ;;  %p2355_p7 = scmp.lt.s32.totalorder %s2746_s28, %s2746_s28 }
  0x53   : > { %p2348_p0 = scmp.ne.s32.totalorder %s2746_s28, %s2347_s3  ;;  %p2356_p9 = scmp.lt.s32.totalorder %s2347_s3, %s2347_s3 }
  0x55   : > { %p2350_p2 = pnand %p2348_p0, %p2758_p8  ;;  %p2357_p5 = por %p2356_p9, %p2355_p7 }
  0x57   : > { %p2351_p4 = pneg %p2350_p2 }
  0x59   : > { %p2358_p10 = pnand %p2357_p5, %p2351_p4 }
  0x5b   : > { %2361 = shalt.err (!%p2358_p10)
}
  0x5c   : > { %2182 = dma.hbm_to_vmem [thread:$0]  (!%p2742_p6), %s3262_s8, 256, %s2746_s28, [#allocation13], %s2575_s18, %s2575_s18, %s2576_s17  }
  0x5d   : > { %s3263_s7 = sld [smem:[#allocation30_spill]] }
  0x63   : > { %s2362_s19 = scalar_lea.hbm %s3263_s7, 16 }
  0x64   : > { %p2363_p11 = scmp.ne.s32.totalorder %s3263_s7, %s2362_s19  ;;  %p2369_p0 = scmp.lt.u32.totalorder %s2362_s19, %s3263_s7 }
  0x66   : > { %p2365_p12 = pnand %p2363_p11, %p2758_p8 }
  0x68   : > { %p2366_p13 = pneg %p2365_p12 }
  0x6a   : > { %p2371_p2 = pnand %p2369_p0, %p2366_p13 }
  0x6c   : > { %2374 = shalt.err (!%p2371_p2)
}
  0x6d   : > { %s2375_s3 = scalar_lea.vmem %s543_s2, 16  ;;  %s2382_s28 = scalar_lea.vmem %s543_s2, 32 }
  0x6e   : > { %p2376_p4 = scmp.ne.s32.totalorder %s543_s2, %s2375_s3  ;;  %p2383_p5 = scmp.lt.s32.totalorder %s543_s2, %s543_s2 }
  0x6f   : > { %p2384_p10 = scmp.lt.s32.totalorder %s2382_s28, %s2375_s3 }
  0x70   : > { %p2378_p7 = pnand %p2376_p4, %p2758_p8 }
  0x71   : > { %p2385_p3 = por %p2384_p10, %p2383_p5 }
  0x72   : > { %p2379_p9 = pneg %p2378_p7 }
  0x74   : > { %p2386_p1 = pnand %p2385_p3, %p2379_p9 }
  0x76   : > { %2389 = shalt.err (!%p2386_p1)
}
  0x77   : > { %2179 = dma.hbm_to_vmem [thread:$0]  (!%p2742_p6), %s3263_s7, 16, %s543_s2, [#allocation10]  }
  0x78   : > { %s2577_s10 = smov [#allocation14]   ;;  %s3264_s9 = sld [smem:[#allocation32_spill]] }
  0x79   : > { %s566_s11 = sshll.u32 %s2577_s10, 4  ;;  %s567_s11 = int_to_ptr.vmem [resolvable:$true] %s566_s11 }
  0x7e   : > { %s2390_s19 = scalar_lea.hbm %s3264_s9, 16 }
  0x7f   : > { %p2391_p11 = scmp.ne.s32.totalorder %s3264_s9, %s2390_s19  ;;  %p2397_p12 = scmp.lt.u32.totalorder %s2390_s19, %s3264_s9 }
  0x81   : > { %p2393_p1 = pnand %p2391_p11, %p2758_p8 }
  0x83   : > { %p2394_p3 = pneg %p2393_p1 }
  0x85   : > { %p2399_p13 = pnand %p2397_p12, %p2394_p3 }
  0x87   : > { %2402 = shalt.err (!%p2399_p13)
}
  0x88   : > { %s2403_s2 = scalar_lea.vmem %s567_s11, 16  ;;  %s2410_s3 = scalar_lea.vmem %s567_s11, 32 }
  0x89   : > { %p2404_p0 = scmp.ne.s32.totalorder %s567_s11, %s2403_s2  ;;  %p2411_p7 = scmp.lt.s32.totalorder %s567_s11, %s567_s11 }
  0x8a   : > { %p2412_p9 = scmp.lt.s32.totalorder %s2410_s3, %s2403_s2 }
  0x8b   : > { %p2406_p2 = pnand %p2404_p0, %p2758_p8 }
  0x8c   : > { %p2413_p5 = por %p2412_p9, %p2411_p7 }
  0x8d   : > { %p2407_p4 = pneg %p2406_p2 }
  0x8f   : > { %p2414_p10 = pnand %p2413_p5, %p2407_p4 }
  0x91   : > { %2417 = shalt.err (!%p2414_p10)
}
  0x92   : > { %2185 = dma.hbm_to_vmem [thread:$0]  (!%p2742_p6), %s3264_s9, 16, %s567_s11, [#allocation13]  }
  0x93   : > { %s1941_s15 = sadd.s32 4294967294, %s2570_s22   ;;  %s53_s17 = sadd.s32 1, %s2566_s1 }
  0x94   : > { %p55_p8 = scmp.ge.s32.totalorder %s53_s17, 2  ;;  %s88_s26 = sadd.s32 1, %s2558_s20 }
  0x95   : > { %p95_p11 = scmp.ne.s32.totalorder %s2558_s20, %s2554_s30  ;;  %p96_p1 = scmp.eq.s32.totalorder %s2570_s22, 0 }
  0x96   : > { %s3298_s17 = smov (%p55_p8, %s53_s17), 0  ;;  %p101_p12 = scmp.ne.s32.totalorder %s2554_s30, %s2550_s0 }
  0x97   : > { %p2847_p3 = por %p96_p1, %p95_p11  ;;  %s85_s11 = ssub.s32 %s2566_s1, %s3298_s17 }
  0x98   : > { %s3266_s13 = sadd.s32 4294967295, %s2570_s22   ;;  %p86_p13 = scmp.eq.s32.totalorder %s85_s11, 0 }
  0x99   : > { %p463_p6 = scmp.eq.s32.totalorder %s3266_s13, 1  ;;  %p3267_p0 = scmp.ne.s32.totalorder %s3257_s23, 0 }
  0x9a   : > { %p469_p7 = scmp.eq.s32.totalorder %s1941_s15, 1  ;;  %p2201_p5 = scmp.lt.s32.totalorder %s2570_s22, 2 }
  0x9b   : > { %p2859_p2 = por %p3267_p0, %p101_p12  ;;  %p2863_p4 = por %p463_p6, %p95_p11 }
  0x9c   : > { %s2868_s25 = scalar_select %p86_p13, %s2558_s20, %s88_s26  }
  0x9d   : > { %s3269_s19 = scalar_select %p2863_p4, 1, 0 }
  0x9e   : > { %p2870_p9 = por %p469_p7, %p101_p12  ;;  %s611_s29 = sand.u32 1, %s2558_s20  }
  0x9f   : > { %s1949_s16 = sshll.u32 %s2566_s1, 6  ;;  %s1948_s2 = sshll.u32 %s611_s29, 2 }
  0xa0   : > { %s3270_s27 = scalar_select %p2870_p9, 1, 0 }
  0xa1   : > { %s3271_s18 = sld [smem:[#allocation24_spill]]  ;;  %s615_s15 = scalar_lea.vmem [#allocation6], %s1948_s2 }
  0xa2   : > { %s622_s26 = sshll.u32 %s615_s15, 4  ;;  %p2884_p10 = pnand %p2201_p5, %p2847_p3  ;;  %s2888_s26 = int_to_ptr.vmem [resolvable:$true] %s622_s26 }
  0xa3   : > { %s612_s6 = scalar_lea.sflag [#allocation7], %s611_s29 }
  0xa4   : > { %p2420_p11 = pneg %p2884_p10 }
  0xa7   : > { %s2880_s11 = scalar_lea.hbm %s3271_s18, %s1949_s16  ;;  %s2423_s10 = scalar_lea.hbm %s3271_s18, 128 }
  0xa8   : > { %s2418_s7 = scalar_lea.hbm %s2880_s11, 64  ;;  %p2424_p3 = scmp.lt.u32.totalorder %s2880_s11, %s3271_s18 }
  0xa9   : > { %p2419_p8 = scmp.ne.s32.totalorder %s2880_s11, %s2418_s7  ;;  %p2425_p6 = scmp.lt.u32.totalorder %s2423_s10, %s2418_s7 }
  0xaa   : > { %p2427_p0 = scmp.lt.u32.totalorder %s2418_s7, %s2880_s11 }
  0xab   : > { %p2421_p1 = pnand %p2420_p11, %p2419_p8  ;;  %p2426_p13 = por %p2425_p6, %p2424_p3 }
  0xad   : > { %p2422_p12 = pneg %p2421_p1  ;;  %p2428_p7 = por %p2427_p0, %p2426_p13 }
  0xaf   : > { %p2429_p5 = pnand %p2428_p7, %p2422_p12 }
  0xb1   : > { %2432 = shalt.err (!%p2429_p5)
}
  0xb2   : > { %s2433_s29 = scalar_lea.vmem %s2888_s26, 64  ;;  %s2578_s15 = smov [#allocation6]  }
  0xb3   : > { %p2434_p8 = scmp.ne.s32.totalorder %s2888_s26, %s2433_s29  ;;  %s2438_s16 = sshll.u32 %s2578_s15, 4  ;;  %s2439_s16 = int_to_ptr.vmem [resolvable:$false] %s2438_s16 }
  0xb4   : > { %s2440_s2 = scalar_lea.vmem %s2439_s16, 128  ;;  %p2441_p4 = scmp.lt.s32.totalorder %s2888_s26, %s2439_s16 }
  0xb5   : > { %p2436_p1 = pnand %p2434_p8, %p2420_p11  ;;  %p2442_p3 = scmp.lt.s32.totalorder %s2440_s2, %s2433_s29 }
  0xb7   : > { %p2437_p9 = pneg %p2436_p1  ;;  %p2443_p6 = por %p2442_p3, %p2441_p4 }
  0xb9   : > { %p2444_p13 = pnand %p2443_p6, %p2437_p9 }
  0xbb   : > { %2447 = shalt.err (!%p2444_p13)
}
  0xbc   : > { %2189 = dma.hbm_to_vmem [thread:$0]  (!%p2884_p10), %s2880_s11, 64, %s2888_s26, %s612_s6  }
  0xbd   : > { %p3273_p12 = scmp.ne.s32.totalorder %s3258_s24, 0 }
  0xbe   : > { %s2918_s7 = sand.u32 (!%p3273_p12), 1, %s2554_s30  }
  0xbf   : > { %631 = sbr.rel (%p3273_p12) target bundleno = 2734 (0xaae), region = 92  ;;  %s1951_s10 = sshll.u32 (!%p3273_p12), %s2918_s7, 2 }
  0xc0   : > { %s634_s3 = scalar_lea.sflag (!%p3273_p12), [#allocation7], %s2918_s7  ;;  %s637_s28 = scalar_lea.vmem (!%p3273_p12), [#allocation6], %s1951_s10 }
  0xc6   : > { %2529 = dma.done.wait (%p2859_p2), %s634_s3, 64  }
  0xc7   : > { %2531 = vsyncadd (%p2859_p2), %s634_s3, 4294967232  ;;  %p3274_p4 = scmp.ne.s32.totalorder %s3257_s23, 0 }
  0xc9   : > { %2533 = dma.done.wait (%p3274_p4), [#allocation10], 272  }
  0xca   : > { %2535 = vsyncadd (%p3274_p4), [#allocation10], 4294967024 }
  0xcb   : > { %2537 = dma.done.wait (%p3274_p4), [#allocation13], 272  }
  0xcc   : > { %2539 = vsyncadd (%p3274_p4), [#allocation13], 4294967024  ;;  %v2579_v0 = vmov 0.0   ;;  %vm2580_vm0 = vmmov 0   ;;  %p720_p2 = scmp.lt.s32.totalorder %s2562_s21, 1  ;;  %s3275_s4 = sld [smem:[#allocation27_spill]] }
  0xcd   : > { %2051 = vmatprep.subr.bf16.mxu0 %v2579_v0  ;;  %2055 = vmatprep.mubr.msk.bf16.mxu0 %vm2580_vm0, %v2579_v0  ;;  %v733_v3 = vld [vmem:[%s637_s28] sm:$0xf]  ;;  %vm757_vm1 = vcmask 261120   ;;  %s3276_s15 = sld [smem:[#allocation25_spill]]  ;;  %s3277_s10 = sld [smem:[#allocation23_spill]]  ;;  %v2276_v8 = vld [vmem:[#allocation9] sm:$0xff]  }
  0xce   : > { %2059 = vmatprep.subr.bf16.mxu1 %v2579_v0  ;;  %2063 = vmatprep.mubr.msk.bf16.mxu1 %vm2580_vm0, %v2579_v0  ;;  %s721_s6 = scalar_select %p720_p2, %s2562_s21, 1  ;;  %v2277_v9 = vld [vmem:[#allocation9 + $0x8] sm:$0xff]   ;;  %vm802_vm2 = vcmask 60416   ;;  %vm1003_vm3 = vcmask 64512   ;;  %v1964_v28 = vld [vmem:[#allocation11] ss:$0 sm:$0xff] }
  0xcf   : > { %2060 = vmatpush3.bf16.msra.mxu1 %v2276_v8  ;;  %s3278_s5 = sld [smem:[#allocation28_spill]]  ;;  %s2581_s23 = smov 104   ;;  %vm1247_vm4 = vcmask 1043456   ;;  %vm1438_vm5 = vcmask 126016   ;;  %vm1447_vm6 = vcmask 191616   ;;  %vm1456_vm7 = vcmask 257216  }
  0xd0   : > { %s1958_s26 = sshll.u32 %s721_s6, 3  ;;  %2061 = vmatprep.subr.bf16.mxu1 %v2579_v0  ;;  %s2582_s11 = smov 120   ;;  %vm1664_vm8 = vcmask 523264  }
  0xd1   : > { %s3279_s29 = sld [smem:[#allocation26_spill]]  ;;  %s2583_s16 = smov 112  }
  0xd2   : > { %v2272_v1 = vld [vmem:[%s3275_s4] sm:$0xff]   ;;  %v2273_v2 = vld [vmem:[%s3275_s4 + $0x8] sm:$0xff]   ;;  %s1957_s2 = sshll.u32 %s2918_s7, 4  ;;  %s2585_s24 = smov 24  }
  0xd3   : > { %2052 = vmatpush3.bf16.msra.mxu0 %v2272_v1  ;;  %v2274_v4 = vld [vmem:[%s3276_s15] sm:$0xff]   ;;  %s726_s3 = scalar_lea.vmem %s3277_s10, %s1958_s26  ;;  %v2275_v5 = vld [vmem:[%s3276_s15 + $0x8] sm:$0xff]   ;;  %2062 = vmatpush3.bf16.msra.mxu1 %v2277_v9  ;;  %s3040_s10 = scalar_lea.vmem [#allocation16], %s1957_s2 }
  0xd4   : > { %2053 = vmatprep.subr.bf16.mxu0 %v2579_v0  ;;  %v2959_v6 = vld [vmem:[%s726_s3] sm:$0xff]  ;;  %2075 = vmatprep.subr.bf16.mxu1 %v2579_v0  ;;  %s2584_s3 = smov 8   ;;  %s2586_s14 = smov 16  }
  0xd5   : > { %v905_v7 = vpack.c.bf16 %v2959_v6, %v2959_v6  ;;  %v1959_v10 = vld [vmem:[%s3278_s5] ss:$0 sm:$0xff]  ;;  %s3284_s6 = sld [smem:[#allocation37_spill]]  ;;  %p3286_p10 = scmp.ne.s32.totalorder %s3269_s19, 0 }
  0xd6   : > { %2064 = vmatmul.mubr.msk.bf16.vlgmr.msra.gmra.mrb[0].mxu1 %vm757_vm1, %v733_v3 }
  0xd7   : > { %2054 = vmatpush3.bf16.msra.mxu0 %v2273_v2  ;;  %2077 = vmatprep.mubr.msk.bf16.mxu1 %vm2580_vm0, %v2579_v0  ;;  %v1969_v17 = vld [vmem:[%s3279_s29] ss:$0 sm:$0xff]  ;;  %s3280_s29 = sld [smem:[#allocation36_spill]] }
  0xd8   : > { %2067 = vmatprep.subr.bf16.mxu0 %v2579_v0 }
  0xda   : > { %2056 = vmatmul.mubr.msk.bf16.vlgmr.msra.gmra.mrb[0].mxu0 %vm757_vm1, %v733_v3 }
  0xdb   : > { %2068 = vmatpush3.bf16.msra.mxu0 %v2274_v4  ;;  %2071 = vmatprep.mubr.msk.bf16.mxu0 %vm2580_vm0, %v2579_v0 }
  0xdc   : > { %2069 = vmatprep.subr.bf16.mxu0 %v2579_v0 }
  0xdf   : > { %2070 = vmatpush3.bf16.msra.mxu0 %v2275_v5 }
  0xe0   : > { %2081 = vmatprep.subr.bf16.mxu0 %v2579_v0 }
  0xe2   : > { %2072 = vmatmul.mubr.msk.bf16.vlgmr.msra.gmra.mrb[4].mxu0 %vm757_vm1, %v905_v7 }
  0xe3   : > { %2083 = vmatprep.mubr.msk.bf16.mxu0 %vm2580_vm0, %v2579_v0 }
 0x1a9   : > { %v879_v29 = vpop.f32.mrb[0].mxu1 }
 0x1aa   : > { %v880_v30 = vadd.f32 %v1964_v28, %v879_v29  ;;  %v2065_v31 = vpop.f32.mrb[1].mxu1 }
 0x1ab   : > { %v882_v32 = vpop.f32.mrb[2].mxu1 }
 0x1ac   : > { %v2995_v33 = vpack.c.bf16 %v880_v30, %v880_v30  ;;  %v2066_v34 = vpop.f32.mrb[3].mxu1 }
 0x1ad   : > { %v795_v11 = vpop.f32.mrb[0].mxu0 }
 0x1ae   : > { %v796_v12 = vadd.f32 %v1959_v10, %v795_v11  ;;  %v2057_v13 = vpop.f32.mrb[1].mxu0  ;;  %886 = vst.msk [vmem:[#allocation3] sm:$0xf] %vm802_vm2, %v2995_v33 }
 0x1af   : > { %v798_v14 = vpop.f32.mrb[2].mxu0 }
 0x1b0   : > { %v801_v15 = vpack.c.bf16 %v796_v12, %v796_v12  ;;  %v2058_v16 = vpop.f32.mrb[3].mxu0 }
 0x1b2   : > { %803 = vst.msk [vmem:[#allocation2] sm:$0xf] %vm802_vm2, %v801_v15  ;;  %817 = vrot.lane.b32.xlu1 %v801_v15, %s2581_s23  ;;  %807 = vrot.lane.b32.xlu0 %v801_v15, %s2582_s11 }
 0x1b5   : > { %v967_v18 = vpop.f32.mrb[4].mxu0  ;;  %v1240_v50 = vld [vmem:[#allocation3] sm:$0xf] }
 0x1b6   : > { %v968_v19 = vadd.f32 %v1969_v17, %v967_v18  ;;  %812 = vrot.lane.b32.xlu0 %v801_v15, %s2583_s16  ;;  %v2073_v20 = vpop.f32.mrb[5].mxu0  ;;  %v1249_v51 = vsel %vm1247_vm4, %v1240_v50, 0 }
 0x1b7   : > { %v970_v21 = vpop.f32.mrb[6].mxu0 }
 0x1b8   : > { %v973_v22 = vmul.f32 0.17677669, %v968_v19  ;;  %v2074_v23 = vpop.f32.mrb[7].mxu0 }
 0x1b9   : > { %v999_v24 = vld [vmem:[#allocation2] sm:$0xf] }
 0x1ba   : > { %v974_v25 = vpack.c.bf16 %v973_v22, %v973_v22  ;;  %v1008_v26 = vsel %vm1003_vm3, %v999_v24, 0 }
 0x1bb   : > { %2076 = vmatpush3.bf16.xpose.msra.mxu1 %v1008_v26 }
 0x1bc   : > { %976 = vst.msk [vmem:[#allocation4] sm:$0xf] %vm802_vm2, %v974_v25  ;;  %985 = vrot.lane.b32.xlu0 %v974_v25, %s2583_s16  ;;  %980 = vrot.lane.b32.xlu1 %v974_v25, %s2582_s11 }
 0x1bd   : > { %2087 = vmatprep.subr.bf16.mxu1 %v2579_v0 }
 0x1c0   : > { %990 = vrot.lane.b32.xlu1 %v974_v25, %s2581_s23 }
 0x1c3   : > { %v995_v27 = vld [vmem:[#allocation4] sm:$0xf] }
 0x1c4   : > { %2078 = vmatmul.mubr.msk.bf16.vlgmr.msra.gmra.mrb[4].mxu1 %vm1003_vm3, %v995_v27 }
 0x1c5   : > { %2089 = vmatprep.mubr.msk.bf16.mxu1 %vm2580_vm0, %v2579_v0 }
 0x224   : > { %v818_v35 = vpop.permute.xlu1 %817  ;;  %v808_v36 = vpop.permute.xlu0 %807 }
 0x225   : > { %821 = vst.msk [vmem:[#allocation2 + $0xc] sm:$0xf] %vm802_vm2, %v818_v35  ;;  %811 = vst.msk [vmem:[#allocation2 + $0x4] sm:$0xf] %vm802_vm2, %v808_v36 }
 0x228   : > { %v813_v37 = vpop.permute.xlu0 %812 }
 0x229   : > { %816 = vst.msk [vmem:[#allocation2 + $0x8] sm:$0xf] %vm802_vm2, %v813_v37 }
 0x22c   : > { %v1000_v38 = vld [vmem:[#allocation2 + $0x4] sm:$0xf]  ;;  %v1002_v45 = vld [vmem:[#allocation2 + $0xc] sm:$0xf] }
 0x22d   : > { %v1054_v39 = vsel %vm1003_vm3, %v1000_v38, 0  ;;  %v1146_v47 = vsel %vm1003_vm3, %v1002_v45, 0 }
 0x22e   : > { %2082 = vmatpush3.bf16.xpose.msra.mxu0 %v1054_v39  ;;  %v986_v40 = vpop.permute.xlu0 %985  ;;  %v981_v41 = vpop.permute.xlu1 %980 }
 0x22f   : > { %989 = vst.msk [vmem:[#allocation4 + $0x8] sm:$0xf] %vm802_vm2, %v986_v40  ;;  %984 = vst.msk [vmem:[#allocation4 + $0x4] sm:$0xf] %vm802_vm2, %v981_v41  ;;  %2093 = vmatprep.subr.bf16.mxu0 %v2579_v0 }
 0x230   : > { %v1001_v42 = vld [vmem:[#allocation2 + $0x8] sm:$0xf] }
 0x231   : > { %v1100_v43 = vsel %vm1003_vm3, %v1001_v42, 0 }
 0x232   : > { %v991_v44 = vpop.permute.xlu1 %990  ;;  %2088 = vmatpush3.bf16.xpose.msra.mxu1 %v1100_v43 }
 0x233   : > { %994 = vst.msk [vmem:[#allocation4 + $0xc] sm:$0xf] %vm802_vm2, %v991_v44  ;;  %2099 = vmatprep.subr.bf16.mxu1 %v2579_v0 }
 0x236   : > { %v996_v46 = vld [vmem:[#allocation4 + $0x4] sm:$0xf]  ;;  %v997_v48 = vld [vmem:[#allocation4 + $0x8] sm:$0xf] }
 0x237   : > { %2084 = vmatmul.mubr.msk.bf16.vlgmr.msra.gmra.mrb[8].mxu0 %vm1003_vm3, %v996_v46 }
 0x238   : > { %2094 = vmatpush3.bf16.xpose.msra.mxu0 %v1146_v47  ;;  %2095 = vmatprep.mubr.msk.bf16.mxu0 %vm2580_vm0, %v2579_v0 }
 0x239   : > { %2090 = vmatmul.mubr.msk.bf16.vlgmr.msra.gmra.mrb[8].mxu1 %vm1003_vm3, %v997_v48  ;;  %2105 = vmatprep.subr.bf16.mxu0 %v2579_v0 }
 0x23a   : > { %2101 = vmatprep.mubr.msk.bf16.mxu1 %vm2580_vm0, %v2579_v0  ;;  %v998_v49 = vld [vmem:[#allocation4 + $0xc] sm:$0xf]  ;;  %2100 = vmatpush3.bf16.msra.mxu1 %v1249_v51 }
 0x23b   : > { %2111 = vmatprep.subr.bf16.mxu1 %v2579_v0 }
 0x23f   : > { %2096 = vmatmul.mubr.msk.bf16.vlgmr.msra.gmra.mrb[12].mxu0 %vm1003_vm3, %v998_v49 }
 0x240   : > { %2107 = vmatprep.mubr.msk.bf16.mxu0 %vm2580_vm0, %v2579_v0 }
 0x297   : > { %v1044_v52 = vpop.f32.mrb[4].mxu1 }
 0x298   : > { %v2079_v53 = vpop.f32.mrb[5].mxu1  ;;  %v1188_v54 = vsel %vm1003_vm3, %v1044_v52, -inf }
 0x299   : > { %1189 = vmax.xlane.f32.xlu0 %v1188_v54  ;;  %v1047_v55 = vpop.f32.mrb[6].mxu1 }
 0x29a   : > { %v2080_v56 = vpop.f32.mrb[7].mxu1 }
 0x30a   : > { %v1090_v57 = vpop.f32.mrb[8].mxu0 }
 0x30b   : > { %v2085_v58 = vpop.f32.mrb[9].mxu0  ;;  %v1191_v59 = vsel %vm1003_vm3, %v1090_v57, -inf }
 0x30c   : > { %v1136_v60 = vpop.f32.mrb[8].mxu1  ;;  %1192 = vmax.xlane.f32.xlu1 %v1191_v59  ;;  %v1093_v61 = vpop.f32.mrb[10].mxu0 }
 0x30d   : > { %v2086_v62 = vpop.f32.mrb[11].mxu0  ;;  %v2091_v63 = vpop.f32.mrb[9].mxu1  ;;  %v1194_v1 = vsel %vm1003_vm3, %v1136_v60, -inf  ;;  %v2278_v61 = vld [vmem:[#allocation12] sm:$0xff]  }
 0x30e   : > { %1195 = vmax.xlane.f32.xlu0 %v1194_v1  ;;  %v1139_v2 = vpop.f32.mrb[10].mxu1 }
 0x30f   : > { %v2092_v3 = vpop.f32.mrb[11].mxu1  ;;  %v2279_v2 = vld [vmem:[#allocation12 + $0x8] sm:$0xff]  }
 0x312   : > { %v1182_v4 = vpop.f32.mrb[12].mxu0 }
 0x313   : > { %v2097_v5 = vpop.f32.mrb[13].mxu0  ;;  %v1197_v7 = vsel %vm1003_vm3, %v1182_v4, -inf }
 0x314   : > { %1198 = vmax.xlane.f32.xlu0 %v1197_v7  ;;  %v1185_v8 = vpop.f32.mrb[14].mxu0 }
 0x315   : > { %v2098_v9 = vpop.f32.mrb[15].mxu0 }
 0x31d   : > { %890 = vrot.lane.b32.xlu1 %v2995_v33, %s2582_s11  ;;  %s1772_s11 = sshll.u32 %s3040_s10, 4  ;;  %s3121_s11 = int_to_ptr.vmem [resolvable:$true] %s1772_s11 }
 0x326   : > { %v1190_v10 = vpop.xlane.xlu0 %1189 }
 0x327   : > { %v1200_v11 = vsub.f32 %v1044_v52, %v1190_v10 }
 0x329   : > { %v1204_v12 = vmul.f32 1.442695, %v1200_v11 }
 0x32b   : > { %2286 = vpow2.f32 %v1204_v12 }
 0x335   : > { %v2287_v13 = vpop.eup %2286 }
 0x336   : > { %v1212_v14 = vsel %vm1003_vm3, %v2287_v13, 0.0 }
 0x341   : > { %1213 = vadd.xlane.f32.xlu1 %v1212_v14 }
 0x399   : > { %v1193_v15 = vpop.xlane.xlu1 %1192 }
 0x39a   : > { %v1201_v16 = vsub.f32 %v1090_v57, %v1193_v15 }
 0x39b   : > { %v1196_v17 = vpop.xlane.xlu0 %1195 }
 0x39c   : > { %v1206_v18 = vmul.f32 1.442695, %v1201_v16  ;;  %v1202_v19 = vsub.f32 %v1136_v60, %v1196_v17 }
 0x39d   : > { %v891_v20 = vpop.permute.xlu1 %890 }
 0x39e   : > { %2288 = vpow2.f32 %v1206_v18  ;;  %v1208_v21 = vmul.f32 1.442695, %v1202_v19  ;;  %894 = vst.msk [vmem:[#allocation3 + $0x4] sm:$0xf] %vm802_vm2, %v891_v20  ;;  %v1985_v19 = vld [vmem:[#allocation14] ss:$0 sm:$0xff] }
 0x3a0   : > { %2290 = vpow2.f32 %v1208_v21 }
 0x3a1   : > { %v1199_v22 = vpop.xlane.xlu0 %1198 }
 0x3a2   : > { %v1203_v23 = vsub.f32 %v1182_v4, %v1199_v22 }
 0x3a4   : > { %v1210_v24 = vmul.f32 1.442695, %v1203_v23 }
 0x3a5   : > { %v1241_v25 = vld [vmem:[#allocation3 + $0x4] sm:$0xf] }
 0x3a6   : > { %2292 = vpow2.f32 %v1210_v24  ;;  %v1295_v26 = vsel %vm1247_vm4, %v1241_v25, 0 }
 0x3a7   : > { %2106 = vmatpush3.bf16.msra.mxu0 %v1295_v26 }
 0x3a8   : > { %v2289_v27 = vpop.eup %2288  ;;  %2117 = vmatprep.subr.bf16.mxu0 %v2579_v0 }
 0x3a9   : > { %v1215_v28 = vsel %vm1003_vm3, %v2289_v27, 0.0 }
 0x3aa   : > { %v2291_v29 = vpop.eup %2290  ;;  %1216 = vadd.xlane.f32.xlu0 %v1215_v28 }
 0x3ab   : > { %v1218_v30 = vsel %vm1003_vm3, %v2291_v29, 0.0 }
 0x3ac   : > { %1219 = vadd.xlane.f32.xlu1 %v1218_v30 }
 0x3b0   : > { %v2293_v31 = vpop.eup %2292 }
 0x3b1   : > { %v1221_v32 = vsel %vm1003_vm3, %v2293_v31, 0.0 }
 0x3b2   : > { %1222 = vadd.xlane.f32.xlu0 %v1221_v32  ;;  %v2280_v32 = vld [vmem:[%s3220_s12] sm:$0xff]  }
 0x3bd   : > { %900 = vrot.lane.b32.xlu1 %v2995_v33, %s2581_s23  ;;  %s3282_s23 = sld [smem:[#allocation34_spill]] }
 0x3c8   : > { %895 = vrot.lane.b32.xlu0 %v2995_v33, %s2583_s16  ;;  %s3285_s16 = sld [smem:[#allocation41_spill]] }
 0x3ce   : > { %v1214_v34 = vpop.xlane.xlu1 %1213 }
 0x3cf   : > { %2294 = vrcp.f32 %v1214_v34  ;;  %v2281_v34 = vld [vmem:[%s3220_s12 + $0x8] sm:$0xff]  }
 0x3d9   : > { %v2295_v35 = vpop.eup %2294 }
 0x3da   : > { %v1228_v36 = vmul.f32 %v2295_v35, %v2287_v13  ;;  %v2283_v35 = vld [vmem:[%s3280_s29 + $0x8] sm:$0xff]  }
 0x3dc   : > { %v1232_v37 = vpack.c.bf16 %v1228_v36, %v1228_v36 }
 0x3de   : > { %1236 = vst.msk [vmem:[%s3040_s10] sm:$0xf] %vm802_vm2, %v1232_v37  ;;  %2102 = vmatmul.mubr.msk.bf16.vlgmr.msra.gmra.mrb[12].mxu1 %vm1003_vm3, %v1232_v37 }
 0x3df   : > { %2113 = vmatprep.mubr.msk.bf16.mxu1 %vm2580_vm0, %v2579_v0 }
 0x437   : > { %v1217_v38 = vpop.xlane.xlu0 %1216 }
 0x438   : > { %2296 = vrcp.f32 %v1217_v38 }
 0x439   : > { %v1220_v33 = vpop.xlane.xlu1 %1219 }
 0x43a   : > { %2298 = vrcp.f32 %v1220_v33 }
 0x43d   : > { %v901_v39 = vpop.permute.xlu1 %900 }
 0x43e   : > { %904 = vst.msk [vmem:[#allocation3 + $0xc] sm:$0xf] %vm802_vm2, %v901_v39 }
 0x43f   : > { %v1223_v40 = vpop.xlane.xlu0 %1222 }
 0x440   : > { %2300 = vrcp.f32 %v1223_v40 }
 0x442   : > { %v2297_v41 = vpop.eup %2296 }
 0x443   : > { %v1229_v42 = vmul.f32 %v2297_v41, %v2289_v27  ;;  %v896_v43 = vpop.permute.xlu0 %895  ;;  %v1990_v41 = vld [vmem:[%s3282_s23] ss:$0 sm:$0xff]  ;;  %s2006_s23 = sshll.u32 %s2562_s21, 6 }
 0x444   : > { %v2299_v44 = vpop.eup %2298  ;;  %899 = vst.msk [vmem:[#allocation3 + $0x8] sm:$0xf] %vm802_vm2, %v896_v43  ;;  %s3119_s2 = scalar_lea.hbm %s3285_s16, %s2006_s23 }
 0x445   : > { %v1230_v45 = vmul.f32 %v2299_v44, %v2291_v29  ;;  %v1233_v46 = vpack.c.bf16 %v1229_v42, %v1229_v42  ;;  %v1243_v47 = vld [vmem:[#allocation3 + $0xc] sm:$0xf] }
 0x446   : > { %v1387_v48 = vsel %vm1247_vm4, %v1243_v47, 0 }
 0x447   : > { %1237 = vst.msk [vmem:[%s3040_s10 + $0x4] sm:$0xf] %vm802_vm2, %v1233_v46  ;;  %2108 = vmatmul.mubr.msk.bf16.vlgmr.msra.gmra.mrb[16].mxu0 %vm1003_vm3, %v1233_v46  ;;  %v1234_v49 = vpack.c.bf16 %v1230_v45, %v1230_v45  ;;  %v2284_v45 = vld [vmem:[%s3280_s29 + $0x10] sm:$0xff]   ;;  %v2285_v46 = vld [vmem:[%s3280_s29 + $0x18] sm:$0xff]  }
 0x448   : > { %2118 = vmatpush3.bf16.msra.mxu0 %v1387_v48  ;;  %2119 = vmatprep.mubr.msk.bf16.mxu0 %vm2580_vm0, %v2579_v0 }
 0x449   : > { %1238 = vst.msk [vmem:[%s3040_s10 + $0x8] sm:$0xf] %vm802_vm2, %v1234_v49  ;;  %2131 = vmatprep.subr.bf16.mxu0 %v2579_v0 }
 0x44a   : > { %v2301_v50 = vpop.eup %2300 }
 0x44b   : > { %v1231_v51 = vmul.f32 %v2301_v50, %v2293_v31  ;;  %v1242_v52 = vld [vmem:[#allocation3 + $0x8] sm:$0xf] }
 0x44c   : > { %v1341_v53 = vsel %vm1247_vm4, %v1242_v52, 0 }
 0x44d   : > { %2112 = vmatpush3.bf16.msra.mxu1 %v1341_v53  ;;  %v1235_v54 = vpack.c.bf16 %v1231_v51, %v1231_v51 }
 0x44e   : > { %2123 = vmatprep.subr.bf16.mxu1 %v2579_v0 }
 0x44f   : > { %1239 = vst.msk [vmem:[%s3040_s10 + $0xc] sm:$0xf] %vm802_vm2, %v1235_v54  ;;  %2120 = vmatmul.mubr.msk.bf16.vlgmr.msra.gmra.mrb[20].mxu0 %vm1003_vm3, %v1235_v54 }
 0x450   : > { %2114 = vmatmul.mubr.msk.bf16.vlgmr.msra.gmra.mrb[16].mxu1 %vm1003_vm3, %v1234_v49  ;;  %2135 = vmatprep.mubr.msk.bf16.mxu0 %vm2580_vm0, %v2579_v0 }
 0x451   : > { %2127 = vmatprep.mubr.msk.bf16.mxu1 %vm2580_vm0, %v2579_v0  ;;  %2124 = vmatpush3.bf16.msra.mxu1 %v2278_v61 }
 0x452   : > { %2125 = vmatprep.subr.bf16.mxu1 %v2579_v0  ;;  %2132 = vmatpush3.bf16.msra.mxu0 %v2280_v32 }
 0x453   : > { %2133 = vmatprep.subr.bf16.mxu0 %v2579_v0 }
 0x455   : > { %2126 = vmatpush3.bf16.msra.mxu1 %v2279_v2 }
 0x456   : > { %2139 = vmatprep.subr.bf16.mxu1 %v2579_v0  ;;  %2134 = vmatpush3.bf16.msra.mxu0 %v2281_v34 }
 0x4b1   : > { %v1285_v55 = vpop.f32.mrb[12].mxu1 }
 0x4b2   : > { %v1429_v56 = vpack.c.bf16 %v1285_v55, %v1285_v55  ;;  %v2103_v57 = vpop.f32.mrb[13].mxu1 }
 0x4b3   : > { %v1288_v58 = vpop.f32.mrb[14].mxu1 }
 0x4b4   : > { %1430 = vst.msk [vmem:[#allocation5] sm:$0xf] %vm802_vm2, %v1429_v56  ;;  %v2104_v59 = vpop.f32.mrb[15].mxu1 }
 0x51a   : > { %v1331_v60 = vpop.f32.mrb[16].mxu0 }
 0x51b   : > { %v2012_v62 = vpack.c.bf16 %v1331_v60, %v1331_v60  ;;  %v2109_v63 = vpop.f32.mrb[17].mxu0 }
 0x51c   : > { %v1334_v1 = vpop.f32.mrb[18].mxu0 }
 0x51d   : > { %1435 = vrot.lane.b32.xlu1 %v2012_v62, %s2584_s3  ;;  %v2110_v3 = vpop.f32.mrb[19].mxu0  ;;  %s1745_s3 = scalar_lea.sflag [#allocation17], %s2918_s7 }
 0x522   : > { %v1423_v4 = vpop.f32.mrb[20].mxu0 }
 0x523   : > { %v2014_v5 = vpack.c.bf16 %v1423_v4, %v1423_v4  ;;  %v1377_v7 = vpop.f32.mrb[16].mxu1  ;;  %v2121_v8 = vpop.f32.mrb[21].mxu0 }
 0x524   : > { %v2013_v9 = vpack.c.bf16 %v1377_v7, %v1377_v7  ;;  %v2115_v10 = vpop.f32.mrb[17].mxu1  ;;  %v1426_v11 = vpop.f32.mrb[22].mxu0 }
 0x525   : > { %v1380_v12 = vpop.f32.mrb[18].mxu1  ;;  %1453 = vrot.lane.b32.xlu1 %v2014_v5, %s2585_s24  ;;  %v2122_v13 = vpop.f32.mrb[23].mxu0  ;;  %s3283_s24 = sld [smem:[#allocation35_spill]] }
 0x526   : > { %1444 = vrot.lane.b32.xlu0 %v2013_v9, %s2586_s14  ;;  %v2116_v14 = vpop.f32.mrb[19].mxu1  ;;  %s3281_s14 = sld [smem:[#allocation33_spill]] }
 0x52b   : > { %v1991_v47 = vld [vmem:[%s3283_s24] ss:$0 sm:$0xff]  ;;  %s2448_s24 = scalar_lea.vmem %s3121_s11, 256 }
 0x52c   : > { %v1989_v39 = vld [vmem:[%s3281_s14] ss:$0 sm:$0xff]  ;;  %p2449_p9 = scmp.ne.s32.totalorder %s3121_s11, %s2448_s24  ;;  %s2587_s14 = smov [#allocation16]  }
 0x52d   : > { %s2452_s28 = sshll.u32 %s2587_s14, 4  ;;  %s2453_s28 = int_to_ptr.vmem [resolvable:$false] %s2452_s28 }
 0x52e   : > { %p2450_p11 = pnand %p2449_p9, %p3286_p10  ;;  %s2454_s10 = scalar_lea.vmem %s2453_s28, 512 }
 0x52f   : > { %p2455_p7 = scmp.lt.s32.totalorder %s3121_s11, %s2453_s28  ;;  %p2456_p5 = scmp.lt.s32.totalorder %s2454_s10, %s2448_s24 }
 0x530   : > { %p2451_p0 = pneg %p2450_p11 }
 0x531   : > { %p2457_p8 = por %p2456_p5, %p2455_p7 }
 0x533   : > { %p2458_p1 = pnand %p2457_p8, %p2451_p0 }
 0x58f   : > { %v1436_v15 = vpop.permute.xlu1 %1435 }
 0x590   : > { %1439 = vst.msk [vmem:[#allocation5] sm:$0xf] %vm1438_vm5, %v1436_v15 }
 0x597   : > { %v1454_v17 = vpop.permute.xlu1 %1453 }
 0x598   : > { %v1445_v16 = vpop.permute.xlu0 %1444 }
 0x599   : > { %1448 = vst.msk [vmem:[#allocation5] sm:$0xf] %vm1447_vm6, %v1445_v16 }
 0x59a   : > { %1457 = vst.msk [vmem:[#allocation5] sm:$0xf] %vm1456_vm7, %v1454_v17 }
 0x5a1   : > { %v1458_v18 = vld [vmem:[#allocation5] sm:$0xf] }
 0x5a2   : > { %2128 = vmatmul.mubr.msk.bf16.vlgmr.msra.gmra.mrb[20].mxu1 %vm757_vm1, %v1458_v18 }
 0x5a3   : > { %2147 = vmatprep.mubr.msk.bf16.mxu1 %vm2580_vm0, %v2579_v0 }
 0x675   : > { %v1519_v20 = vpop.f32.mrb[20].mxu1 }
 0x676   : > { %v1520_v21 = vadd.f32 %v1985_v19, %v1519_v20  ;;  %v2129_v22 = vpop.f32.mrb[21].mxu1 }
 0x677   : > { %v1522_v23 = vpop.f32.mrb[22].mxu1 }
 0x678   : > { %v2130_v24 = vpop.f32.mrb[23].mxu1  ;;  %v1525_v25 = vadd.f32 %v1520_v21, %v2959_v6  ;;  %v2282_v6 = vld [vmem:[%s3280_s29] sm:$0xff]  }
 0x679   : > { %2140 = vmatpush3.bf16.msra.mxu1 %v2282_v6 }
 0x67a   : > { %v1526_v26 = vsel %vm757_vm1, %v1525_v25, 0.0  ;;  %2141 = vmatprep.subr.bf16.mxu1 %v2579_v0 }
 0x67b   : > { %1527 = vadd.xlane.f32.xlu0 %v1526_v26 }
 0x67d   : > { %2142 = vmatpush3.bf16.msra.mxu1 %v2283_v35 }
 0x67e   : > { %2143 = vmatprep.subr.bf16.mxu1 %v2579_v0 }
 0x681   : > { %2144 = vmatpush3.bf16.msra.mxu1 %v2284_v45 }
 0x682   : > { %2145 = vmatprep.subr.bf16.mxu1 %v2579_v0  ;;  %v1995_v0 = vld [vmem:[%s3284_s6] ss:$0 sm:$0xff] }
 0x685   : > { %2146 = vmatpush3.bf16.msra.mxu1 %v2285_v46 }
 0x708   : > { %v1528_v27 = vpop.xlane.xlu0 %1527 }
 0x709   : > { %v1530_v28 = vmul.f32 0.03125, %v1528_v27 }
 0x70b   : > { %v1531_v29 = vsub.f32 %v1525_v25, %v1530_v28 }
 0x70d   : > { %v1532_v30 = vmul.f32 %v1531_v29, %v1531_v29 }
 0x70f   : > { %v1533_v31 = vsel %vm757_vm1, %v1532_v30, 0.0 }
 0x710   : > { %1534 = vadd.xlane.f32.xlu1 %v1533_v31 }
 0x79d   : > { %v1535_v36 = vpop.xlane.xlu1 %1534 }
 0x79e   : > { %v1536_v37 = vmul.f32 0.03125, %v1535_v36 }
 0x7a0   : > { %v1537_v38 = vadd.f32 1e-05, %v1536_v37 }
 0x7a2   : > { %2302 = vrsqrt.f32 %v1537_v38 }
 0x7ac   : > { %v2303_v33 = vpop.eup %2302 }
 0x7ad   : > { %v1539_v40 = vmul.f32 %v2303_v33, %v1531_v29 }
 0x7af   : > { %v1547_v42 = vmul.f32 %v1989_v39, %v1539_v40 }
 0x7b1   : > { %v1555_v43 = vadd.f32 %v1990_v41, %v1547_v42 }
 0x7b3   : > { %v1556_v44 = vpack.c.bf16 %v1555_v43, %v1555_v43 }
 0x7b5   : > { %2136 = vmatmul.mubr.msk.bf16.vlgmr.msra.gmra.mrb[24].mxu0 %vm757_vm1, %v1556_v44 }
 0x888   : > { %v1617_v48 = vpop.f32.mrb[24].mxu0 }
 0x889   : > { %v1618_v49 = vadd.f32 %v1991_v47, %v1617_v48  ;;  %v2137_v50 = vpop.f32.mrb[25].mxu0 }
 0x88a   : > { %v1620_v51 = vpop.f32.mrb[26].mxu0 }
 0x88b   : > { %v1623_v52 = vmax.f32 %v1618_v49, 0.0  ;;  %v2138_v53 = vpop.f32.mrb[27].mxu0 }
 0x88d   : > { %v1624_v54 = vpack.c.bf16 %v1623_v52, %v1623_v52 }
 0x88f   : > { %2148 = vmatmul.mubr.msk.bf16.vlgmr.msra.gmra.mrb[24].mxu1 %vm1664_vm8, %v1624_v54 }
 0x962   : > { %v1702_v55 = vpop.f32.mrb[24].mxu1 }
 0x963   : > { %v1703_v56 = vadd.f32 %v1995_v0, %v1702_v55  ;;  %v2149_v57 = vpop.f32.mrb[25].mxu1 }
 0x964   : > { %v1705_v58 = vpop.f32.mrb[26].mxu1 }
 0x965   : > { %v2150_v59 = vpop.f32.mrb[27].mxu1  ;;  %v1708_v60 = vadd.f32 %v1703_v56, %v1555_v43 }
 0x967   : > { %v1709_v61 = vsel %vm757_vm1, %v1708_v60, 0.0 }
 0x968   : > { %1710 = vadd.xlane.f32.xlu0 %v1709_v61 }
 0x9f5   : > { %v1711_v62 = vpop.xlane.xlu0 %1710 }
 0x9f6   : > { %v1712_v63 = vmul.f32 0.03125, %v1711_v62 }
 0x9f8   : > { %v1713_v1 = vsub.f32 %v1708_v60, %v1712_v63 }
 0x9fa   : > { %v1714_v2 = vmul.f32 %v1713_v1, %v1713_v1 }
 0x9fc   : > { %v1715_v3 = vsel %vm757_vm1, %v1714_v2, 0.0 }
 0x9fd   : > { %1716 = vadd.xlane.f32.xlu0 %v1715_v3 }
 0x9fe   : > { %2461 = shalt.err (!%p2458_p1)
}
 0x9ff   : > { %s2462_s6 = scalar_lea.hbm %s3119_s2, 256  ;;  %s2466_s13 = scalar_lea.hbm %s3285_s16, 512 }
 0xa00   : > { %p2463_p3 = scmp.ne.s32.totalorder %s3119_s2, %s2462_s6  ;;  %p2467_p12 = scmp.lt.u32.totalorder %s3119_s2, %s3285_s16 }
 0xa01   : > { %p2468_p4 = scmp.lt.u32.totalorder %s2466_s13, %s2462_s6  ;;  %p2470_p9 = scmp.lt.u32.totalorder %s2462_s6, %s3119_s2 }
 0xa02   : > { %p2464_p6 = pnand %p2463_p3, %p3286_p10 }
 0xa03   : > { %p2469_p2 = por %p2468_p4, %p2467_p12 }
 0xa04   : > { %p2465_p13 = pneg %p2464_p6 }
 0xa05   : > { %p2471_p11 = por %p2470_p9, %p2469_p2 }
 0xa07   : > { %p2472_p0 = pnand %p2471_p11, %p2465_p13 }
 0xa09   : > { %2475 = shalt.err (!%p2472_p0)
}
 0xa0a   : > { %s2588_s24 = smov 64   ;;  %s2589_s10 = smov 128  }
 0xa0b   : > { %s2590_s23 = smov 4   ;;  %s1956_s6 = sshll.u32 %s2918_s7, 3 }
 0xa0c   : > { %2170 = dma.vmem_to_hbm [thread:$0]  (%p3286_p10), %s3121_s11, 256, %s3119_s2, %s1745_s3, %s2588_s24, %s2589_s10, %s2590_s23  }
 0xa0d   : > { %s3287_s14 = sld [smem:[#allocation38_spill]]  ;;  %s3288_s5 = sld [smem:[#allocation39_spill]] }
 0xa0e   : > { %s2005_s8 = sshll.u32 %s2562_s21, 7  ;;  %s712_s9 = scalar_lea.vmem [#allocation15], %s1956_s6 }
 0xa0f   : > { %s1759_s11 = sshll.u32 %s712_s9, 4  ;;  %s3289_s24 = sld [smem:[#allocation40_spill]]  ;;  %s3160_s11 = int_to_ptr.vmem [resolvable:$true] %s1759_s11 }
 0xa10   : > { %s1740_s23 = scalar_lea.sflag [#allocation8], %s2918_s7  ;;  %s2476_s4 = scalar_lea.vmem %s3160_s11, 128 }
 0xa11   : > { %p2477_p7 = scmp.ne.s32.totalorder %s3160_s11, %s2476_s4 }
 0xa13   : > { %v2001_v9 = vld [vmem:[%s3287_s14] ss:$0 sm:$0xff]  ;;  %p2478_p5 = pnand %p2477_p7, %p3286_p10 }
 0xa14   : > { %v2002_v11 = vld [vmem:[%s3288_s5] ss:$0 sm:$0xff]  ;;  %s2591_s5 = smov [#allocation15]  }
 0xa15   : > { %s3158_s10 = scalar_lea.hbm %s3289_s24, %s2005_s8  ;;  %p2479_p8 = pneg %p2478_p5 }
 0xa16   : > { %s2480_s21 = sshll.u32 %s2591_s5, 4  ;;  %s2481_s21 = int_to_ptr.vmem [resolvable:$false] %s2480_s21 }
 0xa17   : > { %s2482_s6 = scalar_lea.vmem %s2481_s21, 256  ;;  %p2483_p1 = scmp.lt.s32.totalorder %s3160_s11, %s2481_s21 }
 0xa18   : > { %p2484_p3 = scmp.lt.s32.totalorder %s2482_s6, %s2476_s4 }
 0xa1a   : > { %p2485_p6 = por %p2484_p3, %p2483_p1 }
 0xa1c   : > { %p2486_p13 = pnand %p2485_p6, %p2479_p8 }
 0xa8a   : > { %v1717_v4 = vpop.xlane.xlu0 %1716 }
 0xa8b   : > { %v1718_v5 = vmul.f32 0.03125, %v1717_v4 }
 0xa8d   : > { %v1719_v7 = vadd.f32 1e-05, %v1718_v5 }
 0xa8f   : > { %2304 = vrsqrt.f32 %v1719_v7 }
 0xa99   : > { %v2305_v8 = vpop.eup %2304 }
 0xa9a   : > { %v1721_v10 = vmul.f32 %v2305_v8, %v1713_v1 }
 0xa9c   : > { %v1729_v12 = vmul.f32 %v2001_v9, %v1721_v10 }
 0xa9e   : > { %v1737_v13 = vadd.f32 %v2002_v11, %v1729_v12 }
 0xaa0   : > { %1738 = vst.msk [vmem:[%s712_s9] sm:$0xff] %vm757_vm1, %v1737_v13 }
 0xaa1   : > { %2489 = shalt.err (!%p2486_p13)
}
 0xaa2   : > { %s2490_s8 = scalar_lea.hbm %s3158_s10, 128  ;;  %s2494_s26 = scalar_lea.hbm %s3289_s24, 256 }
 0xaa3   : > { %p2491_p12 = scmp.ne.s32.totalorder %s3158_s10, %s2490_s8  ;;  %p2495_p9 = scmp.lt.u32.totalorder %s3158_s10, %s3289_s24 }
 0xaa4   : > { %p2496_p11 = scmp.lt.u32.totalorder %s2494_s26, %s2490_s8  ;;  %p2498_p7 = scmp.lt.u32.totalorder %s2490_s8, %s3158_s10 }
 0xaa5   : > { %p2492_p4 = pnand %p2491_p12, %p3286_p10 }
 0xaa6   : > { %p2497_p0 = por %p2496_p11, %p2495_p9 }
 0xaa7   : > { %p2493_p2 = pneg %p2492_p4 }
 0xaa8   : > { %p2499_p5 = por %p2498_p7, %p2497_p0 }
 0xaaa   : > { %p2500_p8 = pnand %p2499_p5, %p2493_p2 }
 0xaac   : > { %2503 = shalt.err (!%p2500_p8)
}
 0xaad   : > { %2169 = dma.vmem_to_hbm [thread:$0]  (%p3286_p10), %s3160_s11, 128, %s3158_s10, %s1740_s23  }
 0xaae PF: > { %s1787_s28 = sand.u32 1, %s2550_s0   ;;  %p3290_p1 = scmp.ne.s32.totalorder %s3270_s27, 0 }
 0xaaf   : > { %p3291_p3 = scmp.ge.s32.totalorder %s2570_s22, 2  ;;  %s1788_s2 = scalar_lea.sflag [#allocation8], %s1787_s28 }
 0xab1   : > { %p2191_p6 = pnand %p3291_p3, %p3290_p1 }
 0xab3   : > { %2541 = dma.done.wait (!%p2191_p6), %s1788_s2, 128  }
 0xab4   : > { %2543 = vsyncadd (!%p2191_p6), %s1788_s2, 4294967168  ;;  %s1797_s3 = scalar_lea.sflag [#allocation17], %s1787_s28 }
 0xab5   : > { %2545 = dma.done.wait (!%p2191_p6), %s1797_s3, 256  }
 0xab6   : > { %2547 = vsyncadd (!%p2191_p6), %s1797_s3, 4294967040  ;;  %s41_s22 = sadd.s32 1, %s2570_s22   ;;  %s3292_s0 = smov %s2554_s30 }
 0xab7   : > { %p38_p13 = scmp.ge.s32.totalorder %s41_s22, 4   ;;  %s3293_s30 = smov %s2558_s20 }
 0xab8   : > { %s3294_s20 = smov %s2868_s25  ;;  %s3295_s21 = smov %s2566_s1 }
 0xab9   : > { %s3296_s1 = smov %s3298_s17  ;;  %40 = sbr.rel (!%p38_p13) target bundleno = 30 (0x1e), region = 186 }
 0xac0   :  { %1802 = vsyncpa [#allocation7], 1 }
 0xac1   :  { %1804 = vsyncpa [#allocation7 + $0x1], 1 }
 0xac2   :  { %1805 = vsyncpa [#allocation10], 1 }
 0xac3   :  { %1806 = vsyncpa [#allocation13], 1 }
 0xac4   :  { %1807 = vsyncpa [#allocation8], 1 }
 0xac5   :  { %1809 = vsyncpa [#allocation8 + $0x1], 1 }
 0xac6   :  { %1810 = vsyncpa [#allocation17], 1 }
 0xac7   :  { %1812 = vsyncpa [#allocation17 + $0x1], 1 }

// kernel: tpu_custom_call.1
= control target key start
LH: loop header
LB: loop body
LE: loop exit
PB: predicated region body
PF: predicated region fallthrough
CT: control target
= control target key end

     0   :  { %s3208_s0 = inlined_call_operand.vmem [shape: f32[2,8,32], index: 0, kind: input, shape index: {}]   ;;  %s3209_s1 = inlined_call_operand.hbm [shape: bf16[2,8,32], index: 1, kind: input, shape index: {}]   ;;  %s3210_s2 = inlined_call_operand.vmem [shape: bf16[32,32], index: 2, kind: input, shape index: {}]   ;;  %s3211_s3 = inlined_call_operand.vmem [shape: f32[1,32], index: 3, kind: input, shape index: {}]   ;;  %s3212_s4 = inlined_call_operand.vmem [shape: bf16[32,32], index: 4, kind: input, shape index: {}]   ;;  %s3213_s5 = inlined_call_operand.vmem [shape: f32[1,32], index: 5, kind: input, shape index: {}]   ;;  %s3214_s6 = inlined_call_operand.hbm [shape: bf16[32,32], index: 6, kind: input, shape index: {}]   ;;  %s3215_s7 = inlined_call_operand.hbm [shape: f32[1,32], index: 7, kind: input, shape index: {}]   ;;  %s3216_s8 = inlined_call_operand.hbm [shape: bf16[32,32], index: 8, kind: input, shape index: {}]   ;;  %s3217_s9 = inlined_call_operand.hbm [shape: f32[1,32], index: 9, kind: input, shape index: {}]   ;;  %s3218_s10 = inlined_call_operand.vmem [shape: f32[1,32], index: 10, kind: input, shape index: {}]   ;;  %s3219_s11 = inlined_call_operand.vmem [shape: f32[1,32], index: 11, kind: input, shape index: {}]   ;;  %s3220_s12 = inlined_call_operand.vmem [shape: bf16[32,64], index: 12, kind: input, shape index: {}]   ;;  %s3221_s13 = inlined_call_operand.vmem [shape: f32[1,64], index: 13, kind: input, shape index: {}]   ;;  %s3222_s14 = inlined_call_operand.vmem [shape: bf16[64,32], index: 14, kind: input, shape index: {}]   ;;  %s3223_s15 = inlined_call_operand.vmem [shape: f32[1,32], index: 15, kind: input, shape index: {}]   ;;  %s3224_s16 = inlined_call_operand.vmem [shape: f32[1,32], index: 16, kind: input, shape index: {}]   ;;  %s3225_s17 = inlined_call_operand.vmem [shape: f32[1,32], index: 17, kind: input, shape index: {}]   ;;  %s3226_s18 = inlined_call_operand.hbm [shape: f32[2,8,32], index: 18, kind: output, shape index: {0}]   ;;  %s3227_s19 = inlined_call_operand.hbm [shape: bf16[4,2,8,8], index: 19, kind: output, shape index: {1}]  }
   0x1   :  { %3238 = sst [smem:[#allocation23_spill]] %s3208_s0 }
   0x2   :  { %3239 = sst [smem:[#allocation24_spill]] %s3209_s1 }
   0x3   :  { %3240 = sst [smem:[#allocation25_spill]] %s3210_s2 }
   0x4   :  { %3241 = sst [smem:[#allocation26_spill]] %s3211_s3 }
   0x5   :  { %3242 = sst [smem:[#allocation27_spill]] %s3212_s4 }
   0x6   :  { %3243 = sst [smem:[#allocation28_spill]] %s3213_s5 }
   0x7   :  { %3244 = sst [smem:[#allocation29_spill]] %s3214_s6 }
   0x8   :  { %3245 = sst [smem:[#allocation30_spill]] %s3215_s7 }
   0x9   :  { %3246 = sst [smem:[#allocation31_spill]] %s3216_s8 }
   0xa   :  { %3247 = sst [smem:[#allocation32_spill]] %s3217_s9 }
   0xb   :  { %3248 = sst [smem:[#allocation33_spill]] %s3218_s10 }
   0xc   :  { %3249 = sst [smem:[#allocation34_spill]] %s3219_s11 }
   0xd   :  { %3250 = sst [smem:[#allocation35_spill]] %s3221_s13 }
   0xe   :  { %3251 = sst [smem:[#allocation36_spill]] %s3222_s14 }
   0xf   :  { %3252 = sst [smem:[#allocation37_spill]] %s3223_s15 }
  0x10   :  { %3253 = sst [smem:[#allocation38_spill]] %s3224_s16 }
  0x11   :  { %3254 = sst [smem:[#allocation39_spill]] %s3225_s17 }
  0x12   :  { %3255 = sst [smem:[#allocation40_spill]] %s3226_s18 }
  0x13   :  { %3256 = sst [smem:[#allocation41_spill]] %s3227_s19 }
  0x14   :  { %25 = vsyncpa [#allocation7], 0 }
  0x15   :  { %27 = vsyncpa [#allocation7 + $0x1], 0 }
  0x16   :  { %28 = vsyncpa [#allocation10], 0 }
  0x17   :  { %29 = vsyncpa [#allocation13], 0 }
  0x18   :  { %30 = vsyncpa [#allocation8], 0 }
  0x19   :  { %32 = vsyncpa [#allocation8 + $0x1], 0 }
  0x1a   :  { %33 = vsyncpa [#allocation17], 0 }
  0x1b   :  { %35 = vsyncpa [#allocation17 + $0x1], 0  ;;  %s2692_s0 = smov 0   ;;  %s2694_s30 = smov 0  }
  0x1c   :  { %s2696_s20 = smov 0   ;;  %s2698_s21 = smov 0  }
  0x1d   :  { %s2700_s1 = smov 0   ;;  %s2702_s22 = smov 0  }
  0x1e LB: > { %s3230_s2 = sadd.s32 4294967295, %s2570_s22   ;;  %p1942_p0 = scmp.ge.s32.totalorder %s2570_s22, 1  ;;  %s2570_s22 = sphi %s2702_s22, %s41_s22   ;;  %s2566_s1 = sphi %s2700_s1, %s3296_s1   ;;  %s2562_s21 = sphi %s2698_s21, %s3295_s21   ;;  %s2558_s20 = sphi %s2696_s20, %s3294_s20   ;;  %s2554_s30 = sphi %s2694_s30, %s3293_s30   ;;  %s2550_s0 = sphi %s2692_s0, %s3292_s0  }
  0x1f   : > { %p2726_p1 = scmp.eq.s32.totalorder %s3230_s2, 0  ;;  %p504_p2 = scmp.lt.s32.totalorder %s2570_s22, 3 }
  0x20   : > { %s2572_s25 = smov [#allocation9]   ;;  %s2573_s27 = smov [#allocation12]  }
  0x21   : > { %s3257_s23 = scalar_select %p2726_p1, 1, 0 }
  0x22   : > { %p2731_p3 = pnand %p1942_p0, %p504_p2  ;;  %s528_s3 = sshll.u32 %s2572_s25, 4  ;;  %s2735_s3 = int_to_ptr.vmem [resolvable:$true] %s528_s3 }
  0x23   : > { %s552_s28 = sshll.u32 %s2573_s27, 4  ;;  %s2574_s29 = smov [#allocation11]   ;;  %s2746_s28 = int_to_ptr.vmem [resolvable:$true] %s552_s28 }
  0x24   : > { %s3258_s24 = scalar_select %p2731_p3, 1, 0 }
  0x25   : > { %p2173_p4 = pneg %p2731_p3  ;;  %s2748_s2 = sshll.u32 %s2574_s29, 4  ;;  %s543_s2 = int_to_ptr.vmem [resolvable:$true] %s2748_s2 }
  0x26   : > { %s3260_s6 = sld [smem:[#allocation29_spill]] }
  0x27   : > { %p2742_p6 = pnand %p2173_p4, %p2726_p1 }
  0x29   : > { %p2758_p8 = pneg %p2742_p6 }
  0x2c   : > { %s2306_s17 = scalar_lea.hbm %s3260_s6, 256 }
  0x2d   : > { %p2307_p7 = scmp.ne.s32.totalorder %s3260_s6, %s2306_s17  ;;  %p2313_p11 = scmp.lt.u32.totalorder %s2306_s17, %s3260_s6 }
  0x2f   : > { %p2309_p9 = pnand %p2758_p8, %p2307_p7 }
  0x31   : > { %p2310_p10 = pneg %p2309_p9 }
  0x33   : > { %p2315_p12 = pnand %p2313_p11, %p2310_p10 }
  0x35   : > { %2318 = shalt.err (!%p2315_p12)
}
  0x36   : > { %s2319_s16 = scalar_lea.vmem %s2735_s3, 256  ;;  %p2327_p4 = scmp.lt.s32.totalorder %s2735_s3, %s2735_s3 }
  0x37   : > { %p2320_p13 = scmp.ne.s32.totalorder %s2735_s3, %s2319_s16  ;;  %p2328_p5 = scmp.lt.s32.totalorder %s2319_s16, %s2319_s16 }
  0x39   : > { %p2322_p0 = pnand %p2320_p13, %p2758_p8  ;;  %p2329_p7 = por %p2328_p5, %p2327_p4 }
  0x3b   : > { %p2323_p2 = pneg %p2322_p0 }
  0x3d   : > { %p2330_p9 = pnand %p2329_p7, %p2323_p2 }
  0x3f   : > { %2333 = shalt.err (!%p2330_p9)
}
  0x40   : > { %s2575_s18 = smov 64   ;;  %s2576_s17 = smov 4  }
  0x41   : > { %2176 = dma.hbm_to_vmem [thread:$0]  (!%p2742_p6), %s3260_s6, 256, %s2735_s3, [#allocation10], %s2575_s18, %s2575_s18, %s2576_s17  }
  0x42   : > { %s3262_s8 = sld [smem:[#allocation31_spill]] }
  0x48   : > { %s2334_s13 = scalar_lea.hbm %s3262_s8, 256 }
  0x49   : > { %p2335_p5 = scmp.ne.s32.totalorder %s3262_s8, %s2334_s13  ;;  %p2341_p12 = scmp.lt.u32.totalorder %s2334_s13, %s3262_s8 }
  0x4b   : > { %p2337_p10 = pnand %p2335_p5, %p2758_p8 }
  0x4d   : > { %p2338_p11 = pneg %p2337_p10 }
  0x4f   : > { %p2343_p13 = pnand %p2341_p12, %p2338_p11 }
  0x51   : > { %2346 = shalt.err (!%p2343_p13)
}
  0x52   : > { %s2347_s3 = scalar_lea.vmem %s2746_s28, 256  ;;  %p2355_p7 = scmp.lt.s32.totalorder %s2746_s28, %s2746_s28 }
  0x53   : > { %p2348_p0 = scmp.ne.s32.totalorder %s2746_s28, %s2347_s3  ;;  %p2356_p9 = scmp.lt.s32.totalorder %s2347_s3, %s2347_s3 }
  0x55   : > { %p2350_p2 = pnand %p2348_p0, %p2758_p8  ;;  %p2357_p5 = por %p2356_p9, %p2355_p7 }
  0x57   : > { %p2351_p4 = pneg %p2350_p2 }
  0x59   : > { %p2358_p10 = pnand %p2357_p5, %p2351_p4 }
  0x5b   : > { %2361 = shalt.err (!%p2358_p10)
}
  0x5c   : > { %2182 = dma.hbm_to_vmem [thread:$0]  (!%p2742_p6), %s3262_s8, 256, %s2746_s28, [#allocation13], %s2575_s18, %s2575_s18, %s2576_s17  }
  0x5d   : > { %s3263_s7 = sld [smem:[#allocation30_spill]] }
  0x63   : > { %s2362_s19 = scalar_lea.hbm %s3263_s7, 16 }
  0x64   : > { %p2363_p11 = scmp.ne.s32.totalorder %s3263_s7, %s2362_s19  ;;  %p2369_p0 = scmp.lt.u32.totalorder %s2362_s19, %s3263_s7 }
  0x66   : > { %p2365_p12 = pnand %p2363_p11, %p2758_p8 }
  0x68   : > { %p2366_p13 = pneg %p2365_p12 }
  0x6a   : > { %p2371_p2 = pnand %p2369_p0, %p2366_p13 }
  0x6c   : > { %2374 = shalt.err (!%p2371_p2)
}
  0x6d   : > { %s2375_s3 = scalar_lea.vmem %s543_s2, 16  ;;  %s2382_s28 = scalar_lea.vmem %s543_s2, 32 }
  0x6e   : > { %p2376_p4 = scmp.ne.s32.totalorder %s543_s2, %s2375_s3  ;;  %p2383_p5 = scmp.lt.s32.totalorder %s543_s2, %s543_s2 }
  0x6f   : > { %p2384_p10 = scmp.lt.s32.totalorder %s2382_s28, %s2375_s3 }
  0x70   : > { %p2378_p7 = pnand %p2376_p4, %p2758_p8 }
  0x71   : > { %p2385_p3 = por %p2384_p10, %p2383_p5 }
  0x72   : > { %p2379_p9 = pneg %p2378_p7 }
  0x74   : > { %p2386_p1 = pnand %p2385_p3, %p2379_p9 }
  0x76   : > { %2389 = shalt.err (!%p2386_p1)
}
  0x77   : > { %2179 = dma.hbm_to_vmem [thread:$0]  (!%p2742_p6), %s3263_s7, 16, %s543_s2, [#allocation10]  }
  0x78   : > { %s2577_s10 = smov [#allocation14]   ;;  %s3264_s9 = sld [smem:[#allocation32_spill]] }
  0x79   : > { %s566_s11 = sshll.u32 %s2577_s10, 4  ;;  %s567_s11 = int_to_ptr.vmem [resolvable:$true] %s566_s11 }
  0x7e   : > { %s2390_s19 = scalar_lea.hbm %s3264_s9, 16 }
  0x7f   : > { %p2391_p11 = scmp.ne.s32.totalorder %s3264_s9, %s2390_s19  ;;  %p2397_p12 = scmp.lt.u32.totalorder %s2390_s19, %s3264_s9 }
  0x81   : > { %p2393_p1 = pnand %p2391_p11, %p2758_p8 }
  0x83   : > { %p2394_p3 = pneg %p2393_p1 }
  0x85   : > { %p2399_p13 = pnand %p2397_p12, %p2394_p3 }
  0x87   : > { %2402 = shalt.err (!%p2399_p13)
}
  0x88   : > { %s2403_s2 = scalar_lea.vmem %s567_s11, 16  ;;  %s2410_s3 = scalar_lea.vmem %s567_s11, 32 }
  0x89   : > { %p2404_p0 = scmp.ne.s32.totalorder %s567_s11, %s2403_s2  ;;  %p2411_p7 = scmp.lt.s32.totalorder %s567_s11, %s567_s11 }
  0x8a   : > { %p2412_p9 = scmp.lt.s32.totalorder %s2410_s3, %s2403_s2 }
  0x8b   : > { %p2406_p2 = pnand %p2404_p0, %p2758_p8 }
  0x8c   : > { %p2413_p5 = por %p2412_p9, %p2411_p7 }
  0x8d   : > { %p2407_p4 = pneg %p2406_p2 }
  0x8f   : > { %p2414_p10 = pnand %p2413_p5, %p2407_p4 }
  0x91   : > { %2417 = shalt.err (!%p2414_p10)
}
  0x92   : > { %2185 = dma.hbm_to_vmem [thread:$0]  (!%p2742_p6), %s3264_s9, 16, %s567_s11, [#allocation13]  }
  0x93   : > { %s1941_s15 = sadd.s32 4294967294, %s2570_s22   ;;  %s53_s17 = sadd.s32 1, %s2566_s1 }
  0x94   : > { %p55_p8 = scmp.ge.s32.totalorder %s53_s17, 2  ;;  %s88_s26 = sadd.s32 1, %s2558_s20 }
  0x95   : > { %p95_p11 = scmp.ne.s32.totalorder %s2558_s20, %s2554_s30  ;;  %p96_p1 = scmp.eq.s32.totalorder %s2570_s22, 0 }
  0x96   : > { %s3298_s17 = smov (%p55_p8, %s53_s17), 0  ;;  %p101_p12 = scmp.ne.s32.totalorder %s2554_s30, %s2550_s0 }
  0x97   : > { %p2847_p3 = por %p96_p1, %p95_p11  ;;  %s85_s11 = ssub.s32 %s2566_s1, %s3298_s17 }
  0x98   : > { %s3266_s13 = sadd.s32 4294967295, %s2570_s22   ;;  %p86_p13 = scmp.eq.s32.totalorder %s85_s11, 0 }
  0x99   : > { %p463_p6 = scmp.eq.s32.totalorder %s3266_s13, 1  ;;  %p3267_p0 = scmp.ne.s32.totalorder %s3257_s23, 0 }
  0x9a   : > { %p469_p7 = scmp.eq.s32.totalorder %s1941_s15, 1  ;;  %p2201_p5 = scmp.lt.s32.totalorder %s2570_s22, 2 }
  0x9b   : > { %p2859_p2 = por %p3267_p0, %p101_p12  ;;  %p2863_p4 = por %p463_p6, %p95_p11 }
  0x9c   : > { %s2868_s25 = scalar_select %p86_p13, %s2558_s20, %s88_s26  }
  0x9d   : > { %s3269_s19 = scalar_select %p2863_p4, 1, 0 }
  0x9e   : > { %p2870_p9 = por %p469_p7, %p101_p12  ;;  %s611_s29 = sand.u32 1, %s2558_s20  }
  0x9f   : > { %s1949_s16 = sshll.u32 %s2566_s1, 6  ;;  %s1948_s2 = sshll.u32 %s611_s29, 2 }
  0xa0   : > { %s3270_s27 = scalar_select %p2870_p9, 1, 0 }
  0xa1   : > { %s3271_s18 = sld [smem:[#allocation24_spill]]  ;;  %s615_s15 = scalar_lea.vmem [#allocation6], %s1948_s2 }
  0xa2   : > { %s622_s26 = sshll.u32 %s615_s15, 4  ;;  %p2884_p10 = pnand %p2201_p5, %p2847_p3  ;;  %s2888_s26 = int_to_ptr.vmem [resolvable:$true] %s622_s26 }
  0xa3   : > { %s612_s6 = scalar_lea.sflag [#allocation7], %s611_s29 }
  0xa4   : > { %p2420_p11 = pneg %p2884_p10 }
  0xa7   : > { %s2880_s11 = scalar_lea.hbm %s3271_s18, %s1949_s16  ;;  %s2423_s10 = scalar_lea.hbm %s3271_s18, 128 }
  0xa8   : > { %s2418_s7 = scalar_lea.hbm %s2880_s11, 64  ;;  %p2424_p3 = scmp.lt.u32.totalorder %s2880_s11, %s3271_s18 }
  0xa9   : > { %p2419_p8 = scmp.ne.s32.totalorder %s2880_s11, %s2418_s7  ;;  %p2425_p6 = scmp.lt.u32.totalorder %s2423_s10, %s2418_s7 }
  0xaa   : > { %p2427_p0 = scmp.lt.u32.totalorder %s2418_s7, %s2880_s11 }
  0xab   : > { %p2421_p1 = pnand %p2420_p11, %p2419_p8  ;;  %p2426_p13 = por %p2425_p6, %p2424_p3 }
  0xad   : > { %p2422_p12 = pneg %p2421_p1  ;;  %p2428_p7 = por %p2427_p0, %p2426_p13 }
  0xaf   : > { %p2429_p5 = pnand %p2428_p7, %p2422_p12 }
  0xb1   : > { %2432 = shalt.err (!%p2429_p5)
}
  0xb2   : > { %s2433_s29 = scalar_lea.vmem %s2888_s26, 64  ;;  %s2578_s15 = smov [#allocation6]  }
  0xb3   : > { %p2434_p8 = scmp.ne.s32.totalorder %s2888_s26, %s2433_s29  ;;  %s2438_s16 = sshll.u32 %s2578_s15, 4  ;;  %s2439_s16 = int_to_ptr.vmem [resolvable:$false] %s2438_s16 }
  0xb4   : > { %s2440_s2 = scalar_lea.vmem %s2439_s16, 128  ;;  %p2441_p4 = scmp.lt.s32.totalorder %s2888_s26, %s2439_s16 }
  0xb5   : > { %p2436_p1 = pnand %p2434_p8, %p2420_p11  ;;  %p2442_p3 = scmp.lt.s32.totalorder %s2440_s2, %s2433_s29 }
  0xb7   : > { %p2437_p9 = pneg %p2436_p1  ;;  %p2443_p6 = por %p2442_p3, %p2441_p4 }
  0xb9   : > { %p2444_p13 = pnand %p2443_p6, %p2437_p9 }
  0xbb   : > { %2447 = shalt.err (!%p2444_p13)
}
  0xbc   : > { %2189 = dma.hbm_to_vmem [thread:$0]  (!%p2884_p10), %s2880_s11, 64, %s2888_s26, %s612_s6  }
  0xbd   : > { %p3273_p12 = scmp.ne.s32.totalorder %s3258_s24, 0 }
  0xbe   : > { %s2918_s7 = sand.u32 (!%p3273_p12), 1, %s2554_s30  }
  0xbf   : > { %631 = sbr.rel (%p3273_p12) target bundleno = 2734 (0xaae), region = 92  ;;  %s1951_s10 = sshll.u32 (!%p3273_p12), %s2918_s7, 2 }
  0xc0   : > { %s634_s3 = scalar_lea.sflag (!%p3273_p12), [#allocation7], %s2918_s7  ;;  %s637_s28 = scalar_lea.vmem (!%p3273_p12), [#allocation6], %s1951_s10 }
  0xc6   : > { %2529 = dma.done.wait (%p2859_p2), %s634_s3, 64  }
  0xc7   : > { %2531 = vsyncadd (%p2859_p2), %s634_s3, 4294967232  ;;  %p3274_p4 = scmp.ne.s32.totalorder %s3257_s23, 0 }
  0xc9   : > { %2533 = dma.done.wait (%p3274_p4), [#allocation10], 272  }
  0xca   : > { %2535 = vsyncadd (%p3274_p4), [#allocation10], 4294967024 }
  0xcb   : > { %2537 = dma.done.wait (%p3274_p4), [#allocation13], 272  }
  0xcc   : > { %2539 = vsyncadd (%p3274_p4), [#allocation13], 4294967024  ;;  %v2579_v0 = vmov 0.0   ;;  %vm2580_vm0 = vmmov 0   ;;  %p720_p2 = scmp.lt.s32.totalorder %s2562_s21, 1  ;;  %s3275_s4 = sld [smem:[#allocation27_spill]] }
  0xcd   : > { %2051 = vmatprep.subr.bf16.mxu0 %v2579_v0  ;;  %2055 = vmatprep.mubr.msk.bf16.mxu0 %vm2580_vm0, %v2579_v0  ;;  %v733_v3 = vld [vmem:[%s637_s28] sm:$0xf]  ;;  %vm757_vm1 = vcmask 261120   ;;  %s3276_s15 = sld [smem:[#allocation25_spill]]  ;;  %s3277_s10 = sld [smem:[#allocation23_spill]]  ;;  %v2276_v8 = vld [vmem:[#allocation9] sm:$0xff]  }
  0xce   : > { %2059 = vmatprep.subr.bf16.mxu1 %v2579_v0  ;;  %2063 = vmatprep.mubr.msk.bf16.mxu1 %vm2580_vm0, %v2579_v0  ;;  %s721_s6 = scalar_select %p720_p2, %s2562_s21, 1  ;;  %v2277_v9 = vld [vmem:[#allocation9 + $0x8] sm:$0xff]   ;;  %vm802_vm2 = vcmask 60416   ;;  %vm1003_vm3 = vcmask 64512   ;;  %v1964_v28 = vld [vmem:[#allocation11] ss:$0 sm:$0xff] }
  0xcf   : > { %2060 = vmatpush3.bf16.msra.mxu1 %v2276_v8  ;;  %s3278_s5 = sld [smem:[#allocation28_spill]]  ;;  %s2581_s23 = smov 104   ;;  %vm1247_vm4 = vcmask 1043456   ;;  %vm1438_vm5 = vcmask 126016   ;;  %vm1447_vm6 = vcmask 191616   ;;  %vm1456_vm7 = vcmask 257216  }
  0xd0   : > { %s1958_s26 = sshll.u32 %s721_s6, 3  ;;  %2061 = vmatprep.subr.bf16.mxu1 %v2579_v0  ;;  %s2582_s11 = smov 120   ;;  %vm1664_vm8 = vcmask 523264  }
  0xd1   : > { %s3279_s29 = sld [smem:[#allocation26_spill]]  ;;  %s2583_s16 = smov 112  }
  0xd2   : > { %v2272_v1 = vld [vmem:[%s3275_s4] sm:$0xff]   ;;  %v2273_v2 = vld [vmem:[%s3275_s4 + $0x8] sm:$0xff]   ;;  %s1957_s2 = sshll.u32 %s2918_s7, 4  ;;  %s2585_s24 = smov 24  }
  0xd3   : > { %2052 = vmatpush3.bf16.msra.mxu0 %v2272_v1  ;;  %v2274_v4 = vld [vmem:[%s3276_s15] sm:$0xff]   ;;  %s726_s3 = scalar_lea.vmem %s3277_s10, %s1958_s26  ;;  %v2275_v5 = vld [vmem:[%s3276_s15 + $0x8] sm:$0xff]   ;;  %2062 = vmatpush3.bf16.msra.mxu1 %v2277_v9  ;;  %s3040_s10 = scalar_lea.vmem [#allocation16], %s1957_s2 }
  0xd4   : > { %2053 = vmatprep.subr.bf16.mxu0 %v2579_v0  ;;  %v2959_v6 = vld [vmem:[%s726_s3] sm:$0xff]  ;;  %2075 = vmatprep.subr.bf16.mxu1 %v2579_v0  ;;  %s2584_s3 = smov 8   ;;  %s2586_s14 = smov 16  }
  0xd5   : > { %v905_v7 = vpack.c.bf16 %v2959_v6, %v2959_v6  ;;  %v1959_v10 = vld [vmem:[%s3278_s5] ss:$0 sm:$0xff]  ;;  %s3284_s6 = sld [smem:[#allocation37_spill]]  ;;  %p3286_p10 = scmp.ne.s32.totalorder %s3269_s19, 0 }
  0xd6   : > { %2064 = vmatmul.mubr.msk.bf16.vlgmr.msra.gmra.mrb[0].mxu1 %vm757_vm1, %v733_v3 }
  0xd7   : > { %2054 = vmatpush3.bf16.msra.mxu0 %v2273_v2  ;;  %2077 = vmatprep.mubr.msk.bf16.mxu1 %vm2580_vm0, %v2579_v0  ;;  %v1969_v17 = vld [vmem:[%s3279_s29] ss:$0 sm:$0xff]  ;;  %s3280_s29 = sld [smem:[#allocation36_spill]] }
  0xd8   : > { %2067 = vmatprep.subr.bf16.mxu0 %v2579_v0 }
  0xda   : > { %2056 = vmatmul.mubr.msk.bf16.vlgmr.msra.gmra.mrb[0].mxu0 %vm757_vm1, %v733_v3 }
  0xdb   : > { %2068 = vmatpush3.bf16.msra.mxu0 %v2274_v4  ;;  %2071 = vmatprep.mubr.msk.bf16.mxu0 %vm2580_vm0, %v2579_v0 }
  0xdc   : > { %2069 = vmatprep.subr.bf16.mxu0 %v2579_v0 }
  0xdf   : > { %2070 = vmatpush3.bf16.msra.mxu0 %v2275_v5 }
  0xe0   : > { %2081 = vmatprep.subr.bf16.mxu0 %v2579_v0 }
  0xe2   : > { %2072 = vmatmul.mubr.msk.bf16.vlgmr.msra.gmra.mrb[4].mxu0 %vm757_vm1, %v905_v7 }
  0xe3   : > { %2083 = vmatprep.mubr.msk.bf16.mxu0 %vm2580_vm0, %v2579_v0 }
 0x1a9   : > { %v879_v29 = vpop.f32.mrb[0].mxu1 }
 0x1aa   : > { %v880_v30 = vadd.f32 %v1964_v28, %v879_v29  ;;  %v2065_v31 = vpop.f32.mrb[1].mxu1 }
 0x1ab   : > { %v882_v32 = vpop.f32.mrb[2].mxu1 }
 0x1ac   : > { %v2995_v33 = vpack.c.bf16 %v880_v30, %v880_v30  ;;  %v2066_v34 = vpop.f32.mrb[3].mxu1 }
 0x1ad   : > { %v795_v11 = vpop.f32.mrb[0].mxu0 }
 0x1ae   : > { %v796_v12 = vadd.f32 %v1959_v10, %v795_v11  ;;  %v2057_v13 = vpop.f32.mrb[1].mxu0  ;;  %886 = vst.msk [vmem:[#allocation3] sm:$0xf] %vm802_vm2, %v2995_v33 }
 0x1af   : > { %v798_v14 = vpop.f32.mrb[2].mxu0 }
 0x1b0   : > { %v801_v15 = vpack.c.bf16 %v796_v12, %v796_v12  ;;  %v2058_v16 = vpop.f32.mrb[3].mxu0 }
 0x1b2   : > { %803 = vst.msk [vmem:[#allocation2] sm:$0xf] %vm802_vm2, %v801_v15  ;;  %817 = vrot.lane.b32.xlu1 %v801_v15, %s2581_s23  ;;  %807 = vrot.lane.b32.xlu0 %v801_v15, %s2582_s11 }
 0x1b5   : > { %v967_v18 = vpop.f32.mrb[4].mxu0  ;;  %v1240_v50 = vld [vmem:[#allocation3] sm:$0xf] }
 0x1b6   : > { %v968_v19 = vadd.f32 %v1969_v17, %v967_v18  ;;  %812 = vrot.lane.b32.xlu0 %v801_v15, %s2583_s16  ;;  %v2073_v20 = vpop.f32.mrb[5].mxu0  ;;  %v1249_v51 = vsel %vm1247_vm4, %v1240_v50, 0 }
 0x1b7   : > { %v970_v21 = vpop.f32.mrb[6].mxu0 }
 0x1b8   : > { %v973_v22 = vmul.f32 0.17677669, %v968_v19  ;;  %v2074_v23 = vpop.f32.mrb[7].mxu0 }
 0x1b9   : > { %v999_v24 = vld [vmem:[#allocation2] sm:$0xf] }
 0x1ba   : > { %v974_v25 = vpack.c.bf16 %v973_v22, %v973_v22  ;;  %v1008_v26 = vsel %vm1003_vm3, %v999_v24, 0 }
 0x1bb   : > { %2076 = vmatpush3.bf16.xpose.msra.mxu1 %v1008_v26 }
 0x1bc   : > { %976 = vst.msk [vmem:[#allocation4] sm:$0xf] %vm802_vm2, %v974_v25  ;;  %985 = vrot.lane.b32.xlu0 %v974_v25, %s2583_s16  ;;  %980 = vrot.lane.b32.xlu1 %v974_v25, %s2582_s11 }
 0x1bd   : > { %2087 = vmatprep.subr.bf16.mxu1 %v2579_v0 }
 0x1c0   : > { %990 = vrot.lane.b32.xlu1 %v974_v25, %s2581_s23 }
 0x1c3   : > { %v995_v27 = vld [vmem:[#allocation4] sm:$0xf] }
 0x1c4   : > { %2078 = vmatmul.mubr.msk.bf16.vlgmr.msra.gmra.mrb[4].mxu1 %vm1003_vm3, %v995_v27 }
 0x1c5   : > { %2089 = vmatprep.mubr.msk.bf16.mxu1 %vm2580_vm0, %v2579_v0 }
 0x224   : > { %v818_v35 = vpop.permute.xlu1 %817  ;;  %v808_v36 = vpop.permute.xlu0 %807 }
 0x225   : > { %821 = vst.msk [vmem:[#allocation2 + $0xc] sm:$0xf] %vm802_vm2, %v818_v35  ;;  %811 = vst.msk [vmem:[#allocation2 + $0x4] sm:$0xf] %vm802_vm2, %v808_v36 }
 0x228   : > { %v813_v37 = vpop.permute.xlu0 %812 }
 0x229   : > { %816 = vst.msk [vmem:[#allocation2 + $0x8] sm:$0xf] %vm802_vm2, %v813_v37 }
 0x22c   : > { %v1000_v38 = vld [vmem:[#allocation2 + $0x4] sm:$0xf]  ;;  %v1002_v45 = vld [vmem:[#allocation2 + $0xc] sm:$0xf] }
 0x22d   : > { %v1054_v39 = vsel %vm1003_vm3, %v1000_v38, 0  ;;  %v1146_v47 = vsel %vm1003_vm3, %v1002_v45, 0 }
 0x22e   : > { %2082 = vmatpush3.bf16.xpose.msra.mxu0 %v1054_v39  ;;  %v986_v40 = vpop.permute.xlu0 %985  ;;  %v981_v41 = vpop.permute.xlu1 %980 }
 0x22f   : > { %989 = vst.msk [vmem:[#allocation4 + $0x8] sm:$0xf] %vm802_vm2, %v986_v40  ;;  %984 = vst.msk [vmem:[#allocation4 + $0x4] sm:$0xf] %vm802_vm2, %v981_v41  ;;  %2093 = vmatprep.subr.bf16.mxu0 %v2579_v0 }
 0x230   : > { %v1001_v42 = vld [vmem:[#allocation2 + $0x8] sm:$0xf] }
 0x231   : > { %v1100_v43 = vsel %vm1003_vm3, %v1001_v42, 0 }
 0x232   : > { %v991_v44 = vpop.permute.xlu1 %990  ;;  %2088 = vmatpush3.bf16.xpose.msra.mxu1 %v1100_v43 }
 0x233   : > { %994 = vst.msk [vmem:[#allocation4 + $0xc] sm:$0xf] %vm802_vm2, %v991_v44  ;;  %2099 = vmatprep.subr.bf16.mxu1 %v2579_v0 }
 0x236   : > { %v996_v46 = vld [vmem:[#allocation4 + $0x4] sm:$0xf]  ;;  %v997_v48 = vld [vmem:[#allocation4 + $0x8] sm:$0xf] }
 0x237   : > { %2084 = vmatmul.mubr.msk.bf16.vlgmr.msra.gmra.mrb[8].mxu0 %vm1003_vm3, %v996_v46 }
 0x238   : > { %2094 = vmatpush3.bf16.xpose.msra.mxu0 %v1146_v47  ;;  %2095 = vmatprep.mubr.msk.bf16.mxu0 %vm2580_vm0, %v2579_v0 }
 0x239   : > { %2090 = vmatmul.mubr.msk.bf16.vlgmr.msra.gmra.mrb[8].mxu1 %vm1003_vm3, %v997_v48  ;;  %2105 = vmatprep.subr.bf16.mxu0 %v2579_v0 }
 0x23a   : > { %2101 = vmatprep.mubr.msk.bf16.mxu1 %vm2580_vm0, %v2579_v0  ;;  %v998_v49 = vld [vmem:[#allocation4 + $0xc] sm:$0xf]  ;;  %2100 = vmatpush3.bf16.msra.mxu1 %v1249_v51 }
 0x23b   : > { %2111 = vmatprep.subr.bf16.mxu1 %v2579_v0 }
 0x23f   : > { %2096 = vmatmul.mubr.msk.bf16.vlgmr.msra.gmra.mrb[12].mxu0 %vm1003_vm3, %v998_v49 }
 0x240   : > { %2107 = vmatprep.mubr.msk.bf16.mxu0 %vm2580_vm0, %v2579_v0 }
 0x297   : > { %v1044_v52 = vpop.f32.mrb[4].mxu1 }
 0x298   : > { %v2079_v53 = vpop.f32.mrb[5].mxu1  ;;  %v1188_v54 = vsel %vm1003_vm3, %v1044_v52, -inf }
 0x299   : > { %1189 = vmax.xlane.f32.xlu0 %v1188_v54  ;;  %v1047_v55 = vpop.f32.mrb[6].mxu1 }
 0x29a   : > { %v2080_v56 = vpop.f32.mrb[7].mxu1 }
 0x30a   : > { %v1090_v57 = vpop.f32.mrb[8].mxu0 }
 0x30b   : > { %v2085_v58 = vpop.f32.mrb[9].mxu0  ;;  %v1191_v59 = vsel %vm1003_vm3, %v1090_v57, -inf }
 0x30c   : > { %v1136_v60 = vpop.f32.mrb[8].mxu1  ;;  %1192 = vmax.xlane.f32.xlu1 %v1191_v59  ;;  %v1093_v61 = vpop.f32.mrb[10].mxu0 }
 0x30d   : > { %v2086_v62 = vpop.f32.mrb[11].mxu0  ;;  %v2091_v63 = vpop.f32.mrb[9].mxu1  ;;  %v1194_v1 = vsel %vm1003_vm3, %v1136_v60, -inf  ;;  %v2278_v61 = vld [vmem:[#allocation12] sm:$0xff]  }
 0x30e   : > { %1195 = vmax.xlane.f32.xlu0 %v1194_v1  ;;  %v1139_v2 = vpop.f32.mrb[10].mxu1 }
 0x30f   : > { %v2092_v3 = vpop.f32.mrb[11].mxu1  ;;  %v2279_v2 = vld [vmem:[#allocation12 + $0x8] sm:$0xff]  }
 0x312   : > { %v1182_v4 = vpop.f32.mrb[12].mxu0 }
 0x313   : > { %v2097_v5 = vpop.f32.mrb[13].mxu0  ;;  %v1197_v7 = vsel %vm1003_vm3, %v1182_v4, -inf }
 0x314   : > { %1198 = vmax.xlane.f32.xlu0 %v1197_v7  ;;  %v1185_v8 = vpop.f32.mrb[14].mxu0 }
 0x315   : > { %v2098_v9 = vpop.f32.mrb[15].mxu0 }
 0x31d   : > { %890 = vrot.lane.b32.xlu1 %v2995_v33, %s2582_s11  ;;  %s1772_s11 = sshll.u32 %s3040_s10, 4  ;;  %s3121_s11 = int_to_ptr.vmem [resolvable:$true] %s1772_s11 }
 0x326   : > { %v1190_v10 = vpop.xlane.xlu0 %1189 }
 0x327   : > { %v1200_v11 = vsub.f32 %v1044_v52, %v1190_v10 }
 0x329   : > { %v1204_v12 = vmul.f32 1.442695, %v1200_v11 }
 0x32b   : > { %2286 = vpow2.f32 %v1204_v12 }
 0x335   : > { %v2287_v13 = vpop.eup %2286 }
 0x336   : > { %v1212_v14 = vsel %vm1003_vm3, %v2287_v13, 0.0 }
 0x341   : > { %1213 = vadd.xlane.f32.xlu1 %v1212_v14 }
 0x399   : > { %v1193_v15 = vpop.xlane.xlu1 %1192 }
 0x39a   : > { %v1201_v16 = vsub.f32 %v1090_v57, %v1193_v15 }
 0x39b   : > { %v1196_v17 = vpop.xlane.xlu0 %1195 }
 0x39c   : > { %v1206_v18 = vmul.f32 1.442695, %v1201_v16  ;;  %v1202_v19 = vsub.f32 %v1136_v60, %v1196_v17 }
 0x39d   : > { %v891_v20 = vpop.permute.xlu1 %890 }
 0x39e   : > { %2288 = vpow2.f32 %v1206_v18  ;;  %v1208_v21 = vmul.f32 1.442695, %v1202_v19  ;;  %894 = vst.msk [vmem:[#allocation3 + $0x4] sm:$0xf] %vm802_vm2, %v891_v20  ;;  %v1985_v19 = vld [vmem:[#allocation14] ss:$0 sm:$0xff] }
 0x3a0   : > { %2290 = vpow2.f32 %v1208_v21 }
 0x3a1   : > { %v1199_v22 = vpop.xlane.xlu0 %1198 }
 0x3a2   : > { %v1203_v23 = vsub.f32 %v1182_v4, %v1199_v22 }
 0x3a4   : > { %v1210_v24 = vmul.f32 1.442695, %v1203_v23 }
 0x3a5   : > { %v1241_v25 = vld [vmem:[#allocation3 + $0x4] sm:$0xf] }
 0x3a6   : > { %2292 = vpow2.f32 %v1210_v24  ;;  %v1295_v26 = vsel %vm1247_vm4, %v1241_v25, 0 }
 0x3a7   : > { %2106 = vmatpush3.bf16.msra.mxu0 %v1295_v26 }
 0x3a8   : > { %v2289_v27 = vpop.eup %2288  ;;  %2117 = vmatprep.subr.bf16.mxu0 %v2579_v0 }
 0x3a9   : > { %v1215_v28 = vsel %vm1003_vm3, %v2289_v27, 0.0 }
 0x3aa   : > { %v2291_v29 = vpop.eup %2290  ;;  %1216 = vadd.xlane.f32.xlu0 %v1215_v28 }
 0x3ab   : > { %v1218_v30 = vsel %vm1003_vm3, %v2291_v29, 0.0 }
 0x3ac   : > { %1219 = vadd.xlane.f32.xlu1 %v1218_v30 }
 0x3b0   : > { %v2293_v31 = vpop.eup %2292 }
 0x3b1   : > { %v1221_v32 = vsel %vm1003_vm3, %v2293_v31, 0.0 }
 0x3b2   : > { %1222 = vadd.xlane.f32.xlu0 %v1221_v32  ;;  %v2280_v32 = vld [vmem:[%s3220_s12] sm:$0xff]  }
 0x3bd   : > { %900 = vrot.lane.b32.xlu1 %v2995_v33, %s2581_s23  ;;  %s3282_s23 = sld [smem:[#allocation34_spill]] }
 0x3c8   : > { %895 = vrot.lane.b32.xlu0 %v2995_v33, %s2583_s16  ;;  %s3285_s16 = sld [smem:[#allocation41_spill]] }
 0x3ce   : > { %v1214_v34 = vpop.xlane.xlu1 %1213 }
 0x3cf   : > { %2294 = vrcp.f32 %v1214_v34  ;;  %v2281_v34 = vld [vmem:[%s3220_s12 + $0x8] sm:$0xff]  }
 0x3d9   : > { %v2295_v35 = vpop.eup %2294 }
 0x3da   : > { %v1228_v36 = vmul.f32 %v2295_v35, %v2287_v13  ;;  %v2283_v35 = vld [vmem:[%s3280_s29 + $0x8] sm:$0xff]  }
 0x3dc   : > { %v1232_v37 = vpack.c.bf16 %v1228_v36, %v1228_v36 }
 0x3de   : > { %1236 = vst.msk [vmem:[%s3040_s10] sm:$0xf] %vm802_vm2, %v1232_v37  ;;  %2102 = vmatmul.mubr.msk.bf16.vlgmr.msra.gmra.mrb[12].mxu1 %vm1003_vm3, %v1232_v37 }
 0x3df   : > { %2113 = vmatprep.mubr.msk.bf16.mxu1 %vm2580_vm0, %v2579_v0 }
 0x437   : > { %v1217_v38 = vpop.xlane.xlu0 %1216 }
 0x438   : > { %2296 = vrcp.f32 %v1217_v38 }
 0x439   : > { %v1220_v33 = vpop.xlane.xlu1 %1219 }
 0x43a   : > { %2298 = vrcp.f32 %v1220_v33 }
 0x43d   : > { %v901_v39 = vpop.permute.xlu1 %900 }
 0x43e   : > { %904 = vst.msk [vmem:[#allocation3 + $0xc] sm:$0xf] %vm802_vm2, %v901_v39 }
 0x43f   : > { %v1223_v40 = vpop.xlane.xlu0 %1222 }
 0x440   : > { %2300 = vrcp.f32 %v1223_v40 }
 0x442   : > { %v2297_v41 = vpop.eup %2296 }
 0x443   : > { %v1229_v42 = vmul.f32 %v2297_v41, %v2289_v27  ;;  %v896_v43 = vpop.permute.xlu0 %895  ;;  %v1990_v41 = vld [vmem:[%s3282_s23] ss:$0 sm:$0xff]  ;;  %s2006_s23 = sshll.u32 %s2562_s21, 6 }
 0x444   : > { %v2299_v44 = vpop.eup %2298  ;;  %899 = vst.msk [vmem:[#allocation3 + $0x8] sm:$0xf] %vm802_vm2, %v896_v43  ;;  %s3119_s2 = scalar_lea.hbm %s3285_s16, %s2006_s23 }
 0x445   : > { %v1230_v45 = vmul.f32 %v2299_v44, %v2291_v29  ;;  %v1233_v46 = vpack.c.bf16 %v1229_v42, %v1229_v42  ;;  %v1243_v47 = vld [vmem:[#allocation3 + $0xc] sm:$0xf] }
 0x446   : > { %v1387_v48 = vsel %vm1247_vm4, %v1243_v47, 0 }
 0x447   : > { %1237 = vst.msk [vmem:[%s3040_s10 + $0x4] sm:$0xf] %vm802_vm2, %v1233_v46  ;;  %2108 = vmatmul.mubr.msk.bf16.vlgmr.msra.gmra.mrb[16].mxu0 %vm1003_vm3, %v1233_v46  ;;  %v1234_v49 = vpack.c.bf16 %v1230_v45, %v1230_v45  ;;  %v2284_v45 = vld [vmem:[%s3280_s29 + $0x10] sm:$0xff]   ;;  %v2285_v46 = vld [vmem:[%s3280_s29 + $0x18] sm:$0xff]  }
 0x448   : > { %2118 = vmatpush3.bf16.msra.mxu0 %v1387_v48  ;;  %2119 = vmatprep.mubr.msk.bf16.mxu0 %vm2580_vm0, %v2579_v0 }
 0x449   : > { %1238 = vst.msk [vmem:[%s3040_s10 + $0x8] sm:$0xf] %vm802_vm2, %v1234_v49  ;;  %2131 = vmatprep.subr.bf16.mxu0 %v2579_v0 }
 0x44a   : > { %v2301_v50 = vpop.eup %2300 }
 0x44b   : > { %v1231_v51 = vmul.f32 %v2301_v50, %v2293_v31  ;;  %v1242_v52 = vld [vmem:[#allocation3 + $0x8] sm:$0xf] }
 0x44c   : > { %v1341_v53 = vsel %vm1247_vm4, %v1242_v52, 0 }
 0x44d   : > { %2112 = vmatpush3.bf16.msra.mxu1 %v1341_v53  ;;  %v1235_v54 = vpack.c.bf16 %v1231_v51, %v1231_v51 }
 0x44e   : > { %2123 = vmatprep.subr.bf16.mxu1 %v2579_v0 }
 0x44f   : > { %1239 = vst.msk [vmem:[%s3040_s10 + $0xc] sm:$0xf] %vm802_vm2, %v1235_v54  ;;  %2120 = vmatmul.mubr.msk.bf16.vlgmr.msra.gmra.mrb[20].mxu0 %vm1003_vm3, %v1235_v54 }
 0x450   : > { %2114 = vmatmul.mubr.msk.bf16.vlgmr.msra.gmra.mrb[16].mxu1 %vm1003_vm3, %v1234_v49  ;;  %2135 = vmatprep.mubr.msk.bf16.mxu0 %vm2580_vm0, %v2579_v0 }
 0x451   : > { %2127 = vmatprep.mubr.msk.bf16.mxu1 %vm2580_vm0, %v2579_v0  ;;  %2124 = vmatpush3.bf16.msra.mxu1 %v2278_v61 }
 0x452   : > { %2125 = vmatprep.subr.bf16.mxu1 %v2579_v0  ;;  %2132 = vmatpush3.bf16.msra.mxu0 %v2280_v32 }
 0x453   : > { %2133 = vmatprep.subr.bf16.mxu0 %v2579_v0 }
 0x455   : > { %2126 = vmatpush3.bf16.msra.mxu1 %v2279_v2 }
 0x456   : > { %2139 = vmatprep.subr.bf16.mxu1 %v2579_v0  ;;  %2134 = vmatpush3.bf16.msra.mxu0 %v2281_v34 }
 0x4b1   : > { %v1285_v55 = vpop.f32.mrb[12].mxu1 }
 0x4b2   : > { %v1429_v56 = vpack.c.bf16 %v1285_v55, %v1285_v55  ;;  %v2103_v57 = vpop.f32.mrb[13].mxu1 }
 0x4b3   : > { %v1288_v58 = vpop.f32.mrb[14].mxu1 }
 0x4b4   : > { %1430 = vst.msk [vmem:[#allocation5] sm:$0xf] %vm802_vm2, %v1429_v56  ;;  %v2104_v59 = vpop.f32.mrb[15].mxu1 }
 0x51a   : > { %v1331_v60 = vpop.f32.mrb[16].mxu0 }
 0x51b   : > { %v2012_v62 = vpack.c.bf16 %v1331_v60, %v1331_v60  ;;  %v2109_v63 = vpop.f32.mrb[17].mxu0 }
 0x51c   : > { %v1334_v1 = vpop.f32.mrb[18].mxu0 }
 0x51d   : > { %1435 = vrot.lane.b32.xlu1 %v2012_v62, %s2584_s3  ;;  %v2110_v3 = vpop.f32.mrb[19].mxu0  ;;  %s1745_s3 = scalar_lea.sflag [#allocation17], %s2918_s7 }
 0x522   : > { %v1423_v4 = vpop.f32.mrb[20].mxu0 }
 0x523   : > { %v2014_v5 = vpack.c.bf16 %v1423_v4, %v1423_v4  ;;  %v1377_v7 = vpop.f32.mrb[16].mxu1  ;;  %v2121_v8 = vpop.f32.mrb[21].mxu0 }
 0x524   : > { %v2013_v9 = vpack.c.bf16 %v1377_v7, %v1377_v7  ;;  %v2115_v10 = vpop.f32.mrb[17].mxu1  ;;  %v1426_v11 = vpop.f32.mrb[22].mxu0 }
 0x525   : > { %v1380_v12 = vpop.f32.mrb[18].mxu1  ;;  %1453 = vrot.lane.b32.xlu1 %v2014_v5, %s2585_s24  ;;  %v2122_v13 = vpop.f32.mrb[23].mxu0  ;;  %s3283_s24 = sld [smem:[#allocation35_spill]] }
 0x526   : > { %1444 = vrot.lane.b32.xlu0 %v2013_v9, %s2586_s14  ;;  %v2116_v14 = vpop.f32.mrb[19].mxu1  ;;  %s3281_s14 = sld [smem:[#allocation33_spill]] }
 0x52b   : > { %v1991_v47 = vld [vmem:[%s3283_s24] ss:$0 sm:$0xff]  ;;  %s2448_s24 = scalar_lea.vmem %s3121_s11, 256 }
 0x52c   : > { %v1989_v39 = vld [vmem:[%s3281_s14] ss:$0 sm:$0xff]  ;;  %p2449_p9 = scmp.ne.s32.totalorder %s3121_s11, %s2448_s24  ;;  %s2587_s14 = smov [#allocation16]  }
 0x52d   : > { %s2452_s28 = sshll.u32 %s2587_s14, 4  ;;  %s2453_s28 = int_to_ptr.vmem [resolvable:$false] %s2452_s28 }
 0x52e   : > { %p2450_p11 = pnand %p2449_p9, %p3286_p10  ;;  %s2454_s10 = scalar_lea.vmem %s2453_s28, 512 }
 0x52f   : > { %p2455_p7 = scmp.lt.s32.totalorder %s3121_s11, %s2453_s28  ;;  %p2456_p5 = scmp.lt.s32.totalorder %s2454_s10, %s2448_s24 }
 0x530   : > { %p2451_p0 = pneg %p2450_p11 }
 0x531   : > { %p2457_p8 = por %p2456_p5, %p2455_p7 }
 0x533   : > { %p2458_p1 = pnand %p2457_p8, %p2451_p0 }
 0x58f   : > { %v1436_v15 = vpop.permute.xlu1 %1435 }
 0x590   : > { %1439 = vst.msk [vmem:[#allocation5] sm:$0xf] %vm1438_vm5, %v1436_v15 }
 0x597   : > { %v1454_v17 = vpop.permute.xlu1 %1453 }
 0x598   : > { %v1445_v16 = vpop.permute.xlu0 %1444 }
 0x599   : > { %1448 = vst.msk [vmem:[#allocation5] sm:$0xf] %vm1447_vm6, %v1445_v16 }
 0x59a   : > { %1457 = vst.msk [vmem:[#allocation5] sm:$0xf] %vm1456_vm7, %v1454_v17 }
 0x5a1   : > { %v1458_v18 = vld [vmem:[#allocation5] sm:$0xf] }
 0x5a2   : > { %2128 = vmatmul.mubr.msk.bf16.vlgmr.msra.gmra.mrb[20].mxu1 %vm757_vm1, %v1458_v18 }
 0x5a3   : > { %2147 = vmatprep.mubr.msk.bf16.mxu1 %vm2580_vm0, %v2579_v0 }
 0x675   : > { %v1519_v20 = vpop.f32.mrb[20].mxu1 }
 0x676   : > { %v1520_v21 = vadd.f32 %v1985_v19, %v1519_v20  ;;  %v2129_v22 = vpop.f32.mrb[21].mxu1 }
 0x677   : > { %v1522_v23 = vpop.f32.mrb[22].mxu1 }
 0x678   : > { %v2130_v24 = vpop.f32.mrb[23].mxu1  ;;  %v1525_v25 = vadd.f32 %v1520_v21, %v2959_v6  ;;  %v2282_v6 = vld [vmem:[%s3280_s29] sm:$0xff]  }
 0x679   : > { %2140 = vmatpush3.bf16.msra.mxu1 %v2282_v6 }
 0x67a   : > { %v1526_v26 = vsel %vm757_vm1, %v1525_v25, 0.0  ;;  %2141 = vmatprep.subr.bf16.mxu1 %v2579_v0 }
 0x67b   : > { %1527 = vadd.xlane.f32.xlu0 %v1526_v26 }
 0x67d   : > { %2142 = vmatpush3.bf16.msra.mxu1 %v2283_v35 }
 0x67e   : > { %2143 = vmatprep.subr.bf16.mxu1 %v2579_v0 }
 0x681   : > { %2144 = vmatpush3.bf16.msra.mxu1 %v2284_v45 }
 0x682   : > { %2145 = vmatprep.subr.bf16.mxu1 %v2579_v0  ;;  %v1995_v0 = vld [vmem:[%s3284_s6] ss:$0 sm:$0xff] }
 0x685   : > { %2146 = vmatpush3.bf16.msra.mxu1 %v2285_v46 }
 0x708   : > { %v1528_v27 = vpop.xlane.xlu0 %1527 }
 0x709   : > { %v1530_v28 = vmul.f32 0.03125, %v1528_v27 }
 0x70b   : > { %v1531_v29 = vsub.f32 %v1525_v25, %v1530_v28 }
 0x70d   : > { %v1532_v30 = vmul.f32 %v1531_v29, %v1531_v29 }
 0x70f   : > { %v1533_v31 = vsel %vm757_vm1, %v1532_v30, 0.0 }
 0x710   : > { %1534 = vadd.xlane.f32.xlu1 %v1533_v31 }
 0x79d   : > { %v1535_v36 = vpop.xlane.xlu1 %1534 }
 0x79e   : > { %v1536_v37 = vmul.f32 0.03125, %v1535_v36 }
 0x7a0   : > { %v1537_v38 = vadd.f32 1e-05, %v1536_v37 }
 0x7a2   : > { %2302 = vrsqrt.f32 %v1537_v38 }
 0x7ac   : > { %v2303_v33 = vpop.eup %2302 }
 0x7ad   : > { %v1539_v40 = vmul.f32 %v2303_v33, %v1531_v29 }
 0x7af   : > { %v1547_v42 = vmul.f32 %v1989_v39, %v1539_v40 }
 0x7b1   : > { %v1555_v43 = vadd.f32 %v1990_v41, %v1547_v42 }
 0x7b3   : > { %v1556_v44 = vpack.c.bf16 %v1555_v43, %v1555_v43 }
 0x7b5   : > { %2136 = vmatmul.mubr.msk.bf16.vlgmr.msra.gmra.mrb[24].mxu0 %vm757_vm1, %v1556_v44 }
 0x888   : > { %v1617_v48 = vpop.f32.mrb[24].mxu0 }
 0x889   : > { %v1618_v49 = vadd.f32 %v1991_v47, %v1617_v48  ;;  %v2137_v50 = vpop.f32.mrb[25].mxu0 }
 0x88a   : > { %v1620_v51 = vpop.f32.mrb[26].mxu0 }
 0x88b   : > { %v1623_v52 = vmax.f32 %v1618_v49, 0.0  ;;  %v2138_v53 = vpop.f32.mrb[27].mxu0 }
 0x88d   : > { %v1624_v54 = vpack.c.bf16 %v1623_v52, %v1623_v52 }
 0x88f   : > { %2148 = vmatmul.mubr.msk.bf16.vlgmr.msra.gmra.mrb[24].mxu1 %vm1664_vm8, %v1624_v54 }
 0x962   : > { %v1702_v55 = vpop.f32.mrb[24].mxu1 }
 0x963   : > { %v1703_v56 = vadd.f32 %v1995_v0, %v1702_v55  ;;  %v2149_v57 = vpop.f32.mrb[25].mxu1 }
 0x964   : > { %v1705_v58 = vpop.f32.mrb[26].mxu1 }
 0x965   : > { %v2150_v59 = vpop.f32.mrb[27].mxu1  ;;  %v1708_v60 = vadd.f32 %v1703_v56, %v1555_v43 }
 0x967   : > { %v1709_v61 = vsel %vm757_vm1, %v1708_v60, 0.0 }
 0x968   : > { %1710 = vadd.xlane.f32.xlu0 %v1709_v61 }
 0x9f5   : > { %v1711_v62 = vpop.xlane.xlu0 %1710 }
 0x9f6   : > { %v1712_v63 = vmul.f32 0.03125, %v1711_v62 }
 0x9f8   : > { %v1713_v1 = vsub.f32 %v1708_v60, %v1712_v63 }
 0x9fa   : > { %v1714_v2 = vmul.f32 %v1713_v1, %v1713_v1 }
 0x9fc   : > { %v1715_v3 = vsel %vm757_vm1, %v1714_v2, 0.0 }
 0x9fd   : > { %1716 = vadd.xlane.f32.xlu0 %v1715_v3 }
 0x9fe   : > { %2461 = shalt.err (!%p2458_p1)
}
 0x9ff   : > { %s2462_s6 = scalar_lea.hbm %s3119_s2, 256  ;;  %s2466_s13 = scalar_lea.hbm %s3285_s16, 512 }
 0xa00   : > { %p2463_p3 = scmp.ne.s32.totalorder %s3119_s2, %s2462_s6  ;;  %p2467_p12 = scmp.lt.u32.totalorder %s3119_s2, %s3285_s16 }
 0xa01   : > { %p2468_p4 = scmp.lt.u32.totalorder %s2466_s13, %s2462_s6  ;;  %p2470_p9 = scmp.lt.u32.totalorder %s2462_s6, %s3119_s2 }
 0xa02   : > { %p2464_p6 = pnand %p2463_p3, %p3286_p10 }
 0xa03   : > { %p2469_p2 = por %p2468_p4, %p2467_p12 }
 0xa04   : > { %p2465_p13 = pneg %p2464_p6 }
 0xa05   : > { %p2471_p11 = por %p2470_p9, %p2469_p2 }
 0xa07   : > { %p2472_p0 = pnand %p2471_p11, %p2465_p13 }
 0xa09   : > { %2475 = shalt.err (!%p2472_p0)
}
 0xa0a   : > { %s2588_s24 = smov 64   ;;  %s2589_s10 = smov 128  }
 0xa0b   : > { %s2590_s23 = smov 4   ;;  %s1956_s6 = sshll.u32 %s2918_s7, 3 }
 0xa0c   : > { %2170 = dma.vmem_to_hbm [thread:$0]  (%p3286_p10), %s3121_s11, 256, %s3119_s2, %s1745_s3, %s2588_s24, %s2589_s10, %s2590_s23  }
 0xa0d   : > { %s3287_s14 = sld [smem:[#allocation38_spill]]  ;;  %s3288_s5 = sld [smem:[#allocation39_spill]] }
 0xa0e   : > { %s2005_s8 = sshll.u32 %s2562_s21, 7  ;;  %s712_s9 = scalar_lea.vmem [#allocation15], %s1956_s6 }
 0xa0f   : > { %s1759_s11 = sshll.u32 %s712_s9, 4  ;;  %s3289_s24 = sld [smem:[#allocation40_spill]]  ;;  %s3160_s11 = int_to_ptr.vmem [resolvable:$true] %s1759_s11 }
 0xa10   : > { %s1740_s23 = scalar_lea.sflag [#allocation8], %s2918_s7  ;;  %s2476_s4 = scalar_lea.vmem %s3160_s11, 128 }
 0xa11   : > { %p2477_p7 = scmp.ne.s32.totalorder %s3160_s11, %s2476_s4 }
 0xa13   : > { %v2001_v9 = vld [vmem:[%s3287_s14] ss:$0 sm:$0xff]  ;;  %p2478_p5 = pnand %p2477_p7, %p3286_p10 }
 0xa14   : > { %v2002_v11 = vld [vmem:[%s3288_s5] ss:$0 sm:$0xff]  ;;  %s2591_s5 = smov [#allocation15]  }
 0xa15   : > { %s3158_s10 = scalar_lea.hbm %s3289_s24, %s2005_s8  ;;  %p2479_p8 = pneg %p2478_p5 }
 0xa16   : > { %s2480_s21 = sshll.u32 %s2591_s5, 4  ;;  %s2481_s21 = int_to_ptr.vmem [resolvable:$false] %s2480_s21 }
 0xa17   : > { %s2482_s6 = scalar_lea.vmem %s2481_s21, 256  ;;  %p2483_p1 = scmp.lt.s32.totalorder %s3160_s11, %s2481_s21 }
 0xa18   : > { %p2484_p3 = scmp.lt.s32.totalorder %s2482_s6, %s2476_s4 }
 0xa1a   : > { %p2485_p6 = por %p2484_p3, %p2483_p1 }
 0xa1c   : > { %p2486_p13 = pnand %p2485_p6, %p2479_p8 }
 0xa8a   : > { %v1717_v4 = vpop.xlane.xlu0 %1716 }
 0xa8b   : > { %v1718_v5 = vmul.f32 0.03125, %v1717_v4 }
 0xa8d   : > { %v1719_v7 = vadd.f32 1e-05, %v1718_v5 }
 0xa8f   : > { %2304 = vrsqrt.f32 %v1719_v7 }
 0xa99   : > { %v2305_v8 = vpop.eup %2304 }
 0xa9a   : > { %v1721_v10 = vmul.f32 %v2305_v8, %v1713_v1 }
 0xa9c   : > { %v1729_v12 = vmul.f32 %v2001_v9, %v1721_v10 }
 0xa9e   : > { %v1737_v13 = vadd.f32 %v2002_v11, %v1729_v12 }
 0xaa0   : > { %1738 = vst.msk [vmem:[%s712_s9] sm:$0xff] %vm757_vm1, %v1737_v13 }
 0xaa1   : > { %2489 = shalt.err (!%p2486_p13)
}
 0xaa2   : > { %s2490_s8 = scalar_lea.hbm %s3158_s10, 128  ;;  %s2494_s26 = scalar_lea.hbm %s3289_s24, 256 }
 0xaa3   : > { %p2491_p12 = scmp.ne.s32.totalorder %s3158_s10, %s2490_s8  ;;  %p2495_p9 = scmp.lt.u32.totalorder %s3158_s10, %s3289_s24 }
 0xaa4   : > { %p2496_p11 = scmp.lt.u32.totalorder %s2494_s26, %s2490_s8  ;;  %p2498_p7 = scmp.lt.u32.totalorder %s2490_s8, %s3158_s10 }
 0xaa5   : > { %p2492_p4 = pnand %p2491_p12, %p3286_p10 }
 0xaa6   : > { %p2497_p0 = por %p2496_p11, %p2495_p9 }
 0xaa7   : > { %p2493_p2 = pneg %p2492_p4 }
 0xaa8   : > { %p2499_p5 = por %p2498_p7, %p2497_p0 }
 0xaaa   : > { %p2500_p8 = pnand %p2499_p5, %p2493_p2 }
 0xaac   : > { %2503 = shalt.err (!%p2500_p8)
}
 0xaad   : > { %2169 = dma.vmem_to_hbm [thread:$0]  (%p3286_p10), %s3160_s11, 128, %s3158_s10, %s1740_s23  }
 0xaae PF: > { %s1787_s28 = sand.u32 1, %s2550_s0   ;;  %p3290_p1 = scmp.ne.s32.totalorder %s3270_s27, 0 }
 0xaaf   : > { %p3291_p3 = scmp.ge.s32.totalorder %s2570_s22, 2  ;;  %s1788_s2 = scalar_lea.sflag [#allocation8], %s1787_s28 }
 0xab1   : > { %p2191_p6 = pnand %p3291_p3, %p3290_p1 }
 0xab3   : > { %2541 = dma.done.wait (!%p2191_p6), %s1788_s2, 128  }
 0xab4   : > { %2543 = vsyncadd (!%p2191_p6), %s1788_s2, 4294967168  ;;  %s1797_s3 = scalar_lea.sflag [#allocation17], %s1787_s28 }
 0xab5   : > { %2545 = dma.done.wait (!%p2191_p6), %s1797_s3, 256  }
 0xab6   : > { %2547 = vsyncadd (!%p2191_p6), %s1797_s3, 4294967040  ;;  %s41_s22 = sadd.s32 1, %s2570_s22   ;;  %s3292_s0 = smov %s2554_s30 }
 0xab7   : > { %p38_p13 = scmp.ge.s32.totalorder %s41_s22, 4   ;;  %s3293_s30 = smov %s2558_s20 }
 0xab8   : > { %s3294_s20 = smov %s2868_s25  ;;  %s3295_s21 = smov %s2566_s1 }
 0xab9   : > { %s3296_s1 = smov %s3298_s17  ;;  %40 = sbr.rel (!%p38_p13) target bundleno = 30 (0x1e), region = 186 }
 0xac0   :  { %1802 = vsyncpa [#allocation7], 1 }
 0xac1   :  { %1804 = vsyncpa [#allocation7 + $0x1], 1 }
 0xac2   :  { %1805 = vsyncpa [#allocation10], 1 }
 0xac3   :  { %1806 = vsyncpa [#allocation13], 1 }
 0xac4   :  { %1807 = vsyncpa [#allocation8], 1 }
 0xac5   :  { %1809 = vsyncpa [#allocation8 + $0x1], 1 }
 0xac6   :  { %1810 = vsyncpa [#allocation17], 1 }
 0xac7   :  { %1812 = vsyncpa [#allocation17 + $0x1], 1 }

</bundles_post_ra>
